<compile_context>
chip_gen: v6e
topology: v6e:2x2x1
jax: 0.10.0
libtpu: 0.0.40
codegen_flags: <defaults>
</compile_context>

<pallas_src>
import jax
import jax.numpy as jnp
from jax import lax
from jax.experimental import pallas as pl
from jax.experimental.pallas import tpu as pltpu


# ----------------------------------------------------------------------------
# backend / hardware detection (all failures fall back to safe defaults)
# ----------------------------------------------------------------------------
def _backend():
    try:
        return jax.default_backend()
    except Exception:
        return "cpu"


_ON_TPU = _backend() == "tpu"
# bf16 MXU matmuls on real TPU; f32 elsewhere (CPU / interpret DotThunk does
# not support BF16 x BF16 = F32, which was the previous runtime failure).
_MATMUL_DTYPE = jnp.bfloat16 if _ON_TPU else jnp.float32
_MATMUL_BYTES = jnp.dtype(_MATMUL_DTYPE).itemsize


def _device_kind():
    try:
        return jax.devices()[0].device_kind.lower()
    except Exception:
        return ""


_KIND = _device_kind()
_IS_V5E = ("v5 lite" in _KIND) or ("v5e" in _KIND) or ("v5litepod" in _KIND)
_IS_V7 = "v7" in _KIND


def _vmem_limit_bytes():
    cap = 128 * 1024 * 1024
    if _ON_TPU:
        try:
            cap = int(getattr(pltpu.get_tpu_info(), "vmem_capacity_bytes", cap))
        except Exception:
            pass
    # Leave headroom: ~48 MiB on v7x (64 MiB physical), ~96 MiB on v5e/v6e.
    return min(cap * 3 // 4, 112 * 1024 * 1024)


_VMEM_LIMIT_BYTES = _vmem_limit_bytes()

_COMPILER_PARAMS = pltpu.CompilerParams(
    dimension_semantics=("parallel", "arbitrary"),  # batch blocks x time chunks
    vmem_limit_bytes=_VMEM_LIMIT_BYTES,
)


def _supports_buffered():
    if not hasattr(pl, "Buffered"):
        return False
    try:
        pl.BlockSpec((8, 128), lambda i, j: (0, 0), pipeline_mode=pl.Buffered(1))
        return True
    except TypeError:
        return False


_HAS_BUFFERED = _supports_buffered()


def _resident_spec(block_shape, index_map):
    """BlockSpec for a constant-index (resident) operand: single-buffered."""
    if _HAS_BUFFERED:
        return pl.BlockSpec(block_shape, index_map, pipeline_mode=pl.Buffered(1))
    return pl.BlockSpec(block_shape, index_map)


# ----------------------------------------------------------------------------
# small helpers
# ----------------------------------------------------------------------------
def _round_up(n, m):
    return ((n + m - 1) // m) * m


def _pad_axis(a, axis, new_size):
    pad = [(0, 0)] * a.ndim
    pad[axis] = (0, new_size - a.shape[axis])
    return jnp.pad(a, pad)


def _batch_tiles(batch):
    """(padded batch, batch block), generation-aware."""
    if batch > 128:
        b_pad = _round_up(batch, 128)
        if (not _IS_V5E) and b_pad % 256 == 0:
            return b_pad, 256          # fill the 256-row MXU on v6e / v7x
        return b_pad, 128              # v5e: 128-row LHS already fills its MXU
    if _IS_V7 and batch > 16:
        b_pad = _round_up(batch, 32)
        return b_pad, b_pad // 2       # two batch blocks -> both TensorCores
    # bf16 operands tile as (16,128): pad tiny batches to 16 sublanes.
    b_pad = _round_up(max(batch, 16), 16)
    return b_pad, b_pad


def _pick_time_chunk(T, b_blk, h_pad, c_pad, max_chunk=64):
    """Largest time chunk (divisor of T, <= max_chunk) fitting the VMEM budget."""
    n_res = 1 if _HAS_BUFFERED else 2            # buffers per resident operand
    budget = int(_VMEM_LIMIT_BYTES * 0.8)
    fixed = (n_res * h_pad * 4 * h_pad * _MATMUL_BYTES          # resident W_hh
             + n_res * (h_pad * c_pad * _MATMUL_BYTES + c_pad * 4)  # FC w + b
             + n_res * 4 * h_pad * 4                            # resident bias
             + 2 * b_blk * c_pad * 4                            # logits block
             + 2 * b_blk * h_pad * 4)                           # h / c scratch
    per_t = (2 * b_blk * 4 * h_pad * _MATMUL_BYTES              # gx chunk x2 bufs
             + 2 * b_blk * h_pad * _MATMUL_BYTES)               # hidden-out chunk
    tc_cap = max(1, (budget - fixed) // per_t)
    tc = int(min(T, max_chunk, tc_cap))
    # TODO(synk): mask a padded tail chunk instead of shrinking to a divisor.
    while T % tc != 0:
        tc -= 1
    return max(tc, 1)


# ----------------------------------------------------------------------------
# Pallas kernels: the sequential LSTM recurrence (input projection is hoisted)
# ----------------------------------------------------------------------------
def _run_chunk(gx_ref, bias, whh, h0, c0, out_ref=None):
    """Run all timesteps of the current chunk.

    gx_ref : (Tc, B_blk, 4*H_pad)  matmul-dtype  precomputed x @ W_ih^T
    bias   : (1, 4*H_pad)          f32           b_ih + b_hh (resident)
    whh    : (H_pad, 4*H_pad)      matmul-dtype  resident recurrent weight
    h0/c0  : (B_blk, H_pad)        f32           incoming state
    out_ref: optional (Tc, B_blk, H_pad) output ref (per-step hidden states)
    """
    t_chunk = gx_ref.shape[0]
    h_pad = h0.shape[-1]

    # vreg-pressure-aware unroll: full unroll for small gate tiles, partial
    # otherwise so live (B_blk, 4*H_pad) f32 gates don't force VMEM spills.
    gate_bytes = h0.shape[0] * 4 * h_pad * 4
    unroll = True if gate_bytes <= 256 * 1024 else min(int(t_chunk), 8)

    def step(s, carry):
        h, c = carry
        gates = (gx_ref[s].astype(jnp.float32) + bias
                 + jnp.dot(h.astype(whh.dtype), whh,
                           preferred_element_type=jnp.float32))
        # PyTorch gate order [i, f, g, o]; slices are lane-tile aligned.
        i_g = jax.nn.sigmoid(gates[:, 0 * h_pad:1 * h_pad])
        f_g = jax.nn.sigmoid(gates[:, 1 * h_pad:2 * h_pad])
        g_g = jnp.tanh(gates[:, 2 * h_pad:3 * h_pad])
        o_g = jax.nn.sigmoid(gates[:, 3 * h_pad:4 * h_pad])
        c_new = f_g * c + i_g * g_g
        h_new = o_g * jnp.tanh(c_new)
        if out_ref is not None:
            out_ref[s] = h_new.astype(out_ref.dtype)
        return h_new, c_new

    return lax.fori_loop(0, t_chunk, step, (h0, c0), unroll=unroll)


def lstm_seq_kernel(gx_ref, bias_ref, whh_ref, out_ref, h_ref, c_ref):
    """Intermediate LSTM layer: emits the full hidden-state sequence."""
    t_idx = pl.program_id(1)

    @pl.when(t_idx == 0)
    def _():
        h_ref[...] = jnp.zeros_like(h_ref)
        c_ref[...] = jnp.zeros_like(c_ref)

    whh = whh_ref[...]          # hoisted out of the timestep loop
    bias = bias_ref[...]
    h, c = _run_chunk(gx_ref, bias, whh, h_ref[...], c_ref[...], out_ref=out_ref)
    h_ref[...] = h
    c_ref[...] = c


def lstm_final_fc_kernel(gx_ref, bias_ref, whh_ref, wfc_ref, bfc_ref,
                         logits_ref, h_ref, c_ref):
    """Final LSTM layer with the FC head fused into the last time chunk."""
    t_idx = pl.program_id(1)

    @pl.when(t_idx == 0)
    def _():
        h_ref[...] = jnp.zeros_like(h_ref)
        c_ref[...] = jnp.zeros_like(c_ref)

    whh = whh_ref[...]
    bias = bias_ref[...]
    h, c = _run_chunk(gx_ref, bias, whh, h_ref[...], c_ref[...], out_ref=None)
    h_ref[...] = h
    c_ref[...] = c

    @pl.when(t_idx == pl.num_programs(1) - 1)
    def _():
        logits_ref[...] = (
            jnp.dot(h.astype(wfc_ref.dtype), wfc_ref[...],
                    preferred_element_type=jnp.float32)
            + bfc_ref[...]
        )


# ----------------------------------------------------------------------------
# pallas_call wrappers
# ----------------------------------------------------------------------------
def run_lstm_seq_layer(gx, bias, w_hh_t, *, b_blk, t_chunk):
    """gx: (T, B_pad, 4*H_pad) -> hidden sequence (T, B_pad, H_pad)."""
    T, B_pad, G = gx.shape
    H_pad = w_hh_t.shape[0]
    n_b, n_t = B_pad // b_blk, T // t_chunk
    return pl.pallas_call(
        lstm_seq_kernel,
        out_shape=jax.ShapeDtypeStruct((T, B_pad, H_pad), _MATMUL_DTYPE),
        grid_spec=pltpu.PrefetchScalarGridSpec(
            num_scalar_prefetch=0,
            grid=(n_b, n_t),
            in_specs=[
                pl.BlockSpec((t_chunk, b_blk, G), lambda b, t: (t, b, 0)),
                _resident_spec((1, G), lambda b, t: (0, 0)),        # bias
                _resident_spec((H_pad, G), lambda b, t: (0, 0)),    # W_hh
            ],
            out_specs=pl.BlockSpec((t_chunk, b_blk, H_pad),
                                   lambda b, t: (t, b, 0)),
            scratch_shapes=[
                pltpu.VMEM((b_blk, H_pad), jnp.float32),  # h state
                pltpu.VMEM((b_blk, H_pad), jnp.float32),  # c state
            ],
        ),
        compiler_params=_COMPILER_PARAMS,
    )(gx, bias, w_hh_t)


def run_lstm_final_layer(gx, bias, w_hh_t, w_fc_t, b_fc, *, b_blk, t_chunk):
    """Final layer + fused FC head -> padded logits (B_pad, C_pad) f32."""
    T, B_pad, G = gx.shape
    H_pad = w_hh_t.shape[0]
    C_pad = w_fc_t.shape[1]
    n_b, n_t = B_pad // b_blk, T // t_chunk
    return pl.pallas_call(
        lstm_final_fc_kernel,
        out_shape=jax.ShapeDtypeStruct((B_pad, C_pad), jnp.float32),
        grid_spec=pltpu.PrefetchScalarGridSpec(
            num_scalar_prefetch=0,
            grid=(n_b, n_t),
            in_specs=[
                pl.BlockSpec((t_chunk, b_blk, G), lambda b, t: (t, b, 0)),
                _resident_spec((1, G), lambda b, t: (0, 0)),        # bias
                _resident_spec((H_pad, G), lambda b, t: (0, 0)),    # W_hh
                _resident_spec((H_pad, C_pad), lambda b, t: (0, 0)),  # W_fc
                _resident_spec((1, C_pad), lambda b, t: (0, 0)),      # b_fc
            ],
            out_specs=pl.BlockSpec((b_blk, C_pad), lambda b, t: (b, 0)),
            scratch_shapes=[
                pltpu.VMEM((b_blk, H_pad), jnp.float32),
                pltpu.VMEM((b_blk, H_pad), jnp.float32),
            ],
        ),
        compiler_params=_COMPILER_PARAMS,
    )(gx, bias, w_hh_t, w_fc_t, b_fc)


# ----------------------------------------------------------------------------
# parameter init (PyTorch layout) and device-side preparation (pad + cast)
# ----------------------------------------------------------------------------
def init_params(key, input_size, hidden_size, num_layers, num_classes):
    """Raw PyTorch-shaped f32 params, U(-1/sqrt(H), 1/sqrt(H))."""
    k = 1.0 / (float(hidden_size) ** 0.5)
    raw = {"lstm": [], "fc_w": None, "fc_b": None}
    for layer in range(num_layers):
        d_in = input_size if layer == 0 else hidden_size
        key, k1, k2, k3, k4 = jax.random.split(key, 5)
        raw["lstm"].append(dict(
            w_ih=jax.random.uniform(k1, (4 * hidden_size, d_in), jnp.float32, -k, k),
            w_hh=jax.random.uniform(k2, (4 * hidden_size, hidden_size), jnp.float32, -k, k),
            b_ih=jax.random.uniform(k3, (4 * hidden_size,), jnp.float32, -k, k),
            b_hh=jax.random.uniform(k4, (4 * hidden_size,), jnp.float32, -k, k),
        ))
    key, k5, k6 = jax.random.split(key, 3)
    raw["fc_w"] = jax.random.uniform(k5, (num_classes, hidden_size), jnp.float32, -k, k)
    raw["fc_b"] = jax.random.uniform(k6, (num_classes,), jnp.float32, -k, k)
    return raw


def prepare_device_params(raw, hidden_size):
    """Pad H/4H/C to lane multiples of 128, transpose, cast weights."""
    H = hidden_size
    H_pad = _round_up(H, 128)
    dev = {"lstm": [], "fc": None}

    for li, lp in enumerate(raw["lstm"]):
        d_in = lp["w_ih"].shape[1]
        d_in_pad = d_in if li == 0 else H_pad  # later layers consume padded h

        def pad_gate_rows(w):  # (4H, K) -> (4*H_pad, K), per-gate zero padding
            w = w.reshape(4, H, w.shape[-1])
            w = _pad_axis(w, 1, H_pad)
            return w.reshape(4 * H_pad, w.shape[-1])

        w_ih = _pad_axis(pad_gate_rows(lp["w_ih"]), 1, d_in_pad)  # (4H_pad, Din_pad)
        w_hh = _pad_axis(pad_gate_rows(lp["w_hh"]), 1, H_pad)     # (4H_pad, H_pad)
        bias = _pad_axis((lp["b_ih"] + lp["b_hh"]).reshape(4, H), 1, H_pad)
        bias = bias.reshape(1, 4 * H_pad)

        dev["lstm"].append(dict(
            w_ih_t=w_ih.T.astype(_MATMUL_DTYPE),   # (Din_pad, 4*H_pad)
            w_hh_t=w_hh.T.astype(_MATMUL_DTYPE),   # (H_pad,  4*H_pad)
            bias=bias.astype(jnp.float32),         # (1, 4*H_pad), added in-kernel
        ))

    C = raw["fc_w"].shape[0]
    C_pad = _round_up(C, 128)
    w_fc = _pad_axis(_pad_axis(raw["fc_w"], 1, H_pad), 0, C_pad)  # (C_pad, H_pad)
    b_fc = _pad_axis(raw["fc_b"], 0, C_pad).reshape(1, C_pad)
    dev["fc"] = dict(w_t=w_fc.T.astype(_MATMUL_DTYPE),            # (H_pad, C_pad)
                     b=b_fc.astype(jnp.float32))
    return dev


# ----------------------------------------------------------------------------
# forward pass
# ----------------------------------------------------------------------------
def _input_projection(inp, w_ih_t, time_major):
    """Hoisted, fully parallel input projection: one big MXU matmul per layer.

    Returns gx in time-major layout (T, B_pad, 4*H_pad) stored in the matmul
    dtype (bf16 on TPU) to halve HBM traffic; bias is added inside the kernel.
    """
    eq = "tbd,dg->tbg" if time_major else "btd,dg->tbg"
    gx = jnp.einsum(eq, inp.astype(_MATMUL_DTYPE), w_ih_t,
                    preferred_element_type=jnp.float32)
    return gx.astype(_MATMUL_DTYPE)


@jax.jit
def _rnn_forward_padded(dev_params, x):
    """x: (B, T, input_size) batch_first f32 -> padded logits (B_pad, C_pad)."""
    B, T, _ = x.shape
    b_pad, b_blk = _batch_tiles(B)
    h_pad = dev_params["lstm"][0]["w_hh_t"].shape[0]
    c_pad = dev_params["fc"]["w_t"].shape[1]
    t_chunk = _pick_time_chunk(T, b_blk, h_pad, c_pad)

    x_p = jnp.pad(x.astype(jnp.float32), ((0, b_pad - B), (0, 0), (0, 0)))

    layers = dev_params["lstm"]
    inp = x_p
    time_major = False
    logits = None
    for li, lp in enumerate(layers):
        gx = _input_projection(inp, lp["w_ih_t"], time_major)
        if li < len(layers) - 1:
            inp = run_lstm_seq_layer(gx, lp["bias"], lp["w_hh_t"],
                                     b_blk=b_blk, t_chunk=t_chunk)
            time_major = True
        else:
            logits = run_lstm_final_layer(gx, lp["bias"], lp["w_hh_t"],
                                          dev_params["fc"]["w_t"],
                                          dev_params["fc"]["b"],
                                          b_blk=b_blk, t_chunk=t_chunk)
    return logits


def rnn_forward(dev_params, x, num_classes):
    """Equivalent of RNN.forward(x) for batch_first x of shape (B, T, D_in)."""
    logits_padded = _rnn_forward_padded(dev_params, x)
    return logits_padded[: x.shape[0], :num_classes]


# ----------------------------------------------------------------------------
# pure-JAX reference (mirrors the kernel's matmul-dtype / f32-state numerics)
# ----------------------------------------------------------------------------
def rnn_forward_ref(raw, x):
    xs = jnp.transpose(x, (1, 0, 2)).astype(jnp.float32)  # (T, B, D)
    B = xs.shape[1]
    for lp in raw["lstm"]:
        H = lp["w_hh"].shape[1]
        w_ih_t = lp["w_ih"].T.astype(_MATMUL_DTYPE)
        w_hh_t = lp["w_hh"].T.astype(_MATMUL_DTYPE)
        bias = (lp["b_ih"] + lp["b_hh"])[None, :].astype(jnp.float32)
        gx = jnp.einsum("tbd,dg->tbg", xs.astype(_MATMUL_DTYPE), w_ih_t,
                        preferred_element_type=jnp.float32).astype(_MATMUL_DTYPE)

        def step(carry, g_t, w_hh_t=w_hh_t, bias=bias, H=H):
            h, c = carry
            gates = (g_t.astype(jnp.float32) + bias
                     + jnp.dot(h.astype(w_hh_t.dtype), w_hh_t,
                               preferred_element_type=jnp.float32))
            i = jax.nn.sigmoid(gates[:, 0 * H:1 * H])
            f = jax.nn.sigmoid(gates[:, 1 * H:2 * H])
            g = jnp.tanh(gates[:, 2 * H:3 * H])
            o = jax.nn.sigmoid(gates[:, 3 * H:4 * H])
            c = f * c + i * g
            h = o * jnp.tanh(c)
            return (h, c), h.astype(_MATMUL_DTYPE)

        init = (jnp.zeros((B, H), jnp.float32), jnp.zeros((B, H), jnp.float32))
        _, hs = lax.scan(step, init, gx)
        xs = hs
    h_last = xs[-1]
    w_fc_t = raw["fc_w"].T.astype(_MATMUL_DTYPE)
    return (jnp.dot(h_last.astype(_MATMUL_DTYPE), w_fc_t,
                    preferred_element_type=jnp.float32)
            + raw["fc_b"][None, :])


# ----------------------------------------------------------------------------
if __name__ == "__main__":
    # batch=2, seq=8, input_size=16, hidden=32, num_layers=2, num_classes=4
    B, T, D_IN, H, L, C = 2, 8, 16, 32, 2, 4

    key = jax.random.PRNGKey(0)
    key, xkey = jax.random.split(key)
    x = jax.random.normal(xkey, (B, T, D_IN), dtype=jnp.float32)

    raw_params = init_params(key, D_IN, H, L, C)
    dev_params = prepare_device_params(raw_params, H)

    out = rnn_forward(dev_params, x, C)
    out = jax.block_until_ready(out)

    ref = rnn_forward_ref(raw_params, x)
    assert out.shape == (B, C), out.shape
    assert jnp.allclose(out, ref, rtol=5e-3, atol=5e-3), (out, ref)

    print("KERNEL_OK")
</pallas_src>

<mosaic_0001>
module attributes {stable_mosaic.version = 11 : i64} {
  func.func @lstm_seq_kernel(%arg0: i32, %arg1: i32, %arg2: memref<8x16x512xf32, #tpu.memory_space<vmem>>, %arg3: memref<1x512xf32, #tpu.memory_space<vmem>>, %arg4: memref<128x512xf32, #tpu.memory_space<vmem>>, %arg5: memref<8x16x128xf32, #tpu.memory_space<vmem>>, %arg6: memref<16x128xf32, #tpu.memory_space<vmem>>, %arg7: memref<16x128xf32, #tpu.memory_space<vmem>>) attributes {dimension_semantics = [#tpu.dimension_semantics<parallel>, #tpu.dimension_semantics<arbitrary>], iteration_bounds = array<i64: 1, 1>, scalar_prefetch = 0 : i64, scratch_operands = 2 : i64, tpu.core_type = #tpu.core_type<tc>, window_params = [{transform_indices = @transform_0, window_bounds = array<i64: 8, 16, 512>}, {pipeline_mode = #tpu.pipeline_mode<synchronous>, transform_indices = @transform_1, window_bounds = array<i64: 1, 512>}, {pipeline_mode = #tpu.pipeline_mode<synchronous>, transform_indices = @transform_2, window_bounds = array<i64: 128, 512>}, {transform_indices = @transform_3, window_bounds = array<i64: 8, 16, 128>}]} {
    %c0_i32 = arith.constant 0 : i32
    %0 = arith.cmpi eq, %arg1, %c0_i32 : i32
    %1 = arith.extui %0 : i1 to i32
    %c0_i32_0 = arith.constant 0 : i32
    %2 = arith.cmpi ne, %1, %c0_i32_0 : i32
    scf.if %2 {
      %cst_76 = arith.constant 0.000000e+00 : f32
      %297 = vector.broadcast %cst_76 : f32 to vector<16x128xf32>
      %c0_77 = arith.constant 0 : index
      %c0_78 = arith.constant 0 : index
      %298 = vector.load %arg6[%c0_77, %c0_78] : memref<16x128xf32, #tpu.memory_space<vmem>>, vector<16x128xf32>
      tpu.vector_store %arg6[%c0_77, %c0_78], %297 {strides = array<i32>} : memref<16x128xf32, #tpu.memory_space<vmem>>, vector<16x128xf32>,
      %cst_79 = arith.constant 0.000000e+00 : f32
      %299 = vector.broadcast %cst_79 : f32 to vector<16x128xf32>
      %c0_80 = arith.constant 0 : index
      %c0_81 = arith.constant 0 : index
      %300 = vector.load %arg7[%c0_80, %c0_81] : memref<16x128xf32, #tpu.memory_space<vmem>>, vector<16x128xf32>
      tpu.vector_store %arg7[%c0_80, %c0_81], %299 {strides = array<i32>} : memref<16x128xf32, #tpu.memory_space<vmem>>, vector<16x128xf32>,
    } else {
    }
    %c0 = arith.constant 0 : index
    %c0_1 = arith.constant 0 : index
    %3 = vector.load %arg4[%c0, %c0_1] : memref<128x512xf32, #tpu.memory_space<vmem>>, vector<128x512xf32>
    %c0_2 = arith.constant 0 : index
    %c0_3 = arith.constant 0 : index
    %4 = vector.load %arg3[%c0_2, %c0_3] : memref<1x512xf32, #tpu.memory_space<vmem>>, vector<1x512xf32>
    %c0_4 = arith.constant 0 : index
    %c0_5 = arith.constant 0 : index
    %5 = vector.load %arg6[%c0_4, %c0_5] : memref<16x128xf32, #tpu.memory_space<vmem>>, vector<16x128xf32>
    %c0_6 = arith.constant 0 : index
    %c0_7 = arith.constant 0 : index
    %6 = vector.load %arg7[%c0_6, %c0_7] : memref<16x128xf32, #tpu.memory_space<vmem>>, vector<16x128xf32>
    %c0_i32_8 = arith.constant 0 : i32
    %7 = arith.index_cast %c0_i32_8 : i32 to index
    %c0_9 = arith.constant 0 : index
    %c0_10 = arith.constant 0 : index
    %8 = vector.load %arg2[%7, %c0_9, %c0_10] : memref<8x16x512xf32, #tpu.memory_space<vmem>>, vector<1x16x512xf32>
    %9 = vector.shape_cast %8 : vector<1x16x512xf32> to vector<16x512xf32>
    %10 = vector.broadcast %4 : vector<1x512xf32> to vector<16x512xf32>
    %11 = arith.addf %9, %10 : vector<16x512xf32>
    %cst = arith.constant dense<0.000000e+00> : vector<16x512xf32>
    %12 = tpu.matmul %5, %3, %cst {dimension_numbers = #tpu.dot_dimension_numbers<[1], [0], [0], [1], [0, 0, 1, 1], [], []>} : vector<16x128xf32>, vector<128x512xf32>, vector<16x512xf32> -> vector<16x512xf32>
    %13 = arith.addf %11, %12 : vector<16x512xf32>
    %14 = vector.extract_strided_slice %13 {offsets = [0, 0], sizes = [16, 128], strides = [1, 1]} : vector<16x512xf32> to vector<16x128xf32>
    %15 = arith.negf %14 : vector<16x128xf32>
    %16 = math.exp %15 : vector<16x128xf32>
    %cst_11 = arith.constant 1.000000e+00 : f32
    %17 = vector.broadcast %cst_11 : f32 to vector<16x128xf32>
    %18 = arith.addf %17, %16 : vector<16x128xf32>
    %19 = arith.divf %17, %18 : vector<16x128xf32>
    %20 = vector.extract_strided_slice %13 {offsets = [0, 128], sizes = [16, 128], strides = [1, 1]} : vector<16x512xf32> to vector<16x128xf32>
    %21 = arith.negf %20 : vector<16x128xf32>
    %22 = math.exp %21 : vector<16x128xf32>
    %cst_12 = arith.constant 1.000000e+00 : f32
    %23 = vector.broadcast %cst_12 : f32 to vector<16x128xf32>
    %24 = arith.addf %23, %22 : vector<16x128xf32>
    %25 = arith.divf %23, %24 : vector<16x128xf32>
    %26 = vector.extract_strided_slice %13 {offsets = [0, 256], sizes = [16, 128], strides = [1, 1]} : vector<16x512xf32> to vector<16x128xf32>
    %27 = math.tanh %26 : vector<16x128xf32>
    %28 = vector.extract_strided_slice %13 {offsets = [0, 384], sizes = [16, 128], strides = [1, 1]} : vector<16x512xf32> to vector<16x128xf32>
    %29 = arith.negf %28 : vector<16x128xf32>
    %30 = math.exp %29 : vector<16x128xf32>
    %cst_13 = arith.constant 1.000000e+00 : f32
    %31 = vector.broadcast %cst_13 : f32 to vector<16x128xf32>
    %32 = arith.addf %31, %30 : vector<16x128xf32>
    %33 = arith.divf %31, %32 : vector<16x128xf32>
    %34 = arith.mulf %25, %6 : vector<16x128xf32>
    %35 = arith.mulf %19, %27 : vector<16x128xf32>
    %36 = arith.addf %34, %35 : vector<16x128xf32>
    %37 = math.tanh %36 : vector<16x128xf32>
    %38 = arith.mulf %33, %37 : vector<16x128xf32>
    %39 = arith.index_cast %c0_i32_8 : i32 to index
    %c0_14 = arith.constant 0 : index
    %c0_15 = arith.constant 0 : index
    %40 = vector.load %arg5[%39, %c0_14, %c0_15] : memref<8x16x128xf32, #tpu.memory_space<vmem>>, vector<1x16x128xf32>
    %41 = vector.shape_cast %40 : vector<1x16x128xf32> to vector<16x128xf32>
    %42 = vector.shape_cast %38 : vector<16x128xf32> to vector<1x16x128xf32>
    tpu.vector_store %arg5[%39, %c0_14, %c0_15], %42 {strides = array<i32>} : memref<8x16x128xf32, #tpu.memory_space<vmem>>, vector<1x16x128xf32>,
    %c1_i32 = arith.constant 1 : i32
    %43 = arith.index_cast %c1_i32 : i32 to index
    %c0_16 = arith.constant 0 : index
    %c0_17 = arith.constant 0 : index
    %44 = vector.load %arg2[%43, %c0_16, %c0_17] : memref<8x16x512xf32, #tpu.memory_space<vmem>>, vector<1x16x512xf32>
    %45 = vector.shape_cast %44 : vector<1x16x512xf32> to vector<16x512xf32>
    %46 = vector.broadcast %4 : vector<1x512xf32> to vector<16x512xf32>
    %47 = arith.addf %45, %46 : vector<16x512xf32>
    %cst_18 = arith.constant dense<0.000000e+00> : vector<16x512xf32>
    %48 = tpu.matmul %38, %3, %cst_18 {dimension_numbers = #tpu.dot_dimension_numbers<[1], [0], [0], [1], [0, 0, 1, 1], [], []>} : vector<16x128xf32>, vector<128x512xf32>, vector<16x512xf32> -> vector<16x512xf32>
    %49 = arith.addf %47, %48 : vector<16x512xf32>
    %50 = vector.extract_strided_slice %49 {offsets = [0, 0], sizes = [16, 128], strides = [1, 1]} : vector<16x512xf32> to vector<16x128xf32>
    %51 = arith.negf %50 : vector<16x128xf32>
    %52 = math.exp %51 : vector<16x128xf32>
    %cst_19 = arith.constant 1.000000e+00 : f32
    %53 = vector.broadcast %cst_19 : f32 to vector<16x128xf32>
    %54 = arith.addf %53, %52 : vector<16x128xf32>
    %55 = arith.divf %53, %54 : vector<16x128xf32>
    %56 = vector.extract_strided_slice %49 {offsets = [0, 128], sizes = [16, 128], strides = [1, 1]} : vector<16x512xf32> to vector<16x128xf32>
    %57 = arith.negf %56 : vector<16x128xf32>
    %58 = math.exp %57 : vector<16x128xf32>
    %cst_20 = arith.constant 1.000000e+00 : f32
    %59 = vector.broadcast %cst_20 : f32 to vector<16x128xf32>
    %60 = arith.addf %59, %58 : vector<16x128xf32>
    %61 = arith.divf %59, %60 : vector<16x128xf32>
    %62 = vector.extract_strided_slice %49 {offsets = [0, 256], sizes = [16, 128], strides = [1, 1]} : vector<16x512xf32> to vector<16x128xf32>
    %63 = math.tanh %62 : vector<16x128xf32>
    %64 = vector.extract_strided_slice %49 {offsets = [0, 384], sizes = [16, 128], strides = [1, 1]} : vector<16x512xf32> to vector<16x128xf32>
    %65 = arith.negf %64 : vector<16x128xf32>
    %66 = math.exp %65 : vector<16x128xf32>
    %cst_21 = arith.constant 1.000000e+00 : f32
    %67 = vector.broadcast %cst_21 : f32 to vector<16x128xf32>
    %68 = arith.addf %67, %66 : vector<16x128xf32>
    %69 = arith.divf %67, %68 : vector<16x128xf32>
    %70 = arith.mulf %61, %36 : vector<16x128xf32>
    %71 = arith.mulf %55, %63 : vector<16x128xf32>
    %72 = arith.addf %70, %71 : vector<16x128xf32>
    %73 = math.tanh %72 : vector<16x128xf32>
    %74 = arith.mulf %69, %73 : vector<16x128xf32>
    %75 = arith.index_cast %c1_i32 : i32 to index
    %c0_22 = arith.constant 0 : index
    %c0_23 = arith.constant 0 : index
    %76 = vector.load %arg5[%75, %c0_22, %c0_23] : memref<8x16x128xf32, #tpu.memory_space<vmem>>, vector<1x16x128xf32>
    %77 = vector.shape_cast %76 : vector<1x16x128xf32> to vector<16x128xf32>
    %78 = vector.shape_cast %74 : vector<16x128xf32> to vector<1x16x128xf32>
    tpu.vector_store %arg5[%75, %c0_22, %c0_23], %78 {strides = array<i32>} : memref<8x16x128xf32, #tpu.memory_space<vmem>>, vector<1x16x128xf32>,
    %c2_i32 = arith.constant 2 : i32
    %79 = arith.index_cast %c2_i32 : i32 to index
    %c0_24 = arith.constant 0 : index
    %c0_25 = arith.constant 0 : index
    %80 = vector.load %arg2[%79, %c0_24, %c0_25] : memref<8x16x512xf32, #tpu.memory_space<vmem>>, vector<1x16x512xf32>
    %81 = vector.shape_cast %80 : vector<1x16x512xf32> to vector<16x512xf32>
    %82 = vector.broadcast %4 : vector<1x512xf32> to vector<16x512xf32>
    %83 = arith.addf %81, %82 : vector<16x512xf32>
    %cst_26 = arith.constant dense<0.000000e+00> : vector<16x512xf32>
    %84 = tpu.matmul %74, %3, %cst_26 {dimension_numbers = #tpu.dot_dimension_numbers<[1], [0], [0], [1], [0, 0, 1, 1], [], []>} : vector<16x128xf32>, vector<128x512xf32>, vector<16x512xf32> -> vector<16x512xf32>
    %85 = arith.addf %83, %84 : vector<16x512xf32>
    %86 = vector.extract_strided_slice %85 {offsets = [0, 0], sizes = [16, 128], strides = [1, 1]} : vector<16x512xf32> to vector<16x128xf32>
    %87 = arith.negf %86 : vector<16x128xf32>
    %88 = math.exp %87 : vector<16x128xf32>
    %cst_27 = arith.constant 1.000000e+00 : f32
    %89 = vector.broadcast %cst_27 : f32 to vector<16x128xf32>
    %90 = arith.addf %89, %88 : vector<16x128xf32>
    %91 = arith.divf %89, %90 : vector<16x128xf32>
    %92 = vector.extract_strided_slice %85 {offsets = [0, 128], sizes = [16, 128], strides = [1, 1]} : vector<16x512xf32> to vector<16x128xf32>
    %93 = arith.negf %92 : vector<16x128xf32>
    %94 = math.exp %93 : vector<16x128xf32>
    %cst_28 = arith.constant 1.000000e+00 : f32
    %95 = vector.broadcast %cst_28 : f32 to vector<16x128xf32>
    %96 = arith.addf %95, %94 : vector<16x128xf32>
    %97 = arith.divf %95, %96 : vector<16x128xf32>
    %98 = vector.extract_strided_slice %85 {offsets = [0, 256], sizes = [16, 128], strides = [1, 1]} : vector<16x512xf32> to vector<16x128xf32>
    %99 = math.tanh %98 : vector<16x128xf32>
    %100 = vector.extract_strided_slice %85 {offsets = [0, 384], sizes = [16, 128], strides = [1, 1]} : vector<16x512xf32> to vector<16x128xf32>
    %101 = arith.negf %100 : vector<16x128xf32>
    %102 = math.exp %101 : vector<16x128xf32>
    %cst_29 = arith.constant 1.000000e+00 : f32
    %103 = vector.broadcast %cst_29 : f32 to vector<16x128xf32>
    %104 = arith.addf %103, %102 : vector<16x128xf32>
    %105 = arith.divf %103, %104 : vector<16x128xf32>
    %106 = arith.mulf %97, %72 : vector<16x128xf32>
    %107 = arith.mulf %91, %99 : vector<16x128xf32>
    %108 = arith.addf %106, %107 : vector<16x128xf32>
    %109 = math.tanh %108 : vector<16x128xf32>
    %110 = arith.mulf %105, %109 : vector<16x128xf32>
    %111 = arith.index_cast %c2_i32 : i32 to index
    %c0_30 = arith.constant 0 : index
    %c0_31 = arith.constant 0 : index
    %112 = vector.load %arg5[%111, %c0_30, %c0_31] : memref<8x16x128xf32, #tpu.memory_space<vmem>>, vector<1x16x128xf32>
    %113 = vector.shape_cast %112 : vector<1x16x128xf32> to vector<16x128xf32>
    %114 = vector.shape_cast %110 : vector<16x128xf32> to vector<1x16x128xf32>
    tpu.vector_store %arg5[%111, %c0_30, %c0_31], %114 {strides = array<i32>} : memref<8x16x128xf32, #tpu.memory_space<vmem>>, vector<1x16x128xf32>,
    %c3_i32 = arith.constant 3 : i32
    %115 = arith.index_cast %c3_i32 : i32 to index
    %c0_32 = arith.constant 0 : index
    %c0_33 = arith.constant 0 : index
    %116 = vector.load %arg2[%115, %c0_32, %c0_33] : memref<8x16x512xf32, #tpu.memory_space<vmem>>, vector<1x16x512xf32>
    %117 = vector.shape_cast %116 : vector<1x16x512xf32> to vector<16x512xf32>
    %118 = vector.broadcast %4 : vector<1x512xf32> to vector<16x512xf32>
    %119 = arith.addf %117, %118 : vector<16x512xf32>
    %cst_34 = arith.constant dense<0.000000e+00> : vector<16x512xf32>
    %120 = tpu.matmul %110, %3, %cst_34 {dimension_numbers = #tpu.dot_dimension_numbers<[1], [0], [0], [1], [0, 0, 1, 1], [], []>} : vector<16x128xf32>, vector<128x512xf32>, vector<16x512xf32> -> vector<16x512xf32>
    %121 = arith.addf %119, %120 : vector<16x512xf32>
    %122 = vector.extract_strided_slice %121 {offsets = [0, 0], sizes = [16, 128], strides = [1, 1]} : vector<16x512xf32> to vector<16x128xf32>
    %123 = arith.negf %122 : vector<16x128xf32>
    %124 = math.exp %123 : vector<16x128xf32>
    %cst_35 = arith.constant 1.000000e+00 : f32
    %125 = vector.broadcast %cst_35 : f32 to vector<16x128xf32>
    %126 = arith.addf %125, %124 : vector<16x128xf32>
    %127 = arith.divf %125, %126 : vector<16x128xf32>
    %128 = vector.extract_strided_slice %121 {offsets = [0, 128], sizes = [16, 128], strides = [1, 1]} : vector<16x512xf32> to vector<16x128xf32>
    %129 = arith.negf %128 : vector<16x128xf32>
    %130 = math.exp %129 : vector<16x128xf32>
    %cst_36 = arith.constant 1.000000e+00 : f32
    %131 = vector.broadcast %cst_36 : f32 to vector<16x128xf32>
    %132 = arith.addf %131, %130 : vector<16x128xf32>
    %133 = arith.divf %131, %132 : vector<16x128xf32>
    %134 = vector.extract_strided_slice %121 {offsets = [0, 256], sizes = [16, 128], strides = [1, 1]} : vector<16x512xf32> to vector<16x128xf32>
    %135 = math.tanh %134 : vector<16x128xf32>
    %136 = vector.extract_strided_slice %121 {offsets = [0, 384], sizes = [16, 128], strides = [1, 1]} : vector<16x512xf32> to vector<16x128xf32>
    %137 = arith.negf %136 : vector<16x128xf32>
    %138 = math.exp %137 : vector<16x128xf32>
    %cst_37 = arith.constant 1.000000e+00 : f32
    %139 = vector.broadcast %cst_37 : f32 to vector<16x128xf32>
    %140 = arith.addf %139, %138 : vector<16x128xf32>
    %141 = arith.divf %139, %140 : vector<16x128xf32>
    %142 = arith.mulf %133, %108 : vector<16x128xf32>
    %143 = arith.mulf %127, %135 : vector<16x128xf32>
    %144 = arith.addf %142, %143 : vector<16x128xf32>
    %145 = math.tanh %144 : vector<16x128xf32>
    %146 = arith.mulf %141, %145 : vector<16x128xf32>
    %147 = arith.index_cast %c3_i32 : i32 to index
    %c0_38 = arith.constant 0 : index
    %c0_39 = arith.constant 0 : index
    %148 = vector.load %arg5[%147, %c0_38, %c0_39] : memref<8x16x128xf32, #tpu.memory_space<vmem>>, vector<1x16x128xf32>
    %149 = vector.shape_cast %148 : vector<1x16x128xf32> to vector<16x128xf32>
    %150 = vector.shape_cast %146 : vector<16x128xf32> to vector<1x16x128xf32>
    tpu.vector_store %arg5[%147, %c0_38, %c0_39], %150 {strides = array<i32>} : memref<8x16x128xf32, #tpu.memory_space<vmem>>, vector<1x16x128xf32>,
    %c4_i32 = arith.constant 4 : i32
    %151 = arith.index_cast %c4_i32 : i32 to index
    %c0_40 = arith.constant 0 : index
    %c0_41 = arith.constant 0 : index
    %152 = vector.load %arg2[%151, %c0_40, %c0_41] : memref<8x16x512xf32, #tpu.memory_space<vmem>>, vector<1x16x512xf32>
    %153 = vector.shape_cast %152 : vector<1x16x512xf32> to vector<16x512xf32>
    %154 = vector.broadcast %4 : vector<1x512xf32> to vector<16x512xf32>
    %155 = arith.addf %153, %154 : vector<16x512xf32>
    %cst_42 = arith.constant dense<0.000000e+00> : vector<16x512xf32>
    %156 = tpu.matmul %146, %3, %cst_42 {dimension_numbers = #tpu.dot_dimension_numbers<[1], [0], [0], [1], [0, 0, 1, 1], [], []>} : vector<16x128xf32>, vector<128x512xf32>, vector<16x512xf32> -> vector<16x512xf32>
    %157 = arith.addf %155, %156 : vector<16x512xf32>
    %158 = vector.extract_strided_slice %157 {offsets = [0, 0], sizes = [16, 128], strides = [1, 1]} : vector<16x512xf32> to vector<16x128xf32>
    %159 = arith.negf %158 : vector<16x128xf32>
    %160 = math.exp %159 : vector<16x128xf32>
    %cst_43 = arith.constant 1.000000e+00 : f32
    %161 = vector.broadcast %cst_43 : f32 to vector<16x128xf32>
    %162 = arith.addf %161, %160 : vector<16x128xf32>
    %163 = arith.divf %161, %162 : vector<16x128xf32>
    %164 = vector.extract_strided_slice %157 {offsets = [0, 128], sizes = [16, 128], strides = [1, 1]} : vector<16x512xf32> to vector<16x128xf32>
    %165 = arith.negf %164 : vector<16x128xf32>
    %166 = math.exp %165 : vector<16x128xf32>
    %cst_44 = arith.constant 1.000000e+00 : f32
    %167 = vector.broadcast %cst_44 : f32 to vector<16x128xf32>
    %168 = arith.addf %167, %166 : vector<16x128xf32>
    %169 = arith.divf %167, %168 : vector<16x128xf32>
    %170 = vector.extract_strided_slice %157 {offsets = [0, 256], sizes = [16, 128], strides = [1, 1]} : vector<16x512xf32> to vector<16x128xf32>
    %171 = math.tanh %170 : vector<16x128xf32>
    %172 = vector.extract_strided_slice %157 {offsets = [0, 384], sizes = [16, 128], strides = [1, 1]} : vector<16x512xf32> to vector<16x128xf32>
    %173 = arith.negf %172 : vector<16x128xf32>
    %174 = math.exp %173 : vector<16x128xf32>
    %cst_45 = arith.constant 1.000000e+00 : f32
    %175 = vector.broadcast %cst_45 : f32 to vector<16x128xf32>
    %176 = arith.addf %175, %174 : vector<16x128xf32>
    %177 = arith.divf %175, %176 : vector<16x128xf32>
    %178 = arith.mulf %169, %144 : vector<16x128xf32>
    %179 = arith.mulf %163, %171 : vector<16x128xf32>
    %180 = arith.addf %178, %179 : vector<16x128xf32>
    %181 = math.tanh %180 : vector<16x128xf32>
    %182 = arith.mulf %177, %181 : vector<16x128xf32>
    %183 = arith.index_cast %c4_i32 : i32 to index
    %c0_46 = arith.constant 0 : index
    %c0_47 = arith.constant 0 : index
    %184 = vector.load %arg5[%183, %c0_46, %c0_47] : memref<8x16x128xf32, #tpu.memory_space<vmem>>, vector<1x16x128xf32>
    %185 = vector.shape_cast %184 : vector<1x16x128xf32> to vector<16x128xf32>
    %186 = vector.shape_cast %182 : vector<16x128xf32> to vector<1x16x128xf32>
    tpu.vector_store %arg5[%183, %c0_46, %c0_47], %186 {strides = array<i32>} : memref<8x16x128xf32, #tpu.memory_space<vmem>>, vector<1x16x128xf32>,
    %c5_i32 = arith.constant 5 : i32
    %187 = arith.index_cast %c5_i32 : i32 to index
    %c0_48 = arith.constant 0 : index
    %c0_49 = arith.constant 0 : index
    %188 = vector.load %arg2[%187, %c0_48, %c0_49] : memref<8x16x512xf32, #tpu.memory_space<vmem>>, vector<1x16x512xf32>
    %189 = vector.shape_cast %188 : vector<1x16x512xf32> to vector<16x512xf32>
    %190 = vector.broadcast %4 : vector<1x512xf32> to vector<16x512xf32>
    %191 = arith.addf %189, %190 : vector<16x512xf32>
    %cst_50 = arith.constant dense<0.000000e+00> : vector<16x512xf32>
    %192 = tpu.matmul %182, %3, %cst_50 {dimension_numbers = #tpu.dot_dimension_numbers<[1], [0], [0], [1], [0, 0, 1, 1], [], []>} : vector<16x128xf32>, vector<128x512xf32>, vector<16x512xf32> -> vector<16x512xf32>
    %193 = arith.addf %191, %192 : vector<16x512xf32>
    %194 = vector.extract_strided_slice %193 {offsets = [0, 0], sizes = [16, 128], strides = [1, 1]} : vector<16x512xf32> to vector<16x128xf32>
    %195 = arith.negf %194 : vector<16x128xf32>
    %196 = math.exp %195 : vector<16x128xf32>
    %cst_51 = arith.constant 1.000000e+00 : f32
    %197 = vector.broadcast %cst_51 : f32 to vector<16x128xf32>
    %198 = arith.addf %197, %196 : vector<16x128xf32>
    %199 = arith.divf %197, %198 : vector<16x128xf32>
    %200 = vector.extract_strided_slice %193 {offsets = [0, 128], sizes = [16, 128], strides = [1, 1]} : vector<16x512xf32> to vector<16x128xf32>
    %201 = arith.negf %200 : vector<16x128xf32>
    %202 = math.exp %201 : vector<16x128xf32>
    %cst_52 = arith.constant 1.000000e+00 : f32
    %203 = vector.broadcast %cst_52 : f32 to vector<16x128xf32>
    %204 = arith.addf %203, %202 : vector<16x128xf32>
    %205 = arith.divf %203, %204 : vector<16x128xf32>
    %206 = vector.extract_strided_slice %193 {offsets = [0, 256], sizes = [16, 128], strides = [1, 1]} : vector<16x512xf32> to vector<16x128xf32>
    %207 = math.tanh %206 : vector<16x128xf32>
    %208 = vector.extract_strided_slice %193 {offsets = [0, 384], sizes = [16, 128], strides = [1, 1]} : vector<16x512xf32> to vector<16x128xf32>
    %209 = arith.negf %208 : vector<16x128xf32>
    %210 = math.exp %209 : vector<16x128xf32>
    %cst_53 = arith.constant 1.000000e+00 : f32
    %211 = vector.broadcast %cst_53 : f32 to vector<16x128xf32>
    %212 = arith.addf %211, %210 : vector<16x128xf32>
    %213 = arith.divf %211, %212 : vector<16x128xf32>
    %214 = arith.mulf %205, %180 : vector<16x128xf32>
    %215 = arith.mulf %199, %207 : vector<16x128xf32>
    %216 = arith.addf %214, %215 : vector<16x128xf32>
    %217 = math.tanh %216 : vector<16x128xf32>
    %218 = arith.mulf %213, %217 : vector<16x128xf32>
    %219 = arith.index_cast %c5_i32 : i32 to index
    %c0_54 = arith.constant 0 : index
    %c0_55 = arith.constant 0 : index
    %220 = vector.load %arg5[%219, %c0_54, %c0_55] : memref<8x16x128xf32, #tpu.memory_space<vmem>>, vector<1x16x128xf32>
    %221 = vector.shape_cast %220 : vector<1x16x128xf32> to vector<16x128xf32>
    %222 = vector.shape_cast %218 : vector<16x128xf32> to vector<1x16x128xf32>
    tpu.vector_store %arg5[%219, %c0_54, %c0_55], %222 {strides = array<i32>} : memref<8x16x128xf32, #tpu.memory_space<vmem>>, vector<1x16x128xf32>,
    %c6_i32 = arith.constant 6 : i32
    %223 = arith.index_cast %c6_i32 : i32 to index
    %c0_56 = arith.constant 0 : index
    %c0_57 = arith.constant 0 : index
    %224 = vector.load %arg2[%223, %c0_56, %c0_57] : memref<8x16x512xf32, #tpu.memory_space<vmem>>, vector<1x16x512xf32>
    %225 = vector.shape_cast %224 : vector<1x16x512xf32> to vector<16x512xf32>
    %226 = vector.broadcast %4 : vector<1x512xf32> to vector<16x512xf32>
    %227 = arith.addf %225, %226 : vector<16x512xf32>
    %cst_58 = arith.constant dense<0.000000e+00> : vector<16x512xf32>
    %228 = tpu.matmul %218, %3, %cst_58 {dimension_numbers = #tpu.dot_dimension_numbers<[1], [0], [0], [1], [0, 0, 1, 1], [], []>} : vector<16x128xf32>, vector<128x512xf32>, vector<16x512xf32> -> vector<16x512xf32>
    %229 = arith.addf %227, %228 : vector<16x512xf32>
    %230 = vector.extract_strided_slice %229 {offsets = [0, 0], sizes = [16, 128], strides = [1, 1]} : vector<16x512xf32> to vector<16x128xf32>
    %231 = arith.negf %230 : vector<16x128xf32>
    %232 = math.exp %231 : vector<16x128xf32>
    %cst_59 = arith.constant 1.000000e+00 : f32
    %233 = vector.broadcast %cst_59 : f32 to vector<16x128xf32>
    %234 = arith.addf %233, %232 : vector<16x128xf32>
    %235 = arith.divf %233, %234 : vector<16x128xf32>
    %236 = vector.extract_strided_slice %229 {offsets = [0, 128], sizes = [16, 128], strides = [1, 1]} : vector<16x512xf32> to vector<16x128xf32>
    %237 = arith.negf %236 : vector<16x128xf32>
    %238 = math.exp %237 : vector<16x128xf32>
    %cst_60 = arith.constant 1.000000e+00 : f32
    %239 = vector.broadcast %cst_60 : f32 to vector<16x128xf32>
    %240 = arith.addf %239, %238 : vector<16x128xf32>
    %241 = arith.divf %239, %240 : vector<16x128xf32>
    %242 = vector.extract_strided_slice %229 {offsets = [0, 256], sizes = [16, 128], strides = [1, 1]} : vector<16x512xf32> to vector<16x128xf32>
    %243 = math.tanh %242 : vector<16x128xf32>
    %244 = vector.extract_strided_slice %229 {offsets = [0, 384], sizes = [16, 128], strides = [1, 1]} : vector<16x512xf32> to vector<16x128xf32>
    %245 = arith.negf %244 : vector<16x128xf32>
    %246 = math.exp %245 : vector<16x128xf32>
    %cst_61 = arith.constant 1.000000e+00 : f32
    %247 = vector.broadcast %cst_61 : f32 to vector<16x128xf32>
    %248 = arith.addf %247, %246 : vector<16x128xf32>
    %249 = arith.divf %247, %248 : vector<16x128xf32>
    %250 = arith.mulf %241, %216 : vector<16x128xf32>
    %251 = arith.mulf %235, %243 : vector<16x128xf32>
    %252 = arith.addf %250, %251 : vector<16x128xf32>
    %253 = math.tanh %252 : vector<16x128xf32>
    %254 = arith.mulf %249, %253 : vector<16x128xf32>
    %255 = arith.index_cast %c6_i32 : i32 to index
    %c0_62 = arith.constant 0 : index
    %c0_63 = arith.constant 0 : index
    %256 = vector.load %arg5[%255, %c0_62, %c0_63] : memref<8x16x128xf32, #tpu.memory_space<vmem>>, vector<1x16x128xf32>
    %257 = vector.shape_cast %256 : vector<1x16x128xf32> to vector<16x128xf32>
    %258 = vector.shape_cast %254 : vector<16x128xf32> to vector<1x16x128xf32>
    tpu.vector_store %arg5[%255, %c0_62, %c0_63], %258 {strides = array<i32>} : memref<8x16x128xf32, #tpu.memory_space<vmem>>, vector<1x16x128xf32>,
    %c7_i32 = arith.constant 7 : i32
    %259 = arith.index_cast %c7_i32 : i32 to index
    %c0_64 = arith.constant 0 : index
    %c0_65 = arith.constant 0 : index
    %260 = vector.load %arg2[%259, %c0_64, %c0_65] : memref<8x16x512xf32, #tpu.memory_space<vmem>>, vector<1x16x512xf32>
    %261 = vector.shape_cast %260 : vector<1x16x512xf32> to vector<16x512xf32>
    %262 = vector.broadcast %4 : vector<1x512xf32> to vector<16x512xf32>
    %263 = arith.addf %261, %262 : vector<16x512xf32>
    %cst_66 = arith.constant dense<0.000000e+00> : vector<16x512xf32>
    %264 = tpu.matmul %254, %3, %cst_66 {dimension_numbers = #tpu.dot_dimension_numbers<[1], [0], [0], [1], [0, 0, 1, 1], [], []>} : vector<16x128xf32>, vector<128x512xf32>, vector<16x512xf32> -> vector<16x512xf32>
    %265 = arith.addf %263, %264 : vector<16x512xf32>
    %266 = vector.extract_strided_slice %265 {offsets = [0, 0], sizes = [16, 128], strides = [1, 1]} : vector<16x512xf32> to vector<16x128xf32>
    %267 = arith.negf %266 : vector<16x128xf32>
    %268 = math.exp %267 : vector<16x128xf32>
    %cst_67 = arith.constant 1.000000e+00 : f32
    %269 = vector.broadcast %cst_67 : f32 to vector<16x128xf32>
    %270 = arith.addf %269, %268 : vector<16x128xf32>
    %271 = arith.divf %269, %270 : vector<16x128xf32>
    %272 = vector.extract_strided_slice %265 {offsets = [0, 128], sizes = [16, 128], strides = [1, 1]} : vector<16x512xf32> to vector<16x128xf32>
    %273 = arith.negf %272 : vector<16x128xf32>
    %274 = math.exp %273 : vector<16x128xf32>
    %cst_68 = arith.constant 1.000000e+00 : f32
    %275 = vector.broadcast %cst_68 : f32 to vector<16x128xf32>
    %276 = arith.addf %275, %274 : vector<16x128xf32>
    %277 = arith.divf %275, %276 : vector<16x128xf32>
    %278 = vector.extract_strided_slice %265 {offsets = [0, 256], sizes = [16, 128], strides = [1, 1]} : vector<16x512xf32> to vector<16x128xf32>
    %279 = math.tanh %278 : vector<16x128xf32>
    %280 = vector.extract_strided_slice %265 {offsets = [0, 384], sizes = [16, 128], strides = [1, 1]} : vector<16x512xf32> to vector<16x128xf32>
    %281 = arith.negf %280 : vector<16x128xf32>
    %282 = math.exp %281 : vector<16x128xf32>
    %cst_69 = arith.constant 1.000000e+00 : f32
    %283 = vector.broadcast %cst_69 : f32 to vector<16x128xf32>
    %284 = arith.addf %283, %282 : vector<16x128xf32>
    %285 = arith.divf %283, %284 : vector<16x128xf32>
    %286 = arith.mulf %277, %252 : vector<16x128xf32>
    %287 = arith.mulf %271, %279 : vector<16x128xf32>
    %288 = arith.addf %286, %287 : vector<16x128xf32>
    %289 = math.tanh %288 : vector<16x128xf32>
    %290 = arith.mulf %285, %289 : vector<16x128xf32>
    %291 = arith.index_cast %c7_i32 : i32 to index
    %c0_70 = arith.constant 0 : index
    %c0_71 = arith.constant 0 : index
    %292 = vector.load %arg5[%291, %c0_70, %c0_71] : memref<8x16x128xf32, #tpu.memory_space<vmem>>, vector<1x16x128xf32>
    %293 = vector.shape_cast %292 : vector<1x16x128xf32> to vector<16x128xf32>
    %294 = vector.shape_cast %290 : vector<16x128xf32> to vector<1x16x128xf32>
    tpu.vector_store %arg5[%291, %c0_70, %c0_71], %294 {strides = array<i32>} : memref<8x16x128xf32, #tpu.memory_space<vmem>>, vector<1x16x128xf32>,
    %c8_i32 = arith.constant 8 : i32
    %c0_72 = arith.constant 0 : index
    %c0_73 = arith.constant 0 : index
    %295 = vector.load %arg6[%c0_72, %c0_73] : memref<16x128xf32, #tpu.memory_space<vmem>>, vector<16x128xf32>
    tpu.vector_store %arg6[%c0_72, %c0_73], %290 {strides = array<i32>} : memref<16x128xf32, #tpu.memory_space<vmem>>, vector<16x128xf32>,
    %c0_74 = arith.constant 0 : index
    %c0_75 = arith.constant 0 : index
    %296 = vector.load %arg7[%c0_74, %c0_75] : memref<16x128xf32, #tpu.memory_space<vmem>>, vector<16x128xf32>
    tpu.vector_store %arg7[%c0_74, %c0_75], %288 {strides = array<i32>} : memref<16x128xf32, #tpu.memory_space<vmem>>, vector<16x128xf32>,
    return
  }
  func.func @transform_0(%arg0: i32, %arg1: i32) -> (i32, i32, i32) {
    %c0_i32 = arith.constant 0 : i32
    %c0_i32_0 = arith.constant 0 : i32
    return %arg1, %arg0, %c0_i32 : i32, i32, i32
  }
  func.func @transform_1(%arg0: i32, %arg1: i32) -> (i32, i32) {
    %c0_i32 = arith.constant 0 : i32
    %c0_i32_0 = arith.constant 0 : i32
    %c0_i32_1 = arith.constant 0 : i32
    return %c0_i32, %c0_i32_0 : i32, i32
  }
  func.func @transform_2(%arg0: i32, %arg1: i32) -> (i32, i32) {
    %c0_i32 = arith.constant 0 : i32
    %c0_i32_0 = arith.constant 0 : i32
    %c0_i32_1 = arith.constant 0 : i32
    return %c0_i32, %c0_i32_0 : i32, i32
  }
  func.func @transform_3(%arg0: i32, %arg1: i32) -> (i32, i32, i32) {
    %c0_i32 = arith.constant 0 : i32
    %c0_i32_0 = arith.constant 0 : i32
    return %arg1, %arg0, %c0_i32 : i32, i32, i32
  }
}

module attributes {stable_mosaic.version = 11 : i64} {
  func.func @lstm_final_fc_kernel(%arg0: i32, %arg1: i32, %arg2: memref<8x16x512xf32, #tpu.memory_space<vmem>>, %arg3: memref<1x512xf32, #tpu.memory_space<vmem>>, %arg4: memref<128x512xf32, #tpu.memory_space<vmem>>, %arg5: memref<128x128xf32, #tpu.memory_space<vmem>>, %arg6: memref<1x128xf32, #tpu.memory_space<vmem>>, %arg7: memref<16x128xf32, #tpu.memory_space<vmem>>, %arg8: memref<16x128xf32, #tpu.memory_space<vmem>>, %arg9: memref<16x128xf32, #tpu.memory_space<vmem>>) attributes {dimension_semantics = [#tpu.dimension_semantics<parallel>, #tpu.dimension_semantics<arbitrary>], iteration_bounds = array<i64: 1, 1>, scalar_prefetch = 0 : i64, scratch_operands = 2 : i64, tpu.core_type = #tpu.core_type<tc>, window_params = [{transform_indices = @transform_0, window_bounds = array<i64: 8, 16, 512>}, {pipeline_mode = #tpu.pipeline_mode<synchronous>, transform_indices = @transform_1, window_bounds = array<i64: 1, 512>}, {pipeline_mode = #tpu.pipeline_mode<synchronous>, transform_indices = @transform_2, window_bounds = array<i64: 128, 512>}, {pipeline_mode = #tpu.pipeline_mode<synchronous>, transform_indices = @transform_3, window_bounds = array<i64: 128, 128>}, {pipeline_mode = #tpu.pipeline_mode<synchronous>, transform_indices = @transform_4, window_bounds = array<i64: 1, 128>}, {transform_indices = @transform_5, window_bounds = array<i64: 16, 128>}]} {
    %c0_i32 = arith.constant 0 : i32
    %0 = arith.cmpi eq, %arg1, %c0_i32 : i32
    %1 = arith.extui %0 : i1 to i32
    %c0_i32_0 = arith.constant 0 : i32
    %2 = arith.cmpi ne, %1, %c0_i32_0 : i32
    scf.if %2 {
      %cst_62 = arith.constant 0.000000e+00 : f32
      %268 = vector.broadcast %cst_62 : f32 to vector<16x128xf32>
      %c0_63 = arith.constant 0 : index
      %c0_64 = arith.constant 0 : index
      %269 = vector.load %arg8[%c0_63, %c0_64] : memref<16x128xf32, #tpu.memory_space<vmem>>, vector<16x128xf32>
      tpu.vector_store %arg8[%c0_63, %c0_64], %268 {strides = array<i32>} : memref<16x128xf32, #tpu.memory_space<vmem>>, vector<16x128xf32>,
      %cst_65 = arith.constant 0.000000e+00 : f32
      %270 = vector.broadcast %cst_65 : f32 to vector<16x128xf32>
      %c0_66 = arith.constant 0 : index
      %c0_67 = arith.constant 0 : index
      %271 = vector.load %arg9[%c0_66, %c0_67] : memref<16x128xf32, #tpu.memory_space<vmem>>, vector<16x128xf32>
      tpu.vector_store %arg9[%c0_66, %c0_67], %270 {strides = array<i32>} : memref<16x128xf32, #tpu.memory_space<vmem>>, vector<16x128xf32>,
    } else {
    }
    %c0 = arith.constant 0 : index
    %c0_1 = arith.constant 0 : index
    %3 = vector.load %arg4[%c0, %c0_1] : memref<128x512xf32, #tpu.memory_space<vmem>>, vector<128x512xf32>
    %c0_2 = arith.constant 0 : index
    %c0_3 = arith.constant 0 : index
    %4 = vector.load %arg3[%c0_2, %c0_3] : memref<1x512xf32, #tpu.memory_space<vmem>>, vector<1x512xf32>
    %c0_4 = arith.constant 0 : index
    %c0_5 = arith.constant 0 : index
    %5 = vector.load %arg8[%c0_4, %c0_5] : memref<16x128xf32, #tpu.memory_space<vmem>>, vector<16x128xf32>
    %c0_6 = arith.constant 0 : index
    %c0_7 = arith.constant 0 : index
    %6 = vector.load %arg9[%c0_6, %c0_7] : memref<16x128xf32, #tpu.memory_space<vmem>>, vector<16x128xf32>
    %c0_i32_8 = arith.constant 0 : i32
    %7 = arith.index_cast %c0_i32_8 : i32 to index
    %c0_9 = arith.constant 0 : index
    %c0_10 = arith.constant 0 : index
    %8 = vector.load %arg2[%7, %c0_9, %c0_10] : memref<8x16x512xf32, #tpu.memory_space<vmem>>, vector<1x16x512xf32>
    %9 = vector.shape_cast %8 : vector<1x16x512xf32> to vector<16x512xf32>
    %10 = vector.broadcast %4 : vector<1x512xf32> to vector<16x512xf32>
    %11 = arith.addf %9, %10 : vector<16x512xf32>
    %cst = arith.constant dense<0.000000e+00> : vector<16x512xf32>
    %12 = tpu.matmul %5, %3, %cst {dimension_numbers = #tpu.dot_dimension_numbers<[1], [0], [0], [1], [0, 0, 1, 1], [], []>} : vector<16x128xf32>, vector<128x512xf32>, vector<16x512xf32> -> vector<16x512xf32>
    %13 = arith.addf %11, %12 : vector<16x512xf32>
    %14 = vector.extract_strided_slice %13 {offsets = [0, 0], sizes = [16, 128], strides = [1, 1]} : vector<16x512xf32> to vector<16x128xf32>
    %15 = arith.negf %14 : vector<16x128xf32>
    %16 = math.exp %15 : vector<16x128xf32>
    %cst_11 = arith.constant 1.000000e+00 : f32
    %17 = vector.broadcast %cst_11 : f32 to vector<16x128xf32>
    %18 = arith.addf %17, %16 : vector<16x128xf32>
    %19 = arith.divf %17, %18 : vector<16x128xf32>
    %20 = vector.extract_strided_slice %13 {offsets = [0, 128], sizes = [16, 128], strides = [1, 1]} : vector<16x512xf32> to vector<16x128xf32>
    %21 = arith.negf %20 : vector<16x128xf32>
    %22 = math.exp %21 : vector<16x128xf32>
    %cst_12 = arith.constant 1.000000e+00 : f32
    %23 = vector.broadcast %cst_12 : f32 to vector<16x128xf32>
    %24 = arith.addf %23, %22 : vector<16x128xf32>
    %25 = arith.divf %23, %24 : vector<16x128xf32>
    %26 = vector.extract_strided_slice %13 {offsets = [0, 256], sizes = [16, 128], strides = [1, 1]} : vector<16x512xf32> to vector<16x128xf32>
    %27 = math.tanh %26 : vector<16x128xf32>
    %28 = vector.extract_strided_slice %13 {offsets = [0, 384], sizes = [16, 128], strides = [1, 1]} : vector<16x512xf32> to vector<16x128xf32>
    %29 = arith.negf %28 : vector<16x128xf32>
    %30 = math.exp %29 : vector<16x128xf32>
    %cst_13 = arith.constant 1.000000e+00 : f32
    %31 = vector.broadcast %cst_13 : f32 to vector<16x128xf32>
    %32 = arith.addf %31, %30 : vector<16x128xf32>
    %33 = arith.divf %31, %32 : vector<16x128xf32>
    %34 = arith.mulf %25, %6 : vector<16x128xf32>
    %35 = arith.mulf %19, %27 : vector<16x128xf32>
    %36 = arith.addf %34, %35 : vector<16x128xf32>
    %37 = math.tanh %36 : vector<16x128xf32>
    %38 = arith.mulf %33, %37 : vector<16x128xf32>
    %c1_i32 = arith.constant 1 : i32
    %39 = arith.index_cast %c1_i32 : i32 to index
    %c0_14 = arith.constant 0 : index
    %c0_15 = arith.constant 0 : index
    %40 = vector.load %arg2[%39, %c0_14, %c0_15] : memref<8x16x512xf32, #tpu.memory_space<vmem>>, vector<1x16x512xf32>
    %41 = vector.shape_cast %40 : vector<1x16x512xf32> to vector<16x512xf32>
    %42 = vector.broadcast %4 : vector<1x512xf32> to vector<16x512xf32>
    %43 = arith.addf %41, %42 : vector<16x512xf32>
    %cst_16 = arith.constant dense<0.000000e+00> : vector<16x512xf32>
    %44 = tpu.matmul %38, %3, %cst_16 {dimension_numbers = #tpu.dot_dimension_numbers<[1], [0], [0], [1], [0, 0, 1, 1], [], []>} : vector<16x128xf32>, vector<128x512xf32>, vector<16x512xf32> -> vector<16x512xf32>
    %45 = arith.addf %43, %44 : vector<16x512xf32>
    %46 = vector.extract_strided_slice %45 {offsets = [0, 0], sizes = [16, 128], strides = [1, 1]} : vector<16x512xf32> to vector<16x128xf32>
    %47 = arith.negf %46 : vector<16x128xf32>
    %48 = math.exp %47 : vector<16x128xf32>
    %cst_17 = arith.constant 1.000000e+00 : f32
    %49 = vector.broadcast %cst_17 : f32 to vector<16x128xf32>
    %50 = arith.addf %49, %48 : vector<16x128xf32>
    %51 = arith.divf %49, %50 : vector<16x128xf32>
    %52 = vector.extract_strided_slice %45 {offsets = [0, 128], sizes = [16, 128], strides = [1, 1]} : vector<16x512xf32> to vector<16x128xf32>
    %53 = arith.negf %52 : vector<16x128xf32>
    %54 = math.exp %53 : vector<16x128xf32>
    %cst_18 = arith.constant 1.000000e+00 : f32
    %55 = vector.broadcast %cst_18 : f32 to vector<16x128xf32>
    %56 = arith.addf %55, %54 : vector<16x128xf32>
    %57 = arith.divf %55, %56 : vector<16x128xf32>
    %58 = vector.extract_strided_slice %45 {offsets = [0, 256], sizes = [16, 128], strides = [1, 1]} : vector<16x512xf32> to vector<16x128xf32>
    %59 = math.tanh %58 : vector<16x128xf32>
    %60 = vector.extract_strided_slice %45 {offsets = [0, 384], sizes = [16, 128], strides = [1, 1]} : vector<16x512xf32> to vector<16x128xf32>
    %61 = arith.negf %60 : vector<16x128xf32>
    %62 = math.exp %61 : vector<16x128xf32>
    %cst_19 = arith.constant 1.000000e+00 : f32
    %63 = vector.broadcast %cst_19 : f32 to vector<16x128xf32>
    %64 = arith.addf %63, %62 : vector<16x128xf32>
    %65 = arith.divf %63, %64 : vector<16x128xf32>
    %66 = arith.mulf %57, %36 : vector<16x128xf32>
    %67 = arith.mulf %51, %59 : vector<16x128xf32>
    %68 = arith.addf %66, %67 : vector<16x128xf32>
    %69 = math.tanh %68 : vector<16x128xf32>
    %70 = arith.mulf %65, %69 : vector<16x128xf32>
    %c2_i32 = arith.constant 2 : i32
    %71 = arith.index_cast %c2_i32 : i32 to index
    %c0_20 = arith.constant 0 : index
    %c0_21 = arith.constant 0 : index
    %72 = vector.load %arg2[%71, %c0_20, %c0_21] : memref<8x16x512xf32, #tpu.memory_space<vmem>>, vector<1x16x512xf32>
    %73 = vector.shape_cast %72 : vector<1x16x512xf32> to vector<16x512xf32>
    %74 = vector.broadcast %4 : vector<1x512xf32> to vector<16x512xf32>
    %75 = arith.addf %73, %74 : vector<16x512xf32>
    %cst_22 = arith.constant dense<0.000000e+00> : vector<16x512xf32>
    %76 = tpu.matmul %70, %3, %cst_22 {dimension_numbers = #tpu.dot_dimension_numbers<[1], [0], [0], [1], [0, 0, 1, 1], [], []>} : vector<16x128xf32>, vector<128x512xf32>, vector<16x512xf32> -> vector<16x512xf32>
    %77 = arith.addf %75, %76 : vector<16x512xf32>
    %78 = vector.extract_strided_slice %77 {offsets = [0, 0], sizes = [16, 128], strides = [1, 1]} : vector<16x512xf32> to vector<16x128xf32>
    %79 = arith.negf %78 : vector<16x128xf32>
    %80 = math.exp %79 : vector<16x128xf32>
    %cst_23 = arith.constant 1.000000e+00 : f32
    %81 = vector.broadcast %cst_23 : f32 to vector<16x128xf32>
    %82 = arith.addf %81, %80 : vector<16x128xf32>
    %83 = arith.divf %81, %82 : vector<16x128xf32>
    %84 = vector.extract_strided_slice %77 {offsets = [0, 128], sizes = [16, 128], strides = [1, 1]} : vector<16x512xf32> to vector<16x128xf32>
    %85 = arith.negf %84 : vector<16x128xf32>
    %86 = math.exp %85 : vector<16x128xf32>
    %cst_24 = arith.constant 1.000000e+00 : f32
    %87 = vector.broadcast %cst_24 : f32 to vector<16x128xf32>
    %88 = arith.addf %87, %86 : vector<16x128xf32>
    %89 = arith.divf %87, %88 : vector<16x128xf32>
    %90 = vector.extract_strided_slice %77 {offsets = [0, 256], sizes = [16, 128], strides = [1, 1]} : vector<16x512xf32> to vector<16x128xf32>
    %91 = math.tanh %90 : vector<16x128xf32>
    %92 = vector.extract_strided_slice %77 {offsets = [0, 384], sizes = [16, 128], strides = [1, 1]} : vector<16x512xf32> to vector<16x128xf32>
    %93 = arith.negf %92 : vector<16x128xf32>
    %94 = math.exp %93 : vector<16x128xf32>
    %cst_25 = arith.constant 1.000000e+00 : f32
    %95 = vector.broadcast %cst_25 : f32 to vector<16x128xf32>
    %96 = arith.addf %95, %94 : vector<16x128xf32>
    %97 = arith.divf %95, %96 : vector<16x128xf32>
    %98 = arith.mulf %89, %68 : vector<16x128xf32>
    %99 = arith.mulf %83, %91 : vector<16x128xf32>
    %100 = arith.addf %98, %99 : vector<16x128xf32>
    %101 = math.tanh %100 : vector<16x128xf32>
    %102 = arith.mulf %97, %101 : vector<16x128xf32>
    %c3_i32 = arith.constant 3 : i32
    %103 = arith.index_cast %c3_i32 : i32 to index
    %c0_26 = arith.constant 0 : index
    %c0_27 = arith.constant 0 : index
    %104 = vector.load %arg2[%103, %c0_26, %c0_27] : memref<8x16x512xf32, #tpu.memory_space<vmem>>, vector<1x16x512xf32>
    %105 = vector.shape_cast %104 : vector<1x16x512xf32> to vector<16x512xf32>
    %106 = vector.broadcast %4 : vector<1x512xf32> to vector<16x512xf32>
    %107 = arith.addf %105, %106 : vector<16x512xf32>
    %cst_28 = arith.constant dense<0.000000e+00> : vector<16x512xf32>
    %108 = tpu.matmul %102, %3, %cst_28 {dimension_numbers = #tpu.dot_dimension_numbers<[1], [0], [0], [1], [0, 0, 1, 1], [], []>} : vector<16x128xf32>, vector<128x512xf32>, vector<16x512xf32> -> vector<16x512xf32>
    %109 = arith.addf %107, %108 : vector<16x512xf32>
    %110 = vector.extract_strided_slice %109 {offsets = [0, 0], sizes = [16, 128], strides = [1, 1]} : vector<16x512xf32> to vector<16x128xf32>
    %111 = arith.negf %110 : vector<16x128xf32>
    %112 = math.exp %111 : vector<16x128xf32>
    %cst_29 = arith.constant 1.000000e+00 : f32
    %113 = vector.broadcast %cst_29 : f32 to vector<16x128xf32>
    %114 = arith.addf %113, %112 : vector<16x128xf32>
    %115 = arith.divf %113, %114 : vector<16x128xf32>
    %116 = vector.extract_strided_slice %109 {offsets = [0, 128], sizes = [16, 128], strides = [1, 1]} : vector<16x512xf32> to vector<16x128xf32>
    %117 = arith.negf %116 : vector<16x128xf32>
    %118 = math.exp %117 : vector<16x128xf32>
    %cst_30 = arith.constant 1.000000e+00 : f32
    %119 = vector.broadcast %cst_30 : f32 to vector<16x128xf32>
    %120 = arith.addf %119, %118 : vector<16x128xf32>
    %121 = arith.divf %119, %120 : vector<16x128xf32>
    %122 = vector.extract_strided_slice %109 {offsets = [0, 256], sizes = [16, 128], strides = [1, 1]} : vector<16x512xf32> to vector<16x128xf32>
    %123 = math.tanh %122 : vector<16x128xf32>
    %124 = vector.extract_strided_slice %109 {offsets = [0, 384], sizes = [16, 128], strides = [1, 1]} : vector<16x512xf32> to vector<16x128xf32>
    %125 = arith.negf %124 : vector<16x128xf32>
    %126 = math.exp %125 : vector<16x128xf32>
    %cst_31 = arith.constant 1.000000e+00 : f32
    %127 = vector.broadcast %cst_31 : f32 to vector<16x128xf32>
    %128 = arith.addf %127, %126 : vector<16x128xf32>
    %129 = arith.divf %127, %128 : vector<16x128xf32>
    %130 = arith.mulf %121, %100 : vector<16x128xf32>
    %131 = arith.mulf %115, %123 : vector<16x128xf32>
    %132 = arith.addf %130, %131 : vector<16x128xf32>
    %133 = math.tanh %132 : vector<16x128xf32>
    %134 = arith.mulf %129, %133 : vector<16x128xf32>
    %c4_i32 = arith.constant 4 : i32
    %135 = arith.index_cast %c4_i32 : i32 to index
    %c0_32 = arith.constant 0 : index
    %c0_33 = arith.constant 0 : index
    %136 = vector.load %arg2[%135, %c0_32, %c0_33] : memref<8x16x512xf32, #tpu.memory_space<vmem>>, vector<1x16x512xf32>
    %137 = vector.shape_cast %136 : vector<1x16x512xf32> to vector<16x512xf32>
    %138 = vector.broadcast %4 : vector<1x512xf32> to vector<16x512xf32>
    %139 = arith.addf %137, %138 : vector<16x512xf32>
    %cst_34 = arith.constant dense<0.000000e+00> : vector<16x512xf32>
    %140 = tpu.matmul %134, %3, %cst_34 {dimension_numbers = #tpu.dot_dimension_numbers<[1], [0], [0], [1], [0, 0, 1, 1], [], []>} : vector<16x128xf32>, vector<128x512xf32>, vector<16x512xf32> -> vector<16x512xf32>
    %141 = arith.addf %139, %140 : vector<16x512xf32>
    %142 = vector.extract_strided_slice %141 {offsets = [0, 0], sizes = [16, 128], strides = [1, 1]} : vector<16x512xf32> to vector<16x128xf32>
    %143 = arith.negf %142 : vector<16x128xf32>
    %144 = math.exp %143 : vector<16x128xf32>
    %cst_35 = arith.constant 1.000000e+00 : f32
    %145 = vector.broadcast %cst_35 : f32 to vector<16x128xf32>
    %146 = arith.addf %145, %144 : vector<16x128xf32>
    %147 = arith.divf %145, %146 : vector<16x128xf32>
    %148 = vector.extract_strided_slice %141 {offsets = [0, 128], sizes = [16, 128], strides = [1, 1]} : vector<16x512xf32> to vector<16x128xf32>
    %149 = arith.negf %148 : vector<16x128xf32>
    %150 = math.exp %149 : vector<16x128xf32>
    %cst_36 = arith.constant 1.000000e+00 : f32
    %151 = vector.broadcast %cst_36 : f32 to vector<16x128xf32>
    %152 = arith.addf %151, %150 : vector<16x128xf32>
    %153 = arith.divf %151, %152 : vector<16x128xf32>
    %154 = vector.extract_strided_slice %141 {offsets = [0, 256], sizes = [16, 128], strides = [1, 1]} : vector<16x512xf32> to vector<16x128xf32>
    %155 = math.tanh %154 : vector<16x128xf32>
    %156 = vector.extract_strided_slice %141 {offsets = [0, 384], sizes = [16, 128], strides = [1, 1]} : vector<16x512xf32> to vector<16x128xf32>
    %157 = arith.negf %156 : vector<16x128xf32>
    %158 = math.exp %157 : vector<16x128xf32>
    %cst_37 = arith.constant 1.000000e+00 : f32
    %159 = vector.broadcast %cst_37 : f32 to vector<16x128xf32>
    %160 = arith.addf %159, %158 : vector<16x128xf32>
    %161 = arith.divf %159, %160 : vector<16x128xf32>
    %162 = arith.mulf %153, %132 : vector<16x128xf32>
    %163 = arith.mulf %147, %155 : vector<16x128xf32>
    %164 = arith.addf %162, %163 : vector<16x128xf32>
    %165 = math.tanh %164 : vector<16x128xf32>
    %166 = arith.mulf %161, %165 : vector<16x128xf32>
    %c5_i32 = arith.constant 5 : i32
    %167 = arith.index_cast %c5_i32 : i32 to index
    %c0_38 = arith.constant 0 : index
    %c0_39 = arith.constant 0 : index
    %168 = vector.load %arg2[%167, %c0_38, %c0_39] : memref<8x16x512xf32, #tpu.memory_space<vmem>>, vector<1x16x512xf32>
    %169 = vector.shape_cast %168 : vector<1x16x512xf32> to vector<16x512xf32>
    %170 = vector.broadcast %4 : vector<1x512xf32> to vector<16x512xf32>
    %171 = arith.addf %169, %170 : vector<16x512xf32>
    %cst_40 = arith.constant dense<0.000000e+00> : vector<16x512xf32>
    %172 = tpu.matmul %166, %3, %cst_40 {dimension_numbers = #tpu.dot_dimension_numbers<[1], [0], [0], [1], [0, 0, 1, 1], [], []>} : vector<16x128xf32>, vector<128x512xf32>, vector<16x512xf32> -> vector<16x512xf32>
    %173 = arith.addf %171, %172 : vector<16x512xf32>
    %174 = vector.extract_strided_slice %173 {offsets = [0, 0], sizes = [16, 128], strides = [1, 1]} : vector<16x512xf32> to vector<16x128xf32>
    %175 = arith.negf %174 : vector<16x128xf32>
    %176 = math.exp %175 : vector<16x128xf32>
    %cst_41 = arith.constant 1.000000e+00 : f32
    %177 = vector.broadcast %cst_41 : f32 to vector<16x128xf32>
    %178 = arith.addf %177, %176 : vector<16x128xf32>
    %179 = arith.divf %177, %178 : vector<16x128xf32>
    %180 = vector.extract_strided_slice %173 {offsets = [0, 128], sizes = [16, 128], strides = [1, 1]} : vector<16x512xf32> to vector<16x128xf32>
    %181 = arith.negf %180 : vector<16x128xf32>
    %182 = math.exp %181 : vector<16x128xf32>
    %cst_42 = arith.constant 1.000000e+00 : f32
    %183 = vector.broadcast %cst_42 : f32 to vector<16x128xf32>
    %184 = arith.addf %183, %182 : vector<16x128xf32>
    %185 = arith.divf %183, %184 : vector<16x128xf32>
    %186 = vector.extract_strided_slice %173 {offsets = [0, 256], sizes = [16, 128], strides = [1, 1]} : vector<16x512xf32> to vector<16x128xf32>
    %187 = math.tanh %186 : vector<16x128xf32>
    %188 = vector.extract_strided_slice %173 {offsets = [0, 384], sizes = [16, 128], strides = [1, 1]} : vector<16x512xf32> to vector<16x128xf32>
    %189 = arith.negf %188 : vector<16x128xf32>
    %190 = math.exp %189 : vector<16x128xf32>
    %cst_43 = arith.constant 1.000000e+00 : f32
    %191 = vector.broadcast %cst_43 : f32 to vector<16x128xf32>
    %192 = arith.addf %191, %190 : vector<16x128xf32>
    %193 = arith.divf %191, %192 : vector<16x128xf32>
    %194 = arith.mulf %185, %164 : vector<16x128xf32>
    %195 = arith.mulf %179, %187 : vector<16x128xf32>
    %196 = arith.addf %194, %195 : vector<16x128xf32>
    %197 = math.tanh %196 : vector<16x128xf32>
    %198 = arith.mulf %193, %197 : vector<16x128xf32>
    %c6_i32 = arith.constant 6 : i32
    %199 = arith.index_cast %c6_i32 : i32 to index
    %c0_44 = arith.constant 0 : index
    %c0_45 = arith.constant 0 : index
    %200 = vector.load %arg2[%199, %c0_44, %c0_45] : memref<8x16x512xf32, #tpu.memory_space<vmem>>, vector<1x16x512xf32>
    %201 = vector.shape_cast %200 : vector<1x16x512xf32> to vector<16x512xf32>
    %202 = vector.broadcast %4 : vector<1x512xf32> to vector<16x512xf32>
    %203 = arith.addf %201, %202 : vector<16x512xf32>
    %cst_46 = arith.constant dense<0.000000e+00> : vector<16x512xf32>
    %204 = tpu.matmul %198, %3, %cst_46 {dimension_numbers = #tpu.dot_dimension_numbers<[1], [0], [0], [1], [0, 0, 1, 1], [], []>} : vector<16x128xf32>, vector<128x512xf32>, vector<16x512xf32> -> vector<16x512xf32>
    %205 = arith.addf %203, %204 : vector<16x512xf32>
    %206 = vector.extract_strided_slice %205 {offsets = [0, 0], sizes = [16, 128], strides = [1, 1]} : vector<16x512xf32> to vector<16x128xf32>
    %207 = arith.negf %206 : vector<16x128xf32>
    %208 = math.exp %207 : vector<16x128xf32>
    %cst_47 = arith.constant 1.000000e+00 : f32
    %209 = vector.broadcast %cst_47 : f32 to vector<16x128xf32>
    %210 = arith.addf %209, %208 : vector<16x128xf32>
    %211 = arith.divf %209, %210 : vector<16x128xf32>
    %212 = vector.extract_strided_slice %205 {offsets = [0, 128], sizes = [16, 128], strides = [1, 1]} : vector<16x512xf32> to vector<16x128xf32>
    %213 = arith.negf %212 : vector<16x128xf32>
    %214 = math.exp %213 : vector<16x128xf32>
    %cst_48 = arith.constant 1.000000e+00 : f32
    %215 = vector.broadcast %cst_48 : f32 to vector<16x128xf32>
    %216 = arith.addf %215, %214 : vector<16x128xf32>
    %217 = arith.divf %215, %216 : vector<16x128xf32>
    %218 = vector.extract_strided_slice %205 {offsets = [0, 256], sizes = [16, 128], strides = [1, 1]} : vector<16x512xf32> to vector<16x128xf32>
    %219 = math.tanh %218 : vector<16x128xf32>
    %220 = vector.extract_strided_slice %205 {offsets = [0, 384], sizes = [16, 128], strides = [1, 1]} : vector<16x512xf32> to vector<16x128xf32>
    %221 = arith.negf %220 : vector<16x128xf32>
    %222 = math.exp %221 : vector<16x128xf32>
    %cst_49 = arith.constant 1.000000e+00 : f32
    %223 = vector.broadcast %cst_49 : f32 to vector<16x128xf32>
    %224 = arith.addf %223, %222 : vector<16x128xf32>
    %225 = arith.divf %223, %224 : vector<16x128xf32>
    %226 = arith.mulf %217, %196 : vector<16x128xf32>
    %227 = arith.mulf %211, %219 : vector<16x128xf32>
    %228 = arith.addf %226, %227 : vector<16x128xf32>
    %229 = math.tanh %228 : vector<16x128xf32>
    %230 = arith.mulf %225, %229 : vector<16x128xf32>
    %c7_i32 = arith.constant 7 : i32
    %231 = arith.index_cast %c7_i32 : i32 to index
    %c0_50 = arith.constant 0 : index
    %c0_51 = arith.constant 0 : index
    %232 = vector.load %arg2[%231, %c0_50, %c0_51] : memref<8x16x512xf32, #tpu.memory_space<vmem>>, vector<1x16x512xf32>
    %233 = vector.shape_cast %232 : vector<1x16x512xf32> to vector<16x512xf32>
    %234 = vector.broadcast %4 : vector<1x512xf32> to vector<16x512xf32>
    %235 = arith.addf %233, %234 : vector<16x512xf32>
    %cst_52 = arith.constant dense<0.000000e+00> : vector<16x512xf32>
    %236 = tpu.matmul %230, %3, %cst_52 {dimension_numbers = #tpu.dot_dimension_numbers<[1], [0], [0], [1], [0, 0, 1, 1], [], []>} : vector<16x128xf32>, vector<128x512xf32>, vector<16x512xf32> -> vector<16x512xf32>
    %237 = arith.addf %235, %236 : vector<16x512xf32>
    %238 = vector.extract_strided_slice %237 {offsets = [0, 0], sizes = [16, 128], strides = [1, 1]} : vector<16x512xf32> to vector<16x128xf32>
    %239 = arith.negf %238 : vector<16x128xf32>
    %240 = math.exp %239 : vector<16x128xf32>
    %cst_53 = arith.constant 1.000000e+00 : f32
    %241 = vector.broadcast %cst_53 : f32 to vector<16x128xf32>
    %242 = arith.addf %241, %240 : vector<16x128xf32>
    %243 = arith.divf %241, %242 : vector<16x128xf32>
    %244 = vector.extract_strided_slice %237 {offsets = [0, 128], sizes = [16, 128], strides = [1, 1]} : vector<16x512xf32> to vector<16x128xf32>
    %245 = arith.negf %244 : vector<16x128xf32>
    %246 = math.exp %245 : vector<16x128xf32>
    %cst_54 = arith.constant 1.000000e+00 : f32
    %247 = vector.broadcast %cst_54 : f32 to vector<16x128xf32>
    %248 = arith.addf %247, %246 : vector<16x128xf32>
    %249 = arith.divf %247, %248 : vector<16x128xf32>
    %250 = vector.extract_strided_slice %237 {offsets = [0, 256], sizes = [16, 128], strides = [1, 1]} : vector<16x512xf32> to vector<16x128xf32>
    %251 = math.tanh %250 : vector<16x128xf32>
    %252 = vector.extract_strided_slice %237 {offsets = [0, 384], sizes = [16, 128], strides = [1, 1]} : vector<16x512xf32> to vector<16x128xf32>
    %253 = arith.negf %252 : vector<16x128xf32>
    %254 = math.exp %253 : vector<16x128xf32>
    %cst_55 = arith.constant 1.000000e+00 : f32
    %255 = vector.broadcast %cst_55 : f32 to vector<16x128xf32>
    %256 = arith.addf %255, %254 : vector<16x128xf32>
    %257 = arith.divf %255, %256 : vector<16x128xf32>
    %258 = arith.mulf %249, %228 : vector<16x128xf32>
    %259 = arith.mulf %243, %251 : vector<16x128xf32>
    %260 = arith.addf %258, %259 : vector<16x128xf32>
    %261 = math.tanh %260 : vector<16x128xf32>
    %262 = arith.mulf %257, %261 : vector<16x128xf32>
    %c8_i32 = arith.constant 8 : i32
    %c0_56 = arith.constant 0 : index
    %c0_57 = arith.constant 0 : index
    %263 = vector.load %arg8[%c0_56, %c0_57] : memref<16x128xf32, #tpu.memory_space<vmem>>, vector<16x128xf32>
    tpu.vector_store %arg8[%c0_56, %c0_57], %262 {strides = array<i32>} : memref<16x128xf32, #tpu.memory_space<vmem>>, vector<16x128xf32>,
    %c0_58 = arith.constant 0 : index
    %c0_59 = arith.constant 0 : index
    %264 = vector.load %arg9[%c0_58, %c0_59] : memref<16x128xf32, #tpu.memory_space<vmem>>, vector<16x128xf32>
    tpu.vector_store %arg9[%c0_58, %c0_59], %260 {strides = array<i32>} : memref<16x128xf32, #tpu.memory_space<vmem>>, vector<16x128xf32>,
    %c0_i32_60 = arith.constant 0 : i32
    %265 = arith.cmpi eq, %arg1, %c0_i32_60 : i32
    %266 = arith.extui %265 : i1 to i32
    %c0_i32_61 = arith.constant 0 : i32
    %267 = arith.cmpi ne, %266, %c0_i32_61 : i32
    scf.if %267 {
      %c0_62 = arith.constant 0 : index
      %c0_63 = arith.constant 0 : index
      %268 = vector.load %arg5[%c0_62, %c0_63] : memref<128x128xf32, #tpu.memory_space<vmem>>, vector<128x128xf32>
      %cst_64 = arith.constant dense<0.000000e+00> : vector<16x128xf32>
      %269 = tpu.matmul %262, %268, %cst_64 {dimension_numbers = #tpu.dot_dimension_numbers<[1], [0], [0], [1], [0, 0, 1, 1], [], []>} : vector<16x128xf32>, vector<128x128xf32>, vector<16x128xf32> -> vector<16x128xf32>
      %c0_65 = arith.constant 0 : index
      %c0_66 = arith.constant 0 : index
      %270 = vector.load %arg6[%c0_65, %c0_66] : memref<1x128xf32, #tpu.memory_space<vmem>>, vector<1x128xf32>
      %271 = vector.broadcast %270 : vector<1x128xf32> to vector<16x128xf32>
      %272 = arith.addf %269, %271 : vector<16x128xf32>
      %c0_67 = arith.constant 0 : index
      %c0_68 = arith.constant 0 : index
      %273 = vector.load %arg7[%c0_67, %c0_68] : memref<16x128xf32, #tpu.memory_space<vmem>>, vector<16x128xf32>
      tpu.vector_store %arg7[%c0_67, %c0_68], %272 {strides = array<i32>} : memref<16x128xf32, #tpu.memory_space<vmem>>, vector<16x128xf32>,
    } else {
    }
    return
  }
  func.func @transform_0(%arg0: i32, %arg1: i32) -> (i32, i32, i32) {
    %c0_i32 = arith.constant 0 : i32
    %c0_i32_0 = arith.constant 0 : i32
    return %arg1, %arg0, %c0_i32 : i32, i32, i32
  }
  func.func @transform_1(%arg0: i32, %arg1: i32) -> (i32, i32) {
    %c0_i32 = arith.constant 0 : i32
    %c0_i32_0 = arith.constant 0 : i32
    %c0_i32_1 = arith.constant 0 : i32
    return %c0_i32, %c0_i32_0 : i32, i32
  }
  func.func @transform_2(%arg0: i32, %arg1: i32) -> (i32, i32) {
    %c0_i32 = arith.constant 0 : i32
    %c0_i32_0 = arith.constant 0 : i32
    %c0_i32_1 = arith.constant 0 : i32
    return %c0_i32, %c0_i32_0 : i32, i32
  }
  func.func @transform_3(%arg0: i32, %arg1: i32) -> (i32, i32) {
    %c0_i32 = arith.constant 0 : i32
    %c0_i32_0 = arith.constant 0 : i32
    %c0_i32_1 = arith.constant 0 : i32
    return %c0_i32, %c0_i32_0 : i32, i32
  }
  func.func @transform_4(%arg0: i32, %arg1: i32) -> (i32, i32) {
    %c0_i32 = arith.constant 0 : i32
    %c0_i32_0 = arith.constant 0 : i32
    %c0_i32_1 = arith.constant 0 : i32
    return %c0_i32, %c0_i32_0 : i32, i32
  }
  func.func @transform_5(%arg0: i32, %arg1: i32) -> (i32, i32) {
    %c0_i32 = arith.constant 0 : i32
    %c0_i32_0 = arith.constant 0 : i32
    return %arg0, %c0_i32 : i32, i32
  }
}

</mosaic_0001>

<bundles_post_ra>
// kernel: _rnn_forward_padded.2
= control target key start
LH: loop header
LB: loop body
LE: loop exit
PB: predicated region body
PF: predicated region fallthrough
CT: control target
= control target key end

     0   :  { %v3983_v3 = vmov 0.0   ;;  %s3977_s2 = inlined_call_operand.vmem [shape: f32[128,512], index: 2, kind: input, shape index: {}]   ;;  %s3978_s1 = inlined_call_operand.vmem [shape: f32[1,512], index: 1, kind: input, shape index: {}]   ;;  %s3979_s0 = inlined_call_operand.vmem [shape: f32[8,16,512], index: 0, kind: input, shape index: {}]   ;;  %s3980_s3 = inlined_call_operand.vmem [shape: f32[8,16,128], index: 3, kind: output, shape index: {}]  }
   0x1   :  { %v2421_v0 = vld [vmem:[%s3977_s2 + $0x1e8] sm:$0xff]  ;;  %v2426_v1 = vld [vmem:[%s3977_s2 + $0x1e0] sm:$0xff]  ;;  %192 = vmatprep.mubr.f32.mxu0 %v3983_v3  ;;  %269 = vmatprep.mubr.f32.mxu1 %v3983_v3  ;;  %v2468_v9 = vld [vmem:[%s3977_s2 + $0x1f8] sm:$0xff] }
   0x2   :  { %4093 = vst [vmem:[#allocation4_spill] sm:$0xff] %v2421_v0  ;;  %v2431_v2 = vld [vmem:[%s3977_s2 + $0x1c8] sm:$0xff]  ;;  %128 = vmatprep.subr.mxu0 %v2421_v0  ;;  %v2439_v4 = vld [vmem:[%s3977_s2 + $0x1c0] sm:$0xff]  ;;  %4094 = vst [vmem:[#allocation5_spill] sm:$0xff] %v2468_v9  ;;  %205 = vmatprep.subr.mxu1 %v2468_v9 }
   0x3   :  { %129 = vmatpush1.msra.mxu0 %v2426_v1  ;;  %v2445_v5 = vld [vmem:[%s3977_s2 + $0x1a8] sm:$0xff]  ;;  %v2451_v6 = vld [vmem:[%s3977_s2 + $0x1a0] sm:$0xff]  ;;  %v2480_v11 = vld [vmem:[%s3977_s2 + $0x1f0] sm:$0xff] }
   0x4   :  { %130 = vmatprep.subr.mxu0 %v2431_v2  ;;  %v2457_v7 = vld [vmem:[%s3977_s2 + $0x188] sm:$0xff]  ;;  %v2463_v8 = vld [vmem:[%s3977_s2 + $0x180] sm:$0xff]  ;;  %206 = vmatpush1.msra.mxu1 %v2480_v11  ;;  %v2492_v13 = vld [vmem:[%s3977_s2 + $0x1d8] sm:$0xff] }
   0x5   :  { %131 = vmatpush1.msra.mxu0 %v2439_v4  ;;  %v2474_v10 = vld [vmem:[%s3977_s2 + $0x168] sm:$0xff]  ;;  %v2486_v12 = vld [vmem:[%s3977_s2 + $0x160] sm:$0xff]  ;;  %v2497_v14 = vld [vmem:[%s3977_s2 + $0x1d0] sm:$0xff]  ;;  %207 = vmatprep.subr.mxu1 %v2492_v13 }
   0x6   :  { %132 = vmatprep.subr.mxu0 %v2445_v5  ;;  %v2503_v15 = vld [vmem:[%s3977_s2 + $0x148] sm:$0xff]  ;;  %v2509_v16 = vld [vmem:[%s3977_s2 + $0x1b8] sm:$0xff]  ;;  %v2515_v17 = vld [vmem:[%s3977_s2 + $0x140] sm:$0xff]  ;;  %208 = vmatpush1.msra.mxu1 %v2497_v14 }
   0x7   :  { %133 = vmatpush1.msra.mxu0 %v2451_v6  ;;  %v2521_v18 = vld [vmem:[%s3977_s2 + $0x1b0] sm:$0xff]  ;;  %v2526_v19 = vld [vmem:[%s3977_s2 + $0x198] sm:$0xff]  ;;  %v2532_v20 = vld [vmem:[%s3977_s2 + $0x128] sm:$0xff]  ;;  %209 = vmatprep.subr.mxu1 %v2509_v16 }
   0x8   :  { %134 = vmatprep.subr.mxu0 %v2457_v7  ;;  %v2538_v21 = vld [vmem:[%s3977_s2 + $0x190] sm:$0xff]  ;;  %v2544_v22 = vld [vmem:[%s3977_s2 + $0x120] sm:$0xff]  ;;  %210 = vmatpush1.msra.mxu1 %v2521_v18  ;;  %v2550_v23 = vld [vmem:[%s3977_s2 + $0x178] sm:$0xff] }
   0x9   :  { %135 = vmatpush1.msra.mxu0 %v2463_v8  ;;  %v2556_v24 = vld [vmem:[%s3977_s2 + $0x108] sm:$0xff]  ;;  %211 = vmatprep.subr.mxu1 %v2526_v19  ;;  %v2562_v25 = vld [vmem:[%s3977_s2 + $0x170] sm:$0xff]  ;;  %v2568_v26 = vld [vmem:[%s3977_s2 + $0x100] sm:$0xff] }
   0xa   :  { %136 = vmatprep.subr.mxu0 %v2474_v10  ;;  %212 = vmatpush1.msra.mxu1 %v2538_v21  ;;  %v2574_v27 = vld [vmem:[%s3977_s2 + $0x158] sm:$0xff]  ;;  %v2580_v28 = vld [vmem:[%s3977_s2 + $0xe8] sm:$0xff]  ;;  %v2586_v29 = vld [vmem:[%s3977_s2 + $0x150] sm:$0xff] }
   0xb   :  { %137 = vmatpush1.msra.mxu0 %v2486_v12  ;;  %213 = vmatprep.subr.mxu1 %v2550_v23  ;;  %v2592_v30 = vld [vmem:[%s3977_s2 + $0xe0] sm:$0xff]  ;;  %v2598_v31 = vld [vmem:[%s3977_s2 + $0x138] sm:$0xff]  ;;  %v2604_v32 = vld [vmem:[%s3977_s2 + $0xc8] sm:$0xff] }
   0xc   :  { %138 = vmatprep.subr.mxu0 %v2503_v15  ;;  %214 = vmatpush1.msra.mxu1 %v2562_v25  ;;  %v2610_v33 = vld [vmem:[%s3977_s2 + $0x130] sm:$0xff]  ;;  %v2616_v34 = vld [vmem:[%s3977_s2 + $0xc0] sm:$0xff]  ;;  %v2622_v35 = vld [vmem:[%s3977_s2 + $0x118] sm:$0xff] }
   0xd   :  { %139 = vmatpush1.msra.mxu0 %v2515_v17  ;;  %215 = vmatprep.subr.mxu1 %v2574_v27  ;;  %v2628_v36 = vld [vmem:[%s3977_s2 + $0xa8] sm:$0xff]  ;;  %v2634_v37 = vld [vmem:[%s3977_s2 + $0x110] sm:$0xff]  ;;  %v2640_v38 = vld [vmem:[%s3977_s2 + $0xa0] sm:$0xff] }
   0xe   :  { %140 = vmatprep.subr.mxu0 %v2532_v20  ;;  %216 = vmatpush1.msra.mxu1 %v2586_v29  ;;  %4095 = vst [vmem:[#allocation6_spill] sm:$0xff] %v2640_v38  ;;  %v2646_v39 = vld [vmem:[%s3977_s2 + $0xf8] sm:$0xff]  ;;  %v2652_v40 = vld [vmem:[%s3977_s2 + $0x88] sm:$0xff]  ;;  %v2658_v41 = vld [vmem:[%s3977_s2 + $0xf0] sm:$0xff] }
   0xf   :  { %141 = vmatpush1.msra.mxu0 %v2544_v22  ;;  %217 = vmatprep.subr.mxu1 %v2598_v31  ;;  %4096 = vst [vmem:[#allocation7_spill] sm:$0xff] %v2652_v40  ;;  %v2664_v42 = vld [vmem:[%s3977_s2 + $0x80] sm:$0xff]  ;;  %v2670_v43 = vld [vmem:[%s3977_s2 + $0xd8] sm:$0xff]  ;;  %v2676_v44 = vld [vmem:[%s3977_s2 + $0x68] sm:$0xff] }
  0x10   :  { %142 = vmatprep.subr.mxu0 %v2556_v24  ;;  %218 = vmatpush1.msra.mxu1 %v2610_v33  ;;  %4097 = vst [vmem:[#allocation8_spill] sm:$0xff] %v2664_v42  ;;  %4098 = vst [vmem:[#allocation9_spill] sm:$0xff] %v2676_v44  ;;  %v2682_v45 = vld [vmem:[%s3977_s2 + $0xd0] sm:$0xff]  ;;  %v2688_v46 = vld [vmem:[%s3977_s2 + $0x60] sm:$0xff] }
  0x11   :  { %143 = vmatpush1.msra.mxu0 %v2568_v26  ;;  %219 = vmatprep.subr.mxu1 %v2622_v35  ;;  %4099 = vst [vmem:[#allocation10_spill] sm:$0xff] %v2688_v46  ;;  %v2694_v47 = vld [vmem:[%s3977_s2 + $0xb8] sm:$0xff]  ;;  %v2700_v48 = vld [vmem:[%s3977_s2 + $0x48] sm:$0xff]  ;;  %v2706_v49 = vld [vmem:[%s3977_s2 + $0xb0] sm:$0xff] }
  0x12   :  { %144 = vmatprep.subr.mxu0 %v2580_v28  ;;  %220 = vmatpush1.msra.mxu1 %v2634_v37  ;;  %4100 = vst [vmem:[#allocation11_spill] sm:$0xff] %v2694_v47  ;;  %4101 = vst [vmem:[#allocation12_spill] sm:$0xff] %v2700_v48  ;;  %v2712_v50 = vld [vmem:[%s3977_s2 + $0x40] sm:$0xff]  ;;  %v2718_v51 = vld [vmem:[%s3977_s2 + $0x98] sm:$0xff] }
  0x13   :  { %145 = vmatpush1.msra.mxu0 %v2592_v30  ;;  %221 = vmatprep.subr.mxu1 %v2646_v39  ;;  %4102 = vst [vmem:[#allocation13_spill] sm:$0xff] %v2706_v49  ;;  %4103 = vst [vmem:[#allocation14_spill] sm:$0xff] %v2712_v50  ;;  %v2724_v52 = vld [vmem:[%s3977_s2 + $0x28] sm:$0xff]  ;;  %v2730_v53 = vld [vmem:[%s3977_s2 + $0x90] sm:$0xff] }
  0x14   :  { %146 = vmatprep.subr.mxu0 %v2604_v32  ;;  %222 = vmatpush1.msra.mxu1 %v2658_v41  ;;  %4104 = vst [vmem:[#allocation15_spill] sm:$0xff] %v2718_v51  ;;  %4105 = vst [vmem:[#allocation16_spill] sm:$0xff] %v2724_v52  ;;  %v2736_v54 = vld [vmem:[%s3977_s2 + $0x20] sm:$0xff]  ;;  %v2742_v55 = vld [vmem:[%s3977_s2 + $0x78] sm:$0xff] }
  0x15   :  { %147 = vmatpush1.msra.mxu0 %v2616_v34  ;;  %223 = vmatprep.subr.mxu1 %v2670_v43  ;;  %4106 = vst [vmem:[#allocation17_spill] sm:$0xff] %v2730_v53  ;;  %4107 = vst [vmem:[#allocation18_spill] sm:$0xff] %v2736_v54  ;;  %v2748_v56 = vld [vmem:[%s3977_s2 + $0x8] sm:$0xff]  ;;  %v2754_v57 = vld [vmem:[%s3977_s2 + $0x70] sm:$0xff] }
  0x16   :  { %148 = vmatprep.subr.mxu0 %v2628_v36  ;;  %224 = vmatpush1.msra.mxu1 %v2682_v45  ;;  %4108 = vst [vmem:[#allocation19_spill] sm:$0xff] %v2742_v55  ;;  %4109 = vst [vmem:[#allocation20_spill] sm:$0xff] %v2748_v56  ;;  %v2760_v58 = vld [vmem:[%s3977_s2] sm:$0xff]  ;;  %v2766_v59 = vld [vmem:[%s3977_s2 + $0x58] sm:$0xff] }
  0x17   :  { %149 = vmatpush1.msra.mxu0 %v2640_v38  ;;  %225 = vmatprep.subr.mxu1 %v2694_v47  ;;  %4110 = vst [vmem:[#allocation21_spill] sm:$0xff] %v2754_v57  ;;  %4111 = vst [vmem:[#allocation22_spill] sm:$0xff] %v2760_v58  ;;  %v2773_v60 = vld [vmem:[%s3977_s2 + $0x50] sm:$0xff]  ;;  %v2780_v61 = vld [vmem:[%s3977_s2 + $0x38] sm:$0xff] }
  0x18   :  { %150 = vmatprep.subr.mxu0 %v2652_v40  ;;  %226 = vmatpush1.msra.mxu1 %v2706_v49  ;;  %4112 = vst [vmem:[#allocation23_spill] sm:$0xff] %v2766_v59  ;;  %4113 = vst [vmem:[#allocation24_spill] sm:$0xff] %v2773_v60  ;;  %v2787_v62 = vld [vmem:[%s3977_s2 + $0x30] sm:$0xff]  ;;  %v2794_v63 = vld [vmem:[%s3977_s2 + $0x18] sm:$0xff] }
  0x19   :  { %151 = vmatpush1.msra.mxu0 %v2664_v42  ;;  %227 = vmatprep.subr.mxu1 %v2718_v51  ;;  %4114 = vst [vmem:[#allocation25_spill] sm:$0xff] %v2780_v61  ;;  %4115 = vst [vmem:[#allocation26_spill] sm:$0xff] %v2787_v62 }
  0x1a   :  { %152 = vmatprep.subr.mxu0 %v2676_v44  ;;  %228 = vmatpush1.msra.mxu1 %v2730_v53  ;;  %4116 = vst [vmem:[#allocation27_spill] sm:$0xff] %v2794_v63 }
  0x1b   :  { %153 = vmatpush1.msra.mxu0 %v2688_v46  ;;  %229 = vmatprep.subr.mxu1 %v2742_v55 }
  0x1c   :  { %154 = vmatprep.subr.mxu0 %v2700_v48  ;;  %230 = vmatpush1.msra.mxu1 %v2754_v57 }
  0x1d   :  { %155 = vmatpush1.msra.mxu0 %v2712_v50  ;;  %231 = vmatprep.subr.mxu1 %v2766_v59 }
  0x1e   :  { %156 = vmatprep.subr.mxu0 %v2724_v52  ;;  %232 = vmatpush1.msra.mxu1 %v2773_v60 }
  0x1f   :  { %157 = vmatpush1.msra.mxu0 %v2736_v54  ;;  %233 = vmatprep.subr.mxu1 %v2780_v61 }
  0x20   :  { %158 = vmatprep.subr.mxu0 %v2748_v56  ;;  %234 = vmatpush1.msra.mxu1 %v2787_v62 }
  0x21   :  { %159 = vmatpush1.msra.mxu0 %v2760_v58  ;;  %v2801_v58 = vld [vmem:[%s3977_s2 + $0x10] sm:$0xff]  ;;  %235 = vmatprep.subr.mxu1 %v2794_v63 }
  0x22   :  { %193 = vmatmul.mubr.f32.vlgmr.msra.gmra.mxu0 %v3983_v3  ;;  %4117 = vst [vmem:[#allocation28_spill] sm:$0xff] %v2801_v58  ;;  %357 = vmatprep.subr.mxu0 %v2421_v0 }
  0x23   :  { %198 = vmatprep.mubr.f32.mxu0 %v3983_v3  ;;  %358 = vmatpush1.msra.mxu0 %v2426_v1 }
  0x24   :  { %236 = vmatpush1.msra.mxu1 %v2801_v58  ;;  %359 = vmatprep.subr.mxu0 %v2431_v2 }
  0x25   :  { %270 = vmatmul.mubr.f32.vlgmr.msra.gmra.mxu1 %v3983_v3  ;;  %434 = vmatprep.subr.mxu1 %v2468_v9 }
  0x26   :  { %199 = vmatmul.mubr.f32.gmra.mxu0 %v3983_v3  ;;  %275 = vmatprep.mubr.f32.mxu1 %v3983_v3 }
  0x27   :  { %435 = vmatpush1.msra.mxu1 %v2480_v11  ;;  %360 = vmatpush1.msra.mxu0 %v2439_v4 }
  0x28   :  { %436 = vmatprep.subr.mxu1 %v2492_v13  ;;  %361 = vmatprep.subr.mxu0 %v2445_v5 }
  0x29   :  { %437 = vmatpush1.msra.mxu1 %v2497_v14  ;;  %362 = vmatpush1.msra.mxu0 %v2451_v6 }
  0x2a   :  { %276 = vmatmul.mubr.f32.gmra.mxu1 %v3983_v3  ;;  %438 = vmatprep.subr.mxu1 %v2509_v16  ;;  %v4118_v3 = vld [vmem:[#allocation22_spill] sm:$0xff] }
  0x2b   :  { %439 = vmatpush1.msra.mxu1 %v2521_v18  ;;  %363 = vmatprep.subr.mxu0 %v2457_v7 }
  0x2c   :  { %440 = vmatprep.subr.mxu1 %v2526_v19  ;;  %364 = vmatpush1.msra.mxu0 %v2463_v8 }
  0x2d   :  { %441 = vmatpush1.msra.mxu1 %v2538_v21  ;;  %365 = vmatprep.subr.mxu0 %v2474_v10 }
  0x2e   :  { %442 = vmatprep.subr.mxu1 %v2550_v23  ;;  %366 = vmatpush1.msra.mxu0 %v2486_v12 }
  0x2f   :  { %443 = vmatpush1.msra.mxu1 %v2562_v25  ;;  %367 = vmatprep.subr.mxu0 %v2503_v15 }
  0x30   :  { %444 = vmatprep.subr.mxu1 %v2574_v27  ;;  %368 = vmatpush1.msra.mxu0 %v2515_v17 }
  0x31   :  { %445 = vmatpush1.msra.mxu1 %v2586_v29  ;;  %369 = vmatprep.subr.mxu0 %v2532_v20 }
  0x32   :  { %446 = vmatprep.subr.mxu1 %v2598_v31  ;;  %370 = vmatpush1.msra.mxu0 %v2544_v22 }
  0x33   :  { %447 = vmatpush1.msra.mxu1 %v2610_v33  ;;  %371 = vmatprep.subr.mxu0 %v2556_v24 }
  0x34   :  { %448 = vmatprep.subr.mxu1 %v2622_v35  ;;  %372 = vmatpush1.msra.mxu0 %v2568_v26 }
  0x35   :  { %449 = vmatpush1.msra.mxu1 %v2634_v37  ;;  %373 = vmatprep.subr.mxu0 %v2580_v28 }
  0x36   :  { %450 = vmatprep.subr.mxu1 %v2646_v39  ;;  %374 = vmatpush1.msra.mxu0 %v2592_v30 }
  0x37   :  { %451 = vmatpush1.msra.mxu1 %v2658_v41  ;;  %375 = vmatprep.subr.mxu0 %v2604_v32 }
  0x38   :  { %452 = vmatprep.subr.mxu1 %v2670_v43  ;;  %376 = vmatpush1.msra.mxu0 %v2616_v34 }
  0x39   :  { %453 = vmatpush1.msra.mxu1 %v2682_v45  ;;  %377 = vmatprep.subr.mxu0 %v2628_v36 }
  0x3a   :  { %454 = vmatprep.subr.mxu1 %v2694_v47  ;;  %378 = vmatpush1.msra.mxu0 %v2640_v38  ;;  %v94_v38 = vld [vmem:[%s3979_s0 + $0x18] sm:$0xff] }
  0x3b   :  { %455 = vmatpush1.msra.mxu1 %v2706_v49  ;;  %379 = vmatprep.subr.mxu0 %v2652_v40 }
  0x3c   :  { %456 = vmatprep.subr.mxu1 %v2718_v51  ;;  %380 = vmatpush1.msra.mxu0 %v2664_v42 }
  0x3d   :  { %457 = vmatpush1.msra.mxu1 %v2730_v53  ;;  %381 = vmatprep.subr.mxu0 %v2676_v44 }
  0x3e   :  { %458 = vmatprep.subr.mxu1 %v2742_v55  ;;  %382 = vmatpush1.msra.mxu0 %v2688_v46 }
  0x3f   :  { %459 = vmatpush1.msra.mxu1 %v2754_v57  ;;  %383 = vmatprep.subr.mxu0 %v2700_v48  ;;  %v4119_v48 = vmov 0.0  }
  0x40   :  { %460 = vmatprep.subr.mxu1 %v2766_v59  ;;  %384 = vmatpush1.msra.mxu0 %v2712_v50  ;;  %v96_v50 = vld [vmem:[%s3979_s0 + $0x28] sm:$0xff] }
  0x41   :  { %461 = vmatpush1.msra.mxu1 %v2773_v60  ;;  %385 = vmatprep.subr.mxu0 %v2724_v52 }
  0x42   :  { %462 = vmatprep.subr.mxu1 %v2780_v61  ;;  %386 = vmatpush1.msra.mxu0 %v2736_v54  ;;  %v100_v61 = vlaneseq }
  0x43   :  { %463 = vmatpush1.msra.mxu1 %v2787_v62  ;;  %387 = vmatprep.subr.mxu0 %v2748_v56  ;;  %v86_v56 = vld [vmem:[%s3978_s1] sm:$0xf] }
  0x44   :  { %464 = vmatprep.subr.mxu1 %v2794_v63  ;;  %388 = vmatpush1.msra.mxu0 %v4118_v3  ;;  %v101_v54 = vshrl.u32 %v100_v61, 7 }
  0x45   :  { %421 = vmatprep.mubr.f32.mxu0 %v4119_v48  ;;  %465 = vmatpush1.msra.mxu1 %v2801_v58  ;;  %v91_v58 = vld [vmem:[%s3979_s0] sm:$0xff] }
  0x46   :  { %498 = vmatprep.mubr.f32.mxu1 %v4119_v48  ;;  %587 = vmatprep.subr.mxu0 %v2421_v0  ;;  %v102_v52 = vsub.s32 0, %v101_v54  ;;  %v106_v63 = vsub.s32 1, %v101_v54  ;;  %v95_v0 = vld [vmem:[%s3979_s0 + $0x20] sm:$0xff]  ;;  %v114_v59 = vsub.s32 3, %v101_v54  ;;  %v110_v53 = vsub.s32 2, %v101_v54 }
  0x47   :  { %664 = vmatprep.subr.mxu1 %v2468_v9  ;;  %v92_v9 = vld [vmem:[%s3979_s0 + $0x8] sm:$0xff] }
  0x48   :  { %v2881_v62 = vrot.slane %v86_v56, %v102_v52  ;;  %v2886_v3 = vrot.slane %v86_v56, %v106_v63  ;;  %v2901_v51 = vrot.slane %v86_v56, %v114_v59 }
  0x4a   :  { %4120 = vst [vmem:[#allocation29_spill] sm:$0xff] %v2881_v62  ;;  %4121 = vst [vmem:[#allocation30_spill] sm:$0xff] %v2886_v3  ;;  %v120_v61 = vadd.f32 %v2881_v62, %v91_v58  ;;  %v121_v60 = vadd.f32 %v2886_v3, %v92_v9  ;;  %v124_v57 = vadd.f32 %v2881_v62, %v95_v0 }
  0x4b   :  { %v125_v58 = vadd.f32 %v2886_v3, %v96_v50  ;;  %4122 = vst [vmem:[#allocation31_spill] sm:$0xff] %v2901_v51  ;;  %v93_v50 = vld [vmem:[%s3979_s0 + $0x10] sm:$0xff]  ;;  %v123_v54 = vadd.f32 %v2901_v51, %v94_v38 }
  0xe2   :  { %v194_v52 = vpop.f32.mrf.mxu0 }
  0xe3   :  { %v282_v63 = vadd.f32 %v194_v52, %v120_v61 }
  0xe4   :  { %v196_v46 = vpop.f32.mrf.mxu0 }
  0xe5   :  { %v1958_v55 = vmul.f32 -1.442695, %v282_v63  ;;  %v283_v44 = vadd.f32 %v196_v46, %v121_v60  ;;  %v271_v49 = vpop.f32.mrf.mxu1  ;;  %v2906_v63 = vrot.slane %v86_v56, %v110_v53  ;;  %v97_v53 = vld [vmem:[%s3979_s0 + $0x30] sm:$0xff] }
  0xe6   :  { %v200_v42 = vpop.f32.mrf.mxu0 }
  0xe7   :  { %2077 = vpow2.f32 %v1958_v55  ;;  %v1960_v9 = vmul.f32 -1.442695, %v283_v44  ;;  %v286_v40 = vadd.f32 %v200_v42, %v124_v57  ;;  %v273_v46 = vpop.f32.mrf.mxu1  ;;  %v98_v55 = vld [vmem:[%s3979_s0 + $0x38] sm:$0xff]  ;;  %v126_v38 = vadd.f32 %v2906_v63, %v97_v53 }
  0xe8   :  { %v202_v61 = vpop.f32.mrf.mxu0  ;;  %v285_v56 = vadd.f32 %v273_v46, %v123_v54  ;;  %v127_v57 = vadd.f32 %v2901_v51, %v98_v55 }
  0xe9   :  { %2079 = vpow2.f32 %v1960_v9  ;;  %v1959_v0 = vmul.f32 -1.442695, %v286_v40  ;;  %v287_v52 = vadd.f32 %v202_v61, %v125_v58  ;;  %v122_v40 = vadd.f32 %v2906_v63, %v93_v50 }
  0xea   :  { %v277_v44 = vpop.f32.mrf.mxu1  ;;  %v1962_v58 = vmul.f32 -1.442695, %v285_v56 }
  0xeb   :  { %2081 = vpow2.f32 %v1959_v0  ;;  %v1961_v42 = vmul.f32 -1.442695, %v287_v52  ;;  %v284_v60 = vadd.f32 %v271_v49, %v122_v40  ;;  %v288_v0 = vadd.f32 %v277_v44, %v126_v38 }
  0xec   :  { %v279_v59 = vpop.f32.mrf.mxu1 }
  0xed   :  { %2083 = vpow2.f32 %v1961_v42  ;;  %v289_v9 = vadd.f32 %v279_v59, %v127_v57 }
  0xee   :  { %2085 = vtanh.f32 %v284_v60 }
  0xef   :  { %2087 = vpow2.f32 %v1962_v58  ;;  %v1963_v50 = vmul.f32 -1.442695, %v289_v9 }
  0xf4   :  { %v2078_v61 = vpop.eup %2077 }
  0xf5   :  { %v296_v52 = vadd.f32 1.0, %v2078_v61 }
  0xf6   :  { %v2080_v42 = vpop.eup %2079 }
  0xf7   :  { %2089 = vrcp.f32 %v296_v52  ;;  %v308_v3 = vadd.f32 1.0, %v2080_v42 }
  0xf8   :  { %v2082_v62 = vpop.eup %2081  ;;  %2091 = vtanh.f32 %v288_v0 }
  0xf9   :  { %2093 = vrcp.f32 %v308_v3  ;;  %v297_v46 = vadd.f32 1.0, %v2082_v62 }
  0xfa   :  { %v2084_v54 = vpop.eup %2083  ;;  %2095 = vpow2.f32 %v1963_v50 }
  0xfb   :  { %2097 = vrcp.f32 %v297_v46  ;;  %v309_v55 = vadd.f32 1.0, %v2084_v54  ;;  %v2086_v49 = vpop.eup %2085 }
  0xfc   :  { %v2088_v40 = vpop.eup %2087 }
  0xfd   :  { %2099 = vrcp.f32 %v309_v55  ;;  %v322_v57 = vadd.f32 1.0, %v2088_v40  ;;  %v4123_v40 = vld [vmem:[#allocation6_spill] sm:$0xff] }
  0xff   :  { %2101 = vrcp.f32 %v322_v57  ;;  %v4127_v57 = vld [vmem:[#allocation8_spill] sm:$0xff] }
 0x104   :  { %v2090_v53 = vpop.eup %2089 }
 0x105   :  { %v2092_v44 = vpop.eup %2091  ;;  %v330_v60 = vmul.f32 %v2090_v53, %v2086_v49  ;;  %v4124_v53 = vld [vmem:[#allocation13_spill] sm:$0xff] }
 0x106   :  { %v2094_v56 = vpop.eup %2093 }
 0x107   :  { %v2096_v59 = vpop.eup %2095  ;;  %v328_v38 = vmul.f32 0.0, %v2094_v56  ;;  %v4126_v56 = vld [vmem:[#allocation15_spill] sm:$0xff] }
 0x108   :  { %v2098_v58 = vpop.eup %2097  ;;  %v323_v3 = vadd.f32 1.0, %v2096_v59  ;;  %v4128_v59 = vld [vmem:[#allocation17_spill] sm:$0xff] }
 0x109   :  { %v2921_v9 = vadd.f32 %v330_v60, %v328_v38  ;;  %v331_v0 = vmul.f32 %v2098_v58, %v2092_v44  ;;  %v4125_v44 = vld [vmem:[#allocation7_spill] sm:$0xff]  ;;  %v4129_v38 = vld [vmem:[#allocation9_spill] sm:$0xff]  ;;  %v4131_v58 = vld [vmem:[#allocation10_spill] sm:$0xff] }
 0x10a   :  { %v2100_v61 = vpop.eup %2099  ;;  %v4130_v60 = vld [vmem:[#allocation19_spill] sm:$0xff] }
 0x10b   :  { %v329_v62 = vmul.f32 0.0, %v2100_v61  ;;  %2103 = vtanh.f32 %v2921_v9  ;;  %v4132_v61 = vld [vmem:[#allocation21_spill] sm:$0xff] }
 0x10c   :  { %2105 = vrcp.f32 %v323_v3  ;;  %v2102_v42 = vpop.eup %2101  ;;  %v4133_v3 = vld [vmem:[#allocation12_spill] sm:$0xff] }
 0x10d   :  { %v2924_v52 = vadd.f32 %v331_v0, %v329_v62  ;;  %v4134_v62 = vld [vmem:[#allocation23_spill] sm:$0xff]  ;;  %v4135_v0 = vld [vmem:[#allocation14_spill] sm:$0xff] }
 0x10f   :  { %2107 = vtanh.f32 %v2924_v52 }
 0x118   :  { %v2104_v50 = vpop.eup %2103 }
 0x119   :  { %v336_v46 = vmul.f32 %v2104_v50, %v2102_v42  ;;  %v2106_v54 = vpop.eup %2105  ;;  %v4136_v42 = vld [vmem:[#allocation24_spill] sm:$0xff] }
 0x11a   :  { %v4137_v50 = vld [vmem:[#allocation16_spill] sm:$0xff] }
 0x11b   :  { %338 = vst [vmem:[%s3980_s3] sm:$0xff] %v336_v46  ;;  %422 = vmatmul.mubr.f32.vlgmr.msra.gmra.mxu0 %v336_v46  ;;  %499 = vmatmul.mubr.f32.vlgmr.msra.gmra.mxu1 %v336_v46  ;;  %v4138_v46 = vld [vmem:[#allocation25_spill] sm:$0xff] }
 0x11c   :  { %v2108_v55 = vpop.eup %2107  ;;  %427 = vmatprep.mubr.f32.mxu0 %v4119_v48  ;;  %504 = vmatprep.mubr.f32.mxu1 %v4119_v48 }
 0x11d   :  { %v337_v49 = vmul.f32 %v2108_v55, %v2106_v54  ;;  %588 = vmatpush1.msra.mxu0 %v2426_v1  ;;  %665 = vmatpush1.msra.mxu1 %v2480_v11  ;;  %v4139_v54 = vld [vmem:[#allocation18_spill] sm:$0xff] }
 0x11e   :  { %589 = vmatprep.subr.mxu0 %v2431_v2  ;;  %666 = vmatprep.subr.mxu1 %v2492_v13  ;;  %v4140_v55 = vld [vmem:[#allocation26_spill] sm:$0xff] }
 0x11f   :  { %339 = vst [vmem:[%s3980_s3 + $0x8] sm:$0xff] %v337_v49  ;;  %428 = vmatmul.mubr.f32.gmra.mxu0 %v337_v49  ;;  %505 = vmatmul.mubr.f32.gmra.mxu1 %v337_v49  ;;  %v4141_v49 = vld [vmem:[#allocation20_spill] sm:$0xff] }
 0x120   :  { %590 = vmatpush1.msra.mxu0 %v2439_v4  ;;  %667 = vmatpush1.msra.mxu1 %v2497_v14 }
 0x121   :  { %591 = vmatprep.subr.mxu0 %v2445_v5  ;;  %668 = vmatprep.subr.mxu1 %v2509_v16 }
 0x122   :  { %592 = vmatpush1.msra.mxu0 %v2451_v6  ;;  %669 = vmatpush1.msra.mxu1 %v2521_v18 }
 0x123   :  { %593 = vmatprep.subr.mxu0 %v2457_v7  ;;  %670 = vmatprep.subr.mxu1 %v2526_v19 }
 0x124   :  { %594 = vmatpush1.msra.mxu0 %v2463_v8  ;;  %671 = vmatpush1.msra.mxu1 %v2538_v21 }
 0x125   :  { %595 = vmatprep.subr.mxu0 %v2474_v10  ;;  %672 = vmatprep.subr.mxu1 %v2550_v23 }
 0x126   :  { %596 = vmatpush1.msra.mxu0 %v2486_v12  ;;  %673 = vmatpush1.msra.mxu1 %v2562_v25 }
 0x127   :  { %597 = vmatprep.subr.mxu0 %v2503_v15  ;;  %674 = vmatprep.subr.mxu1 %v2574_v27 }
 0x128   :  { %598 = vmatpush1.msra.mxu0 %v2515_v17  ;;  %675 = vmatpush1.msra.mxu1 %v2586_v29 }
 0x129   :  { %599 = vmatprep.subr.mxu0 %v2532_v20  ;;  %676 = vmatprep.subr.mxu1 %v2598_v31 }
 0x12a   :  { %600 = vmatpush1.msra.mxu0 %v2544_v22  ;;  %677 = vmatpush1.msra.mxu1 %v2610_v33 }
 0x12b   :  { %601 = vmatprep.subr.mxu0 %v2556_v24  ;;  %678 = vmatprep.subr.mxu1 %v2622_v35 }
 0x12c   :  { %602 = vmatpush1.msra.mxu0 %v2568_v26  ;;  %679 = vmatpush1.msra.mxu1 %v2634_v37 }
 0x12d   :  { %603 = vmatprep.subr.mxu0 %v2580_v28  ;;  %680 = vmatprep.subr.mxu1 %v2646_v39 }
 0x12e   :  { %604 = vmatpush1.msra.mxu0 %v2592_v30  ;;  %681 = vmatpush1.msra.mxu1 %v2658_v41 }
 0x12f   :  { %605 = vmatprep.subr.mxu0 %v2604_v32  ;;  %682 = vmatprep.subr.mxu1 %v2670_v43 }
 0x130   :  { %606 = vmatpush1.msra.mxu0 %v2616_v34  ;;  %683 = vmatpush1.msra.mxu1 %v2682_v45 }
 0x131   :  { %607 = vmatprep.subr.mxu0 %v2628_v36  ;;  %684 = vmatprep.subr.mxu1 %v2694_v47 }
 0x132   :  { %608 = vmatpush1.msra.mxu0 %v4123_v40  ;;  %685 = vmatpush1.msra.mxu1 %v4124_v53 }
 0x133   :  { %609 = vmatprep.subr.mxu0 %v4125_v44  ;;  %686 = vmatprep.subr.mxu1 %v4126_v56 }
 0x134   :  { %610 = vmatpush1.msra.mxu0 %v4127_v57  ;;  %687 = vmatpush1.msra.mxu1 %v4128_v59 }
 0x135   :  { %611 = vmatprep.subr.mxu0 %v4129_v38  ;;  %688 = vmatprep.subr.mxu1 %v4130_v60 }
 0x136   :  { %612 = vmatpush1.msra.mxu0 %v4131_v58  ;;  %689 = vmatpush1.msra.mxu1 %v4132_v61  ;;  %v4142_v58 = vld [vmem:[#allocation27_spill] sm:$0xff]  ;;  %v4143_v61 = vld [vmem:[#allocation22_spill] sm:$0xff] }
 0x137   :  { %613 = vmatprep.subr.mxu0 %v4133_v3  ;;  %690 = vmatprep.subr.mxu1 %v4134_v62  ;;  %v4144_v62 = vld [vmem:[#allocation28_spill] sm:$0xff] }
 0x138   :  { %614 = vmatpush1.msra.mxu0 %v4135_v0  ;;  %691 = vmatpush1.msra.mxu1 %v4136_v42  ;;  %v4145_v42 = vld [vmem:[#allocation4_spill] sm:$0xff] }
 0x139   :  { %615 = vmatprep.subr.mxu0 %v4137_v50  ;;  %692 = vmatprep.subr.mxu1 %v4138_v46  ;;  %v4146_v50 = vld [vmem:[#allocation5_spill] sm:$0xff] }
 0x13a   :  { %616 = vmatpush1.msra.mxu0 %v4139_v54  ;;  %693 = vmatpush1.msra.mxu1 %v4140_v55  ;;  %v1964_v55 = vld [vmem:[%s3979_s0 + $0x40] sm:$0xff]  ;;  %v4148_v54 = vld [vmem:[#allocation30_spill] sm:$0xff] }
 0x13b   :  { %617 = vmatprep.subr.mxu0 %v4141_v49  ;;  %694 = vmatprep.subr.mxu1 %v4142_v58  ;;  %v1965_v58 = vld [vmem:[%s3979_s0 + $0x48] sm:$0xff] }
 0x13c   :  { %618 = vmatpush1.msra.mxu0 %v4143_v61  ;;  %651 = vmatprep.mubr.f32.mxu0 %v4119_v48  ;;  %v4147_v49 = vld [vmem:[#allocation29_spill] sm:$0xff]  ;;  %v350_v46 = vadd.f32 %v1965_v58, %v4148_v54  ;;  %v1967_v58 = vld [vmem:[%s3979_s0 + $0x58] sm:$0xff] }
 0x13d   :  { %695 = vmatpush1.msra.mxu1 %v4144_v62  ;;  %728 = vmatprep.mubr.f32.mxu1 %v4119_v48  ;;  %v349_v61 = vadd.f32 %v1964_v55, %v4147_v49  ;;  %v1968_v62 = vld [vmem:[%s3979_s0 + $0x60] sm:$0xff] }
 0x13e   :  { %817 = vmatprep.subr.mxu0 %v4145_v42  ;;  %894 = vmatprep.subr.mxu1 %v4146_v50  ;;  %v1969_v42 = vld [vmem:[%s3979_s0 + $0x68] sm:$0xff]  ;;  %v353_v60 = vadd.f32 %v1968_v62, %v4147_v49  ;;  %v352_v62 = vadd.f32 %v1967_v58, %v2901_v51 }
 0x13f   :  { %v354_v55 = vadd.f32 %v1969_v42, %v4148_v54 }
 0x1db   :  { %v423_v0 = vpop.f32.mrf.mxu0  ;;  %v500_v3 = vpop.f32.mrf.mxu1 }
 0x1dc   :  { %v511_v50 = vadd.f32 %v423_v0, %v349_v61 }
 0x1dd   :  { %v425_v38 = vpop.f32.mrf.mxu0  ;;  %v502_v53 = vpop.f32.mrf.mxu1 }
 0x1de   :  { %v1972_v59 = vmul.f32 -1.442695, %v511_v50  ;;  %v512_v57 = vadd.f32 %v425_v38, %v350_v46  ;;  %v514_v46 = vadd.f32 %v502_v53, %v352_v62 }
 0x1df   :  { %v429_v56 = vpop.f32.mrf.mxu0  ;;  %v506_v50 = vpop.f32.mrf.mxu1 }
 0x1e0   :  { %2109 = vpow2.f32 %v1972_v59  ;;  %v1974_v44 = vmul.f32 -1.442695, %v512_v57  ;;  %v515_v40 = vadd.f32 %v429_v56, %v353_v60  ;;  %v1971_v59 = vld [vmem:[%s3979_s0 + $0x78] sm:$0xff]  ;;  %v1966_v57 = vld [vmem:[%s3979_s0 + $0x50] sm:$0xff]  ;;  %v1976_v60 = vmul.f32 -1.442695, %v514_v46 }
 0x1e1   :  { %v431_v47 = vpop.f32.mrf.mxu0  ;;  %v356_v56 = vadd.f32 %v1971_v59, %v2901_v51 }
 0x1e2   :  { %2111 = vpow2.f32 %v1974_v44  ;;  %v1973_v61 = vmul.f32 -1.442695, %v515_v40  ;;  %v516_v0 = vadd.f32 %v431_v47, %v354_v55  ;;  %v508_v44 = vpop.f32.mrf.mxu1  ;;  %v351_v47 = vadd.f32 %v1966_v57, %v2906_v63  ;;  %v1970_v40 = vld [vmem:[%s3979_s0 + $0x70] sm:$0xff] }
 0x1e3   :  { %v518_v42 = vadd.f32 %v508_v44, %v356_v56 }
 0x1e4   :  { %2113 = vpow2.f32 %v1973_v61  ;;  %v1975_v38 = vmul.f32 -1.442695, %v516_v0  ;;  %v513_v58 = vadd.f32 %v500_v3, %v351_v47  ;;  %v355_v61 = vadd.f32 %v1970_v40, %v2906_v63 }
 0x1e6   :  { %2115 = vpow2.f32 %v1975_v38  ;;  %v1977_v38 = vmul.f32 -1.442695, %v518_v42  ;;  %v517_v59 = vadd.f32 %v506_v50, %v355_v61 }
 0x1e7   :  { %2117 = vpow2.f32 %v1976_v60 }
 0x1ed   :  { %v2110_v55 = vpop.eup %2109 }
 0x1ee   :  { %v525_v0 = vadd.f32 1.0, %v2110_v55 }
 0x1ef   :  { %v2112_v54 = vpop.eup %2111 }
 0x1f0   :  { %2119 = vrcp.f32 %v525_v0  ;;  %v537_v53 = vadd.f32 1.0, %v2112_v54 }
 0x1f1   :  { %v2114_v62 = vpop.eup %2113  ;;  %2121 = vtanh.f32 %v513_v58 }
 0x1f2   :  { %2123 = vrcp.f32 %v537_v53  ;;  %v526_v57 = vadd.f32 1.0, %v2114_v62 }
 0x1f3   :  { %v2116_v51 = vpop.eup %2115  ;;  %2125 = vpow2.f32 %v1977_v38 }
 0x1f4   :  { %2127 = vrcp.f32 %v526_v57  ;;  %v538_v46 = vadd.f32 1.0, %v2116_v51  ;;  %v2118_v3 = vpop.eup %2117 }
 0x1f5   :  { %2129 = vtanh.f32 %v517_v59  ;;  %v551_v40 = vadd.f32 1.0, %v2118_v3 }
 0x1f6   :  { %2131 = vrcp.f32 %v538_v46 }
 0x1f7   :  { %2133 = vrcp.f32 %v551_v40 }
 0x1fd   :  { %v2120_v56 = vpop.eup %2119 }
 0x1fe   :  { %v2122_v44 = vpop.eup %2121 }
 0x1ff   :  { %v2124_v47 = vpop.eup %2123  ;;  %v559_v42 = vmul.f32 %v2122_v44, %v2120_v56 }
 0x200   :  { %v2126_v60 = vpop.eup %2125  ;;  %v557_v54 = vmul.f32 %v2124_v47, %v2921_v9  ;;  %v1983_v47 = vld [vmem:[%s3979_s0 + $0x98] sm:$0xff] }
 0x201   :  { %v2128_v55 = vpop.eup %2127  ;;  %v552_v0 = vadd.f32 1.0, %v2126_v60 }
 0x202   :  { %v2130_v58 = vpop.eup %2129  ;;  %v3034_v50 = vadd.f32 %v559_v42, %v557_v54 }
 0x203   :  { %v2132_v61 = vpop.eup %2131  ;;  %v560_v51 = vmul.f32 %v2130_v58, %v2128_v55  ;;  %v4175_v58 = vld [vmem:[#allocation31_spill] sm:$0xff] }
 0x204   :  { %2135 = vtanh.f32 %v3034_v50  ;;  %v558_v38 = vmul.f32 %v2132_v61, %v2924_v52  ;;  %v2134_v62 = vpop.eup %2133  ;;  %v582_v61 = vadd.f32 %v1983_v47, %v4175_v58  ;;  %v3206_v47 = vld [vmem:[%s3977_s2 + $0x1d0] sm:$0xff] }
 0x205   :  { %2137 = vrcp.f32 %v552_v0 }
 0x206   :  { %v3038_v53 = vadd.f32 %v560_v51, %v558_v38  ;;  %v1987_v38 = vld [vmem:[%s3979_s0 + $0xb8] sm:$0xff] }
 0x208   :  { %2139 = vtanh.f32 %v3038_v53 }
 0x211   :  { %v2136_v59 = vpop.eup %2135 }
 0x212   :  { %v565_v9 = vmul.f32 %v2136_v59, %v2134_v62  ;;  %v2138_v57 = vpop.eup %2137  ;;  %v1982_v62 = vld [vmem:[%s3979_s0 + $0x90] sm:$0xff] }
 0x214   :  { %1978 = vst [vmem:[%s3980_s3 + $0x10] sm:$0xff] %v565_v9  ;;  %652 = vmatmul.mubr.f32.vlgmr.msra.gmra.mxu0 %v565_v9  ;;  %729 = vmatmul.mubr.f32.vlgmr.msra.gmra.mxu1 %v565_v9  ;;  %v586_v9 = vadd.f32 %v1987_v38, %v4175_v58  ;;  %v3260_v38 = vld [vmem:[%s3977_s2 + $0x168] sm:$0xff] }
 0x215   :  { %v2140_v46 = vpop.eup %2139  ;;  %657 = vmatprep.mubr.f32.mxu0 %v4119_v48  ;;  %734 = vmatprep.mubr.f32.mxu1 %v4119_v48 }
 0x216   :  { %v566_v52 = vmul.f32 %v2140_v46, %v2138_v57  ;;  %818 = vmatpush1.msra.mxu0 %v2426_v1  ;;  %895 = vmatpush1.msra.mxu1 %v2480_v11  ;;  %v4149_v1 = vld [vmem:[#allocation11_spill] sm:$0xff]  ;;  %v581_v46 = vadd.f32 %v1982_v62, %v2906_v63 }
 0x217   :  { %819 = vmatprep.subr.mxu0 %v2431_v2  ;;  %896 = vmatprep.subr.mxu1 %v2492_v13  ;;  %v4150_v2 = vld [vmem:[#allocation6_spill] sm:$0xff]  ;;  %v4157_v11 = vld [vmem:[#allocation19_spill] sm:$0xff]  ;;  %v4159_v13 = vld [vmem:[#allocation21_spill] sm:$0xff] }
 0x218   :  { %1979 = vst [vmem:[%s3980_s3 + $0x18] sm:$0xff] %v566_v52  ;;  %658 = vmatmul.mubr.f32.gmra.mxu0 %v566_v52  ;;  %735 = vmatmul.mubr.f32.gmra.mxu1 %v566_v52  ;;  %v1986_v52 = vld [vmem:[%s3979_s0 + $0xb0] sm:$0xff]  ;;  %v3266_v62 = vld [vmem:[%s3977_s2 + $0x178] sm:$0xff] }
 0x219   :  { %820 = vmatpush1.msra.mxu0 %v2439_v4  ;;  %897 = vmatpush1.msra.mxu1 %v2497_v14  ;;  %v4151_v4 = vld [vmem:[#allocation13_spill] sm:$0xff]  ;;  %v4160_v14 = vld [vmem:[#allocation12_spill] sm:$0xff] }
 0x21a   :  { %821 = vmatprep.subr.mxu0 %v2445_v5  ;;  %898 = vmatprep.subr.mxu1 %v2509_v16  ;;  %v4152_v5 = vld [vmem:[#allocation7_spill] sm:$0xff]  ;;  %v4162_v16 = vld [vmem:[#allocation14_spill] sm:$0xff] }
 0x21b   :  { %822 = vmatpush1.msra.mxu0 %v2451_v6  ;;  %899 = vmatpush1.msra.mxu1 %v2521_v18  ;;  %v4153_v6 = vld [vmem:[#allocation15_spill] sm:$0xff]  ;;  %v4164_v18 = vld [vmem:[#allocation16_spill] sm:$0xff] }
 0x21c   :  { %823 = vmatprep.subr.mxu0 %v2457_v7  ;;  %900 = vmatprep.subr.mxu1 %v2526_v19  ;;  %v4154_v7 = vld [vmem:[#allocation8_spill] sm:$0xff]  ;;  %v4165_v19 = vld [vmem:[#allocation25_spill] sm:$0xff] }
 0x21d   :  { %824 = vmatpush1.msra.mxu0 %v2463_v8  ;;  %901 = vmatpush1.msra.mxu1 %v2538_v21  ;;  %v4155_v8 = vld [vmem:[#allocation17_spill] sm:$0xff]  ;;  %v4167_v21 = vld [vmem:[#allocation26_spill] sm:$0xff] }
 0x21e   :  { %825 = vmatprep.subr.mxu0 %v2474_v10  ;;  %902 = vmatprep.subr.mxu1 %v2550_v23  ;;  %v4156_v10 = vld [vmem:[#allocation9_spill] sm:$0xff]  ;;  %v4169_v23 = vld [vmem:[#allocation27_spill] sm:$0xff] }
 0x21f   :  { %826 = vmatpush1.msra.mxu0 %v2486_v12  ;;  %903 = vmatpush1.msra.mxu1 %v2562_v25  ;;  %v4158_v12 = vld [vmem:[#allocation10_spill] sm:$0xff]  ;;  %v4171_v25 = vld [vmem:[#allocation28_spill] sm:$0xff] }
 0x220   :  { %827 = vmatprep.subr.mxu0 %v2503_v15  ;;  %904 = vmatprep.subr.mxu1 %v2574_v27  ;;  %v4161_v15 = vld [vmem:[#allocation23_spill] sm:$0xff] }
 0x221   :  { %828 = vmatpush1.msra.mxu0 %v2515_v17  ;;  %905 = vmatpush1.msra.mxu1 %v2586_v29  ;;  %v4163_v17 = vld [vmem:[#allocation24_spill] sm:$0xff]  ;;  %v3122_v27 = vld [vmem:[%s3977_s2 + $0x1f8] sm:$0xff]  ;;  %v1981_v29 = vld [vmem:[%s3979_s0 + $0x88] sm:$0xff] }
 0x222   :  { %829 = vmatprep.subr.mxu0 %v2532_v20  ;;  %906 = vmatprep.subr.mxu1 %v2598_v31  ;;  %v4166_v20 = vld [vmem:[#allocation18_spill] sm:$0xff]  ;;  %4173 = vst [vmem:[#allocation5_spill] sm:$0xff] %v3122_v27  ;;  %v1984_v31 = vld [vmem:[%s3979_s0 + $0xa0] sm:$0xff] }
 0x223   :  { %830 = vmatpush1.msra.mxu0 %v2544_v22  ;;  %907 = vmatpush1.msra.mxu1 %v2610_v33  ;;  %v4168_v22 = vld [vmem:[#allocation20_spill] sm:$0xff] }
 0x224   :  { %831 = vmatprep.subr.mxu0 %v2556_v24  ;;  %908 = vmatprep.subr.mxu1 %v2622_v35  ;;  %v4170_v24 = vld [vmem:[#allocation22_spill] sm:$0xff]  ;;  %v1985_v35 = vld [vmem:[%s3979_s0 + $0xa8] sm:$0xff] }
 0x225   :  { %832 = vmatpush1.msra.mxu0 %v2568_v26  ;;  %909 = vmatpush1.msra.mxu1 %v2634_v37  ;;  %v3116_v26 = vld [vmem:[%s3977_s2 + $0x1e8] sm:$0xff] }
 0x226   :  { %833 = vmatprep.subr.mxu0 %v2580_v28  ;;  %910 = vmatprep.subr.mxu1 %v2646_v39  ;;  %4172 = vst [vmem:[#allocation4_spill] sm:$0xff] %v3116_v26  ;;  %v1980_v28 = vld [vmem:[%s3979_s0 + $0x80] sm:$0xff]  ;;  %v583_v39 = vadd.f32 %v1984_v31, %v4147_v49 }
 0x227   :  { %834 = vmatpush1.msra.mxu0 %v2592_v30  ;;  %911 = vmatpush1.msra.mxu1 %v2658_v41  ;;  %v579_v30 = vadd.f32 %v1980_v28, %v4147_v49 }
 0x228   :  { %835 = vmatprep.subr.mxu0 %v2604_v32  ;;  %912 = vmatprep.subr.mxu1 %v2670_v43  ;;  %v4174_v32 = vld [vmem:[#allocation30_spill] sm:$0xff] }
 0x229   :  { %836 = vmatpush1.msra.mxu0 %v2616_v34  ;;  %913 = vmatpush1.msra.mxu1 %v2682_v45  ;;  %v580_v33 = vadd.f32 %v1981_v29, %v4174_v32  ;;  %v584_v3 = vadd.f32 %v1985_v35, %v4174_v32 }
 0x22a   :  { %837 = vmatprep.subr.mxu0 %v2628_v36  ;;  %914 = vmatprep.subr.mxu1 %v4149_v1 }
 0x22b   :  { %838 = vmatpush1.msra.mxu0 %v4150_v2  ;;  %915 = vmatpush1.msra.mxu1 %v4151_v4 }
 0x22c   :  { %839 = vmatprep.subr.mxu0 %v4152_v5  ;;  %916 = vmatprep.subr.mxu1 %v4153_v6  ;;  %v585_v6 = vadd.f32 %v1986_v52, %v2906_v63  ;;  %v3296_v52 = vld [vmem:[%s3977_s2 + $0x140] sm:$0xff] }
 0x22d   :  { %840 = vmatpush1.msra.mxu0 %v4154_v7  ;;  %917 = vmatpush1.msra.mxu1 %v4155_v8 }
 0x22e   :  { %841 = vmatprep.subr.mxu0 %v4156_v10  ;;  %918 = vmatprep.subr.mxu1 %v4157_v11 }
 0x22f   :  { %842 = vmatpush1.msra.mxu0 %v4158_v12  ;;  %919 = vmatpush1.msra.mxu1 %v4159_v13 }
 0x230   :  { %843 = vmatprep.subr.mxu0 %v4160_v14  ;;  %920 = vmatprep.subr.mxu1 %v4161_v15 }
 0x231   :  { %844 = vmatpush1.msra.mxu0 %v4162_v16  ;;  %921 = vmatpush1.msra.mxu1 %v4163_v17 }
 0x232   :  { %845 = vmatprep.subr.mxu0 %v4164_v18  ;;  %922 = vmatprep.subr.mxu1 %v4165_v19 }
 0x233   :  { %846 = vmatpush1.msra.mxu0 %v4166_v20  ;;  %923 = vmatpush1.msra.mxu1 %v4167_v21 }
 0x234   :  { %847 = vmatprep.subr.mxu0 %v4168_v22  ;;  %924 = vmatprep.subr.mxu1 %v4169_v23 }
 0x235   :  { %848 = vmatpush1.msra.mxu0 %v4170_v24  ;;  %881 = vmatprep.mubr.f32.mxu0 %v4119_v48 }
 0x236   :  { %925 = vmatpush1.msra.mxu1 %v4171_v25  ;;  %958 = vmatprep.mubr.f32.mxu1 %v4119_v48 }
 0x237   :  { %1047 = vmatprep.subr.mxu0 %v3116_v26  ;;  %1124 = vmatprep.subr.mxu1 %v3122_v27 }
 0x2d4   :  { %v653_v34 = vpop.f32.mrf.mxu0  ;;  %v730_v37 = vpop.f32.mrf.mxu1 }
 0x2d5   :  { %v741_v36 = vadd.f32 %v653_v34, %v579_v30  ;;  %v743_v5 = vadd.f32 %v730_v37, %v581_v46  ;;  %v3290_v46 = vld [vmem:[%s3977_s2 + $0x158] sm:$0xff] }
 0x2d6   :  { %v655_v41 = vpop.f32.mrf.mxu0  ;;  %v732_v40 = vpop.f32.mrf.mxu1 }
 0x2d7   :  { %v1988_v43 = vmul.f32 -1.442695, %v741_v36  ;;  %v742_v45 = vadd.f32 %v655_v41, %v580_v33  ;;  %v744_v59 = vadd.f32 %v732_v40, %v582_v61  ;;  %v3212_v40 = vld [vmem:[%s3977_s2 + $0x1a8] sm:$0xff]  ;;  %v3242_v61 = vld [vmem:[%s3977_s2 + $0x198] sm:$0xff] }
 0x2d8   :  { %v659_v56 = vpop.f32.mrf.mxu0  ;;  %v736_v0 = vpop.f32.mrf.mxu1 }
 0x2d9   :  { %2141 = vpow2.f32 %v1988_v43  ;;  %v1990_v44 = vmul.f32 -1.442695, %v742_v45  ;;  %v745_v60 = vadd.f32 %v659_v56, %v583_v39  ;;  %v1992_v1 = vmul.f32 -1.442695, %v744_v59  ;;  %v3173_v43 = vld [vmem:[%s3977_s2 + $0x1e0] sm:$0xff]  ;;  %v3179_v45 = vld [vmem:[%s3977_s2 + $0x1f0] sm:$0xff] }
 0x2da   :  { %v661_v42 = vpop.f32.mrf.mxu0  ;;  %v738_v57 = vpop.f32.mrf.mxu1  ;;  %v747_v13 = vadd.f32 %v736_v0, %v585_v6  ;;  %v3191_v56 = vld [vmem:[%s3977_s2 + $0x1d8] sm:$0xff]  ;;  %v3248_v0 = vld [vmem:[%s3977_s2 + $0x180] sm:$0xff]  ;;  %v3326_v6 = vld [vmem:[%s3977_s2 + $0x130] sm:$0xff] }
 0x2db   :  { %2143 = vpow2.f32 %v1990_v44  ;;  %v1989_v54 = vmul.f32 -1.442695, %v745_v60  ;;  %v746_v55 = vadd.f32 %v661_v42, %v584_v3  ;;  %v748_v2 = vadd.f32 %v738_v57, %v586_v9  ;;  %v3185_v3 = vld [vmem:[%s3977_s2 + $0x1c8] sm:$0xff]  ;;  %v3200_v44 = vld [vmem:[%s3977_s2 + $0x1c0] sm:$0xff]  ;;  %v3218_v60 = vld [vmem:[%s3977_s2 + $0x1b8] sm:$0xff] }
 0x2dc   :  { %v3224_v42 = vld [vmem:[%s3977_s2 + $0x1a0] sm:$0xff]  ;;  %v3278_v9 = vld [vmem:[%s3977_s2 + $0x170] sm:$0xff]  ;;  %v3284_v57 = vld [vmem:[%s3977_s2 + $0x148] sm:$0xff] }
 0x2dd   :  { %2145 = vpow2.f32 %v1989_v54  ;;  %v1991_v51 = vmul.f32 -1.442695, %v746_v55  ;;  %v1993_v10 = vmul.f32 -1.442695, %v748_v2  ;;  %v3230_v54 = vld [vmem:[%s3977_s2 + $0x1b0] sm:$0xff]  ;;  %v3236_v55 = vld [vmem:[%s3977_s2 + $0x188] sm:$0xff] }
 0x2de   :  { %v3272_v59 = vld [vmem:[%s3977_s2 + $0x160] sm:$0xff]  ;;  %v3308_v2 = vld [vmem:[%s3977_s2 + $0x128] sm:$0xff] }
 0x2df   :  { %2147 = vpow2.f32 %v1991_v51  ;;  %v3254_v51 = vld [vmem:[%s3977_s2 + $0x190] sm:$0xff] }
 0x2e0   :  { %2149 = vpow2.f32 %v1992_v1  ;;  %v3302_v1 = vld [vmem:[%s3977_s2 + $0x150] sm:$0xff] }
 0x2e6   :  { %v2142_v4 = vpop.eup %2141 }
 0x2e7   :  { %v755_v7 = vadd.f32 1.0, %v2142_v4  ;;  %v3314_v4 = vld [vmem:[%s3977_s2 + $0x138] sm:$0xff] }
 0x2e8   :  { %v2144_v8 = vpop.eup %2143 }
 0x2e9   :  { %2151 = vrcp.f32 %v755_v7  ;;  %v767_v11 = vadd.f32 1.0, %v2144_v8  ;;  %v3332_v7 = vld [vmem:[%s3977_s2 + $0x108] sm:$0xff]  ;;  %v3338_v8 = vld [vmem:[%s3977_s2 + $0x118] sm:$0xff] }
 0x2ea   :  { %v2146_v12 = vpop.eup %2145  ;;  %2153 = vtanh.f32 %v743_v5  ;;  %v3320_v5 = vld [vmem:[%s3977_s2 + $0x120] sm:$0xff] }
 0x2eb   :  { %2155 = vrcp.f32 %v767_v11  ;;  %v756_v14 = vadd.f32 1.0, %v2146_v12  ;;  %v3350_v11 = vld [vmem:[%s3977_s2 + $0x110] sm:$0xff]  ;;  %v3356_v12 = vld [vmem:[%s3977_s2 + $0xe8] sm:$0xff] }
 0x2ec   :  { %v2148_v15 = vpop.eup %2147  ;;  %2157 = vpow2.f32 %v1993_v10  ;;  %v3344_v10 = vld [vmem:[%s3977_s2 + $0x100] sm:$0xff] }
 0x2ed   :  { %2159 = vrcp.f32 %v756_v14  ;;  %v768_v16 = vadd.f32 1.0, %v2148_v15  ;;  %v2150_v17 = vpop.eup %2149  ;;  %v3368_v14 = vld [vmem:[%s3977_s2 + $0xe0] sm:$0xff]  ;;  %v3374_v15 = vld [vmem:[%s3977_s2 + $0xf0] sm:$0xff] }
 0x2ee   :  { %2161 = vtanh.f32 %v747_v13  ;;  %v781_v21 = vadd.f32 1.0, %v2150_v17  ;;  %v3362_v13 = vld [vmem:[%s3977_s2 + $0xf8] sm:$0xff] }
 0x2ef   :  { %2163 = vrcp.f32 %v768_v16  ;;  %v3380_v16 = vld [vmem:[%s3977_s2 + $0xc8] sm:$0xff]  ;;  %v3386_v17 = vld [vmem:[%s3977_s2 + $0xd8] sm:$0xff] }
 0x2f0   :  { %2165 = vrcp.f32 %v781_v21  ;;  %v3410_v21 = vld [vmem:[%s3977_s2 + $0xb8] sm:$0xff] }
 0x2f1   :  { %4176 = vst [vmem:[#allocation29_spill] sm:$0xff] %v3410_v21 }
 0x2f6   :  { %v2152_v18 = vpop.eup %2151 }
 0x2f7   :  { %v2154_v19 = vpop.eup %2153 }
 0x2f8   :  { %v2156_v20 = vpop.eup %2155  ;;  %v789_v23 = vmul.f32 %v2154_v19, %v2152_v18  ;;  %v3392_v18 = vld [vmem:[%s3977_s2 + $0xc0] sm:$0xff]  ;;  %v3398_v19 = vld [vmem:[%s3977_s2 + $0xd0] sm:$0xff] }
 0x2f9   :  { %v2158_v22 = vpop.eup %2157  ;;  %v787_v24 = vmul.f32 %v2156_v20, %v3034_v50  ;;  %v3404_v20 = vld [vmem:[%s3977_s2 + $0xa8] sm:$0xff] }
 0x2fa   :  { %v2160_v25 = vpop.eup %2159  ;;  %v782_v31 = vadd.f32 1.0, %v2158_v22  ;;  %v3416_v22 = vld [vmem:[%s3977_s2 + $0xa0] sm:$0xff] }
 0x2fb   :  { %v2162_v28 = vpop.eup %2161  ;;  %v3158_v29 = vadd.f32 %v789_v23, %v787_v24  ;;  %4177 = vst [vmem:[#allocation11_spill] sm:$0xff] %v3416_v22  ;;  %v3422_v23 = vld [vmem:[%s3977_s2 + $0xb0] sm:$0xff]  ;;  %v3428_v24 = vld [vmem:[%s3977_s2 + $0x88] sm:$0xff] }
 0x2fc   :  { %v2164_v30 = vpop.eup %2163  ;;  %v790_v33 = vmul.f32 %v2162_v28, %v2160_v25  ;;  %4178 = vst [vmem:[#allocation6_spill] sm:$0xff] %v3422_v23  ;;  %4179 = vst [vmem:[#allocation13_spill] sm:$0xff] %v3428_v24  ;;  %v3434_v25 = vld [vmem:[%s3977_s2 + $0x98] sm:$0xff]  ;;  %v3440_v28 = vld [vmem:[%s3977_s2 + $0x80] sm:$0xff] }
 0x2fd   :  { %2167 = vtanh.f32 %v3158_v29  ;;  %v788_v34 = vmul.f32 %v2164_v30, %v3038_v53  ;;  %v2166_v36 = vpop.eup %2165  ;;  %4180 = vst [vmem:[#allocation7_spill] sm:$0xff] %v3434_v25  ;;  %4181 = vst [vmem:[#allocation15_spill] sm:$0xff] %v3440_v28  ;;  %v3446_v30 = vld [vmem:[%s3977_s2 + $0x90] sm:$0xff] }
 0x2fe   :  { %2169 = vrcp.f32 %v782_v31  ;;  %4182 = vst [vmem:[#allocation8_spill] sm:$0xff] %v3446_v30  ;;  %v3452_v31 = vld [vmem:[%s3977_s2 + $0x68] sm:$0xff] }
 0x2ff   :  { %v3162_v35 = vadd.f32 %v790_v33, %v788_v34  ;;  %4183 = vst [vmem:[#allocation17_spill] sm:$0xff] %v3452_v31  ;;  %v3458_v33 = vld [vmem:[%s3977_s2 + $0x78] sm:$0xff]  ;;  %v3464_v34 = vld [vmem:[%s3977_s2 + $0x60] sm:$0xff] }
 0x300   :  { %4184 = vst [vmem:[#allocation9_spill] sm:$0xff] %v3458_v33  ;;  %4185 = vst [vmem:[#allocation19_spill] sm:$0xff] %v3464_v34 }
 0x301   :  { %2171 = vtanh.f32 %v3162_v35 }
 0x30a   :  { %v2168_v37 = vpop.eup %2167 }
 0x30b   :  { %v795_v50 = vmul.f32 %v2168_v37, %v2166_v36  ;;  %v2170_v39 = vpop.eup %2169  ;;  %v3470_v36 = vld [vmem:[%s3977_s2 + $0x70] sm:$0xff]  ;;  %v3476_v37 = vld [vmem:[%s3977_s2 + $0x48] sm:$0xff] }
 0x30c   :  { %4186 = vst [vmem:[#allocation10_spill] sm:$0xff] %v3470_v36  ;;  %4187 = vst [vmem:[#allocation21_spill] sm:$0xff] %v3476_v37 }
 0x30d   :  { %1994 = vst [vmem:[%s3980_s3 + $0x20] sm:$0xff] %v795_v50  ;;  %882 = vmatmul.mubr.f32.vlgmr.msra.gmra.mxu0 %v795_v50  ;;  %959 = vmatmul.mubr.f32.vlgmr.msra.gmra.mxu1 %v795_v50  ;;  %v3482_v50 = vld [vmem:[%s3977_s2 + $0x58] sm:$0xff] }
 0x30e   :  { %v2172_v41 = vpop.eup %2171  ;;  %887 = vmatprep.mubr.f32.mxu0 %v4119_v48  ;;  %964 = vmatprep.mubr.f32.mxu1 %v4119_v48  ;;  %4188 = vst [vmem:[#allocation12_spill] sm:$0xff] %v3482_v50 }
 0x30f   :  { %v796_v53 = vmul.f32 %v2172_v41, %v2170_v39  ;;  %1048 = vmatpush1.msra.mxu0 %v3173_v43  ;;  %1125 = vmatpush1.msra.mxu1 %v3179_v45  ;;  %v3488_v39 = vld [vmem:[%s3977_s2 + $0x40] sm:$0xff]  ;;  %v3494_v41 = vld [vmem:[%s3977_s2 + $0x50] sm:$0xff] }
 0x310   :  { %1049 = vmatprep.subr.mxu0 %v3185_v3  ;;  %1126 = vmatprep.subr.mxu1 %v3191_v56  ;;  %4189 = vst [vmem:[#allocation23_spill] sm:$0xff] %v3488_v39  ;;  %4190 = vst [vmem:[#allocation14_spill] sm:$0xff] %v3494_v41 }
 0x311   :  { %1995 = vst [vmem:[%s3980_s3 + $0x28] sm:$0xff] %v796_v53  ;;  %888 = vmatmul.mubr.f32.gmra.mxu0 %v796_v53  ;;  %965 = vmatmul.mubr.f32.gmra.mxu1 %v796_v53  ;;  %v3500_v53 = vld [vmem:[%s3977_s2 + $0x28] sm:$0xff] }
 0x312   :  { %1050 = vmatpush1.msra.mxu0 %v3200_v44  ;;  %1127 = vmatpush1.msra.mxu1 %v3206_v47  ;;  %4191 = vst [vmem:[#allocation24_spill] sm:$0xff] %v3500_v53 }
 0x313   :  { %1051 = vmatprep.subr.mxu0 %v3212_v40  ;;  %1128 = vmatprep.subr.mxu1 %v3218_v60 }
 0x314   :  { %1052 = vmatpush1.msra.mxu0 %v3224_v42  ;;  %1129 = vmatpush1.msra.mxu1 %v3230_v54 }
 0x315   :  { %1053 = vmatprep.subr.mxu0 %v3236_v55  ;;  %1130 = vmatprep.subr.mxu1 %v3242_v61 }
 0x316   :  { %1054 = vmatpush1.msra.mxu0 %v3248_v0  ;;  %1131 = vmatpush1.msra.mxu1 %v3254_v51 }
 0x317   :  { %1055 = vmatprep.subr.mxu0 %v3260_v38  ;;  %1132 = vmatprep.subr.mxu1 %v3266_v62 }
 0x318   :  { %1056 = vmatpush1.msra.mxu0 %v3272_v59  ;;  %1133 = vmatpush1.msra.mxu1 %v3278_v9 }
 0x319   :  { %1057 = vmatprep.subr.mxu0 %v3284_v57  ;;  %1134 = vmatprep.subr.mxu1 %v3290_v46 }
 0x31a   :  { %1058 = vmatpush1.msra.mxu0 %v3296_v52  ;;  %1135 = vmatpush1.msra.mxu1 %v3302_v1 }
 0x31b   :  { %1059 = vmatprep.subr.mxu0 %v3308_v2  ;;  %1136 = vmatprep.subr.mxu1 %v3314_v4 }
 0x31c   :  { %1060 = vmatpush1.msra.mxu0 %v3320_v5  ;;  %1137 = vmatpush1.msra.mxu1 %v3326_v6 }
 0x31d   :  { %1061 = vmatprep.subr.mxu0 %v3332_v7  ;;  %1138 = vmatprep.subr.mxu1 %v3338_v8 }
 0x31e   :  { %1062 = vmatpush1.msra.mxu0 %v3344_v10  ;;  %1139 = vmatpush1.msra.mxu1 %v3350_v11 }
 0x31f   :  { %1063 = vmatprep.subr.mxu0 %v3356_v12  ;;  %1140 = vmatprep.subr.mxu1 %v3362_v13 }
 0x320   :  { %1064 = vmatpush1.msra.mxu0 %v3368_v14  ;;  %1141 = vmatpush1.msra.mxu1 %v3374_v15 }
 0x321   :  { %1065 = vmatprep.subr.mxu0 %v3380_v16  ;;  %1142 = vmatprep.subr.mxu1 %v3386_v17 }
 0x322   :  { %1066 = vmatpush1.msra.mxu0 %v3392_v18  ;;  %1143 = vmatpush1.msra.mxu1 %v3398_v19 }
 0x323   :  { %1067 = vmatprep.subr.mxu0 %v3404_v20  ;;  %1144 = vmatprep.subr.mxu1 %v3410_v21 }
 0x324   :  { %1068 = vmatpush1.msra.mxu0 %v3416_v22  ;;  %1145 = vmatpush1.msra.mxu1 %v3422_v23 }
 0x325   :  { %1069 = vmatprep.subr.mxu0 %v3428_v24  ;;  %1146 = vmatprep.subr.mxu1 %v3434_v25 }
 0x326   :  { %1070 = vmatpush1.msra.mxu0 %v3440_v28  ;;  %1147 = vmatpush1.msra.mxu1 %v3446_v30 }
 0x327   :  { %1071 = vmatprep.subr.mxu0 %v3452_v31  ;;  %1148 = vmatprep.subr.mxu1 %v3458_v33 }
 0x328   :  { %1072 = vmatpush1.msra.mxu0 %v3464_v34  ;;  %1149 = vmatpush1.msra.mxu1 %v3470_v36 }
 0x329   :  { %1073 = vmatprep.subr.mxu0 %v3476_v37  ;;  %1150 = vmatprep.subr.mxu1 %v3482_v50  ;;  %v3506_v50 = vld [vmem:[%s3977_s2 + $0x38] sm:$0xff] }
 0x32a   :  { %1074 = vmatpush1.msra.mxu0 %v3488_v39  ;;  %1151 = vmatpush1.msra.mxu1 %v3494_v41  ;;  %4192 = vst [vmem:[#allocation16_spill] sm:$0xff] %v3506_v50  ;;  %v3512_v39 = vld [vmem:[%s3977_s2 + $0x20] sm:$0xff]  ;;  %v3518_v41 = vld [vmem:[%s3977_s2 + $0x30] sm:$0xff] }
 0x32b   :  { %1075 = vmatprep.subr.mxu0 %v3500_v53  ;;  %1152 = vmatprep.subr.mxu1 %v3506_v50  ;;  %4193 = vst [vmem:[#allocation25_spill] sm:$0xff] %v3512_v39  ;;  %4194 = vst [vmem:[#allocation18_spill] sm:$0xff] %v3518_v41  ;;  %v3524_v53 = vld [vmem:[%s3977_s2 + $0x8] sm:$0xff]  ;;  %v3530_v50 = vld [vmem:[%s3977_s2 + $0x18] sm:$0xff] }
 0x32c   :  { %1076 = vmatpush1.msra.mxu0 %v3512_v39  ;;  %1153 = vmatpush1.msra.mxu1 %v3518_v41  ;;  %4195 = vst [vmem:[#allocation26_spill] sm:$0xff] %v3524_v53  ;;  %4196 = vst [vmem:[#allocation20_spill] sm:$0xff] %v3530_v50  ;;  %v3536_v39 = vld [vmem:[%s3977_s2] sm:$0xff] }
 0x32d   :  { %1077 = vmatprep.subr.mxu0 %v3524_v53  ;;  %1154 = vmatprep.subr.mxu1 %v3530_v50  ;;  %4197 = vst [vmem:[#allocation27_spill] sm:$0xff] %v3536_v39  ;;  %v3543_v53 = vld [vmem:[%s3977_s2 + $0x10] sm:$0xff]  ;;  %v1996_v50 = vld [vmem:[%s3979_s0 + $0xc0] sm:$0xff] }
 0x32e   :  { %1078 = vmatpush1.msra.mxu0 %v3536_v39  ;;  %1111 = vmatprep.mubr.f32.mxu0 %v4119_v48  ;;  %4198 = vst [vmem:[#allocation22_spill] sm:$0xff] %v3543_v53  ;;  %v1997_v39 = vld [vmem:[%s3979_s0 + $0xc8] sm:$0xff]  ;;  %v809_v41 = vadd.f32 %v1996_v50, %v4147_v49 }
 0x32f   :  { %1155 = vmatpush1.msra.mxu1 %v3543_v53  ;;  %1188 = vmatprep.mubr.f32.mxu1 %v4119_v48  ;;  %v2000_v53 = vld [vmem:[%s3979_s0 + $0xe0] sm:$0xff]  ;;  %v810_v37 = vadd.f32 %v1997_v39, %v4174_v32  ;;  %v1999_v39 = vld [vmem:[%s3979_s0 + $0xd8] sm:$0xff] }
 0x330   :  { %1277 = vmatprep.subr.mxu0 %v3116_v26  ;;  %1354 = vmatprep.subr.mxu1 %v3122_v27  ;;  %v2001_v27 = vld [vmem:[%s3979_s0 + $0xe8] sm:$0xff]  ;;  %v813_v33 = vadd.f32 %v2000_v53, %v4147_v49  ;;  %v812_v53 = vadd.f32 %v1999_v39, %v4175_v58 }
 0x331   :  { %v814_v50 = vadd.f32 %v2001_v27, %v4174_v32  ;;  %v2003_v27 = vld [vmem:[%s3979_s0 + $0xf8] sm:$0xff] }
 0x3cd   :  { %v883_v36 = vpop.f32.mrf.mxu0  ;;  %v960_v34 = vpop.f32.mrf.mxu1 }
 0x3ce   :  { %v971_v26 = vadd.f32 %v883_v36, %v809_v41 }
 0x3cf   :  { %v885_v31 = vpop.f32.mrf.mxu0  ;;  %v962_v23 = vpop.f32.mrf.mxu1 }
 0x3d0   :  { %v2004_v30 = vmul.f32 -1.442695, %v971_v26  ;;  %v972_v28 = vadd.f32 %v885_v31, %v810_v37 }
 0x3d1   :  { %v889_v25 = vpop.f32.mrf.mxu0  ;;  %v966_v26 = vpop.f32.mrf.mxu1 }
 0x3d2   :  { %2173 = vpow2.f32 %v2004_v30  ;;  %v2006_v24 = vmul.f32 -1.442695, %v972_v28  ;;  %v975_v22 = vadd.f32 %v889_v25, %v813_v33  ;;  %v1998_v28 = vld [vmem:[%s3979_s0 + $0xd0] sm:$0xff]  ;;  %v974_v30 = vadd.f32 %v962_v23, %v812_v53 }
 0x3d3   :  { %v891_v21 = vpop.f32.mrf.mxu0  ;;  %v816_v25 = vadd.f32 %v2003_v27, %v4175_v58 }
 0x3d4   :  { %2175 = vpow2.f32 %v2006_v24  ;;  %v2005_v36 = vmul.f32 -1.442695, %v975_v22  ;;  %v976_v41 = vadd.f32 %v891_v21, %v814_v50  ;;  %v968_v24 = vpop.f32.mrf.mxu1  ;;  %v811_v21 = vadd.f32 %v1998_v28, %v2906_v63  ;;  %v2002_v22 = vld [vmem:[%s3979_s0 + $0xf0] sm:$0xff] }
 0x3d5   :  { %v2008_v33 = vmul.f32 -1.442695, %v974_v30  ;;  %v978_v37 = vadd.f32 %v968_v24, %v816_v25 }
 0x3d6   :  { %2177 = vpow2.f32 %v2005_v36  ;;  %v2007_v31 = vmul.f32 -1.442695, %v976_v41  ;;  %v973_v39 = vadd.f32 %v960_v34, %v811_v21  ;;  %v815_v36 = vadd.f32 %v2002_v22, %v2906_v63 }
 0x3d8   :  { %2179 = vpow2.f32 %v2007_v31  ;;  %v2009_v31 = vmul.f32 -1.442695, %v978_v37  ;;  %v977_v27 = vadd.f32 %v966_v26, %v815_v36 }
 0x3d9   :  { %2181 = vpow2.f32 %v2008_v33 }
 0x3df   :  { %v2174_v50 = vpop.eup %2173 }
 0x3e0   :  { %v985_v41 = vadd.f32 1.0, %v2174_v50 }
 0x3e1   :  { %v2176_v32 = vpop.eup %2175 }
 0x3e2   :  { %2183 = vrcp.f32 %v985_v41  ;;  %v997_v23 = vadd.f32 1.0, %v2176_v32 }
 0x3e3   :  { %v2178_v53 = vpop.eup %2177  ;;  %2185 = vtanh.f32 %v973_v39 }
 0x3e4   :  { %2187 = vrcp.f32 %v997_v23  ;;  %v986_v28 = vadd.f32 1.0, %v2178_v53 }
 0x3e5   :  { %v2180_v58 = vpop.eup %2179  ;;  %2189 = vpow2.f32 %v2009_v31 }
 0x3e6   :  { %2191 = vrcp.f32 %v986_v28  ;;  %v998_v30 = vadd.f32 1.0, %v2180_v58  ;;  %v2182_v34 = vpop.eup %2181 }
 0x3e7   :  { %2193 = vtanh.f32 %v977_v27  ;;  %v1011_v22 = vadd.f32 1.0, %v2182_v34  ;;  %v4199_v34 = vld [vmem:[#allocation29_spill] sm:$0xff] }
 0x3e8   :  { %2195 = vrcp.f32 %v998_v30 }
 0x3e9   :  { %2197 = vrcp.f32 %v1011_v22  ;;  %v4203_v22 = vld [vmem:[#allocation7_spill] sm:$0xff] }
 0x3ef   :  { %v2184_v25 = vpop.eup %2183 }
 0x3f0   :  { %v2186_v24 = vpop.eup %2185 }
 0x3f1   :  { %v2188_v21 = vpop.eup %2187  ;;  %v1019_v37 = vmul.f32 %v2186_v24, %v2184_v25  ;;  %v4200_v25 = vld [vmem:[#allocation11_spill] sm:$0xff]  ;;  %v4201_v24 = vld [vmem:[#allocation6_spill] sm:$0xff] }
 0x3f2   :  { %v2190_v33 = vpop.eup %2189  ;;  %v1017_v32 = vmul.f32 %v2188_v21, %v3158_v29  ;;  %v4202_v21 = vld [vmem:[#allocation13_spill] sm:$0xff] }
 0x3f3   :  { %v2192_v50 = vpop.eup %2191  ;;  %v1012_v41 = vadd.f32 1.0, %v2190_v33  ;;  %v4204_v33 = vld [vmem:[#allocation15_spill] sm:$0xff] }
 0x3f4   :  { %v2194_v39 = vpop.eup %2193  ;;  %v3582_v26 = vadd.f32 %v1019_v37, %v1017_v32  ;;  %v4205_v37 = vld [vmem:[#allocation8_spill] sm:$0xff]  ;;  %v4206_v32 = vld [vmem:[#allocation17_spill] sm:$0xff] }
 0x3f5   :  { %v2196_v36 = vpop.eup %2195  ;;  %v1020_v58 = vmul.f32 %v2194_v39, %v2192_v50  ;;  %v4207_v50 = vld [vmem:[#allocation9_spill] sm:$0xff]  ;;  %v4208_v39 = vld [vmem:[#allocation19_spill] sm:$0xff] }
 0x3f6   :  { %2199 = vtanh.f32 %v3582_v26  ;;  %v1018_v31 = vmul.f32 %v2196_v36, %v3162_v35  ;;  %v2198_v53 = vpop.eup %2197  ;;  %v4209_v36 = vld [vmem:[#allocation10_spill] sm:$0xff] }
 0x3f7   :  { %2201 = vrcp.f32 %v1012_v41  ;;  %v4210_v41 = vld [vmem:[#allocation21_spill] sm:$0xff] }
 0x3f8   :  { %v3586_v23 = vadd.f32 %v1020_v58, %v1018_v31  ;;  %v4211_v58 = vld [vmem:[#allocation12_spill] sm:$0xff]  ;;  %v4212_v31 = vld [vmem:[#allocation23_spill] sm:$0xff] }
 0x3fa   :  { %2203 = vtanh.f32 %v3586_v23 }
 0x403   :  { %v2200_v27 = vpop.eup %2199 }
 0x404   :  { %v1025_v29 = vmul.f32 %v2200_v27, %v2198_v53  ;;  %v2202_v28 = vpop.eup %2201  ;;  %v4213_v53 = vld [vmem:[#allocation14_spill] sm:$0xff]  ;;  %v4214_v27 = vld [vmem:[#allocation24_spill] sm:$0xff] }
 0x406   :  { %2010 = vst [vmem:[%s3980_s3 + $0x30] sm:$0xff] %v1025_v29  ;;  %1112 = vmatmul.mubr.f32.vlgmr.msra.gmra.mxu0 %v1025_v29  ;;  %1189 = vmatmul.mubr.f32.vlgmr.msra.gmra.mxu1 %v1025_v29  ;;  %v4215_v29 = vld [vmem:[#allocation16_spill] sm:$0xff] }
 0x407   :  { %v2204_v30 = vpop.eup %2203  ;;  %1117 = vmatprep.mubr.f32.mxu0 %v4119_v48  ;;  %1194 = vmatprep.mubr.f32.mxu1 %v4119_v48 }
 0x408   :  { %v1026_v35 = vmul.f32 %v2204_v30, %v2202_v28  ;;  %1278 = vmatpush1.msra.mxu0 %v3173_v43  ;;  %1355 = vmatpush1.msra.mxu1 %v3179_v45  ;;  %v4216_v28 = vld [vmem:[#allocation25_spill] sm:$0xff]  ;;  %v4217_v30 = vld [vmem:[#allocation18_spill] sm:$0xff] }
 0x409   :  { %1279 = vmatprep.subr.mxu0 %v3185_v3  ;;  %1356 = vmatprep.subr.mxu1 %v3191_v56 }
 0x40a   :  { %2011 = vst [vmem:[%s3980_s3 + $0x38] sm:$0xff] %v1026_v35  ;;  %1118 = vmatmul.mubr.f32.gmra.mxu0 %v1026_v35  ;;  %1195 = vmatmul.mubr.f32.gmra.mxu1 %v1026_v35  ;;  %v4218_v35 = vld [vmem:[#allocation26_spill] sm:$0xff] }
 0x40b   :  { %1280 = vmatpush1.msra.mxu0 %v3200_v44  ;;  %1357 = vmatpush1.msra.mxu1 %v3206_v47 }
 0x40c   :  { %1281 = vmatprep.subr.mxu0 %v3212_v40  ;;  %1358 = vmatprep.subr.mxu1 %v3218_v60 }
 0x40d   :  { %1282 = vmatpush1.msra.mxu0 %v3224_v42  ;;  %1359 = vmatpush1.msra.mxu1 %v3230_v54 }
 0x40e   :  { %1283 = vmatprep.subr.mxu0 %v3236_v55  ;;  %1360 = vmatprep.subr.mxu1 %v3242_v61 }
 0x40f   :  { %1284 = vmatpush1.msra.mxu0 %v3248_v0  ;;  %1361 = vmatpush1.msra.mxu1 %v3254_v51 }
 0x410   :  { %1285 = vmatprep.subr.mxu0 %v3260_v38  ;;  %1362 = vmatprep.subr.mxu1 %v3266_v62 }
 0x411   :  { %1286 = vmatpush1.msra.mxu0 %v3272_v59  ;;  %1363 = vmatpush1.msra.mxu1 %v3278_v9 }
 0x412   :  { %1287 = vmatprep.subr.mxu0 %v3284_v57  ;;  %1364 = vmatprep.subr.mxu1 %v3290_v46 }
 0x413   :  { %1288 = vmatpush1.msra.mxu0 %v3296_v52  ;;  %1365 = vmatpush1.msra.mxu1 %v3302_v1 }
 0x414   :  { %1289 = vmatprep.subr.mxu0 %v3308_v2  ;;  %1366 = vmatprep.subr.mxu1 %v3314_v4 }
 0x415   :  { %1290 = vmatpush1.msra.mxu0 %v3320_v5  ;;  %1367 = vmatpush1.msra.mxu1 %v3326_v6 }
 0x416   :  { %1291 = vmatprep.subr.mxu0 %v3332_v7  ;;  %1368 = vmatprep.subr.mxu1 %v3338_v8 }
 0x417   :  { %1292 = vmatpush1.msra.mxu0 %v3344_v10  ;;  %1369 = vmatpush1.msra.mxu1 %v3350_v11 }
 0x418   :  { %1293 = vmatprep.subr.mxu0 %v3356_v12  ;;  %1370 = vmatprep.subr.mxu1 %v3362_v13 }
 0x419   :  { %1294 = vmatpush1.msra.mxu0 %v3368_v14  ;;  %1371 = vmatpush1.msra.mxu1 %v3374_v15 }
 0x41a   :  { %1295 = vmatprep.subr.mxu0 %v3380_v16  ;;  %1372 = vmatprep.subr.mxu1 %v3386_v17 }
 0x41b   :  { %1296 = vmatpush1.msra.mxu0 %v3392_v18  ;;  %1373 = vmatpush1.msra.mxu1 %v3398_v19 }
 0x41c   :  { %1297 = vmatprep.subr.mxu0 %v3404_v20  ;;  %1374 = vmatprep.subr.mxu1 %v4199_v34  ;;  %v4225_v34 = vld [vmem:[#allocation31_spill] sm:$0xff] }
 0x41d   :  { %1298 = vmatpush1.msra.mxu0 %v4200_v25  ;;  %1375 = vmatpush1.msra.mxu1 %v4201_v24 }
 0x41e   :  { %1299 = vmatprep.subr.mxu0 %v4202_v21  ;;  %1376 = vmatprep.subr.mxu1 %v4203_v22 }
 0x41f   :  { %1300 = vmatpush1.msra.mxu0 %v4204_v33  ;;  %1377 = vmatpush1.msra.mxu1 %v4205_v37 }
 0x420   :  { %1301 = vmatprep.subr.mxu0 %v4206_v32  ;;  %1378 = vmatprep.subr.mxu1 %v4207_v50 }
 0x421   :  { %1302 = vmatpush1.msra.mxu0 %v4208_v39  ;;  %1379 = vmatpush1.msra.mxu1 %v4209_v36  ;;  %v4219_v39 = vld [vmem:[#allocation20_spill] sm:$0xff]  ;;  %v4220_v36 = vld [vmem:[#allocation27_spill] sm:$0xff] }
 0x422   :  { %1303 = vmatprep.subr.mxu0 %v4210_v41  ;;  %1380 = vmatprep.subr.mxu1 %v4211_v58  ;;  %v4221_v58 = vld [vmem:[#allocation22_spill] sm:$0xff] }
 0x423   :  { %1304 = vmatpush1.msra.mxu0 %v4212_v31  ;;  %1381 = vmatpush1.msra.mxu1 %v4213_v53  ;;  %v4222_v53 = vld [vmem:[#allocation4_spill] sm:$0xff] }
 0x424   :  { %1305 = vmatprep.subr.mxu0 %v4214_v27  ;;  %1382 = vmatprep.subr.mxu1 %v4215_v29  ;;  %v4223_v27 = vld [vmem:[#allocation5_spill] sm:$0xff] }
 0x425   :  { %1306 = vmatpush1.msra.mxu0 %v4216_v28  ;;  %1383 = vmatpush1.msra.mxu1 %v4217_v30  ;;  %v2012_v30 = vld [vmem:[%s3979_s0 + $0x100] sm:$0xff] }
 0x426   :  { %1307 = vmatprep.subr.mxu0 %v4218_v35  ;;  %1384 = vmatprep.subr.mxu1 %v4219_v39  ;;  %v2013_v39 = vld [vmem:[%s3979_s0 + $0x108] sm:$0xff]  ;;  %v4224_v35 = vld [vmem:[#allocation30_spill] sm:$0xff] }
 0x427   :  { %1308 = vmatpush1.msra.mxu0 %v4220_v36  ;;  %1341 = vmatprep.mubr.f32.mxu0 %v4119_v48  ;;  %v1039_v36 = vadd.f32 %v2012_v30, %v4147_v49  ;;  %v1040_v28 = vadd.f32 %v2013_v39, %v4224_v35  ;;  %v2015_v39 = vld [vmem:[%s3979_s0 + $0x118] sm:$0xff] }
 0x428   :  { %1385 = vmatpush1.msra.mxu1 %v4221_v58  ;;  %1418 = vmatprep.mubr.f32.mxu1 %v4119_v48  ;;  %v2016_v58 = vld [vmem:[%s3979_s0 + $0x120] sm:$0xff] }
 0x429   :  { %1507 = vmatprep.subr.mxu0 %v4222_v53  ;;  %1584 = vmatprep.subr.mxu1 %v4223_v27  ;;  %v2017_v27 = vld [vmem:[%s3979_s0 + $0x128] sm:$0xff]  ;;  %v1043_v41 = vadd.f32 %v2016_v58, %v4147_v49  ;;  %v1042_v58 = vadd.f32 %v2015_v39, %v4225_v34 }
 0x42a   :  { %v1044_v30 = vadd.f32 %v2017_v27, %v4224_v35 }
 0x4c6   :  { %v1113_v29 = vpop.f32.mrf.mxu0  ;;  %v1190_v31 = vpop.f32.mrf.mxu1 }
 0x4c7   :  { %v1201_v53 = vadd.f32 %v1113_v29, %v1039_v36 }
 0x4c8   :  { %v1115_v50 = vpop.f32.mrf.mxu0  ;;  %v1192_v21 = vpop.f32.mrf.mxu1 }
 0x4c9   :  { %v2020_v32 = vmul.f32 -1.442695, %v1201_v53  ;;  %v1202_v37 = vadd.f32 %v1115_v50, %v1040_v28  ;;  %v1204_v27 = vadd.f32 %v1192_v21, %v1042_v58 }
 0x4ca   :  { %v1119_v33 = vpop.f32.mrf.mxu0  ;;  %v1196_v53 = vpop.f32.mrf.mxu1 }
 0x4cb   :  { %2205 = vpow2.f32 %v2020_v32  ;;  %v2022_v22 = vmul.f32 -1.442695, %v1202_v37  ;;  %v1205_v24 = vadd.f32 %v1119_v33, %v1043_v41  ;;  %v2019_v32 = vld [vmem:[%s3979_s0 + $0x138] sm:$0xff]  ;;  %v2014_v37 = vld [vmem:[%s3979_s0 + $0x110] sm:$0xff]  ;;  %v2024_v41 = vmul.f32 -1.442695, %v1204_v27 }
 0x4cc   :  { %v1121_v25 = vpop.f32.mrf.mxu0  ;;  %v1046_v33 = vadd.f32 %v2019_v32, %v4225_v34 }
 0x4cd   :  { %2207 = vpow2.f32 %v2022_v22  ;;  %v2021_v36 = vmul.f32 -1.442695, %v1205_v24  ;;  %v1206_v29 = vadd.f32 %v1121_v25, %v1044_v30  ;;  %v1198_v22 = vpop.f32.mrf.mxu1  ;;  %v1041_v25 = vadd.f32 %v2014_v37, %v2906_v63  ;;  %v2018_v24 = vld [vmem:[%s3979_s0 + $0x130] sm:$0xff] }
 0x4ce   :  { %v1208_v28 = vadd.f32 %v1198_v22, %v1046_v33 }
 0x4cf   :  { %2209 = vpow2.f32 %v2021_v36  ;;  %v2023_v50 = vmul.f32 -1.442695, %v1206_v29  ;;  %v1203_v39 = vadd.f32 %v1190_v31, %v1041_v25  ;;  %v1045_v36 = vadd.f32 %v2018_v24, %v2906_v63 }
 0x4d1   :  { %2211 = vpow2.f32 %v2023_v50  ;;  %v2025_v50 = vmul.f32 -1.442695, %v1208_v28  ;;  %v1207_v32 = vadd.f32 %v1196_v53, %v1045_v36 }
 0x4d2   :  { %2213 = vpow2.f32 %v2024_v41 }
 0x4d8   :  { %v2206_v30 = vpop.eup %2205 }
 0x4d9   :  { %v1215_v29 = vadd.f32 1.0, %v2206_v30 }
 0x4da   :  { %v2208_v35 = vpop.eup %2207 }
 0x4db   :  { %2215 = vrcp.f32 %v1215_v29  ;;  %v1227_v21 = vadd.f32 1.0, %v2208_v35 }
 0x4dc   :  { %v2210_v58 = vpop.eup %2209  ;;  %2217 = vtanh.f32 %v1203_v39 }
 0x4dd   :  { %2219 = vrcp.f32 %v1227_v21  ;;  %v1216_v37 = vadd.f32 1.0, %v2210_v58 }
 0x4de   :  { %v2212_v34 = vpop.eup %2211  ;;  %2221 = vpow2.f32 %v2025_v50 }
 0x4df   :  { %2223 = vrcp.f32 %v1216_v37  ;;  %v1228_v27 = vadd.f32 1.0, %v2212_v34  ;;  %v2214_v31 = vpop.eup %2213 }
 0x4e0   :  { %2225 = vtanh.f32 %v1207_v32  ;;  %v1241_v24 = vadd.f32 1.0, %v2214_v31  ;;  %v4226_v31 = vld [vmem:[#allocation29_spill] sm:$0xff] }
 0x4e1   :  { %2227 = vrcp.f32 %v1228_v27 }
 0x4e2   :  { %2229 = vrcp.f32 %v1241_v24  ;;  %v4230_v24 = vld [vmem:[#allocation7_spill] sm:$0xff] }
 0x4e8   :  { %v2216_v33 = vpop.eup %2215 }
 0x4e9   :  { %v2218_v22 = vpop.eup %2217 }
 0x4ea   :  { %v2220_v25 = vpop.eup %2219  ;;  %v1249_v28 = vmul.f32 %v2218_v22, %v2216_v33  ;;  %v4227_v33 = vld [vmem:[#allocation11_spill] sm:$0xff]  ;;  %v4228_v22 = vld [vmem:[#allocation6_spill] sm:$0xff] }
 0x4eb   :  { %v2222_v41 = vpop.eup %2221  ;;  %v1247_v35 = vmul.f32 %v2220_v25, %v3582_v26  ;;  %v4229_v25 = vld [vmem:[#allocation13_spill] sm:$0xff] }
 0x4ec   :  { %v2224_v30 = vpop.eup %2223  ;;  %v1242_v29 = vadd.f32 1.0, %v2222_v41  ;;  %v4231_v41 = vld [vmem:[#allocation15_spill] sm:$0xff] }
 0x4ed   :  { %v2226_v39 = vpop.eup %2225  ;;  %v3696_v53 = vadd.f32 %v1249_v28, %v1247_v35  ;;  %v4232_v28 = vld [vmem:[#allocation8_spill] sm:$0xff]  ;;  %v4233_v35 = vld [vmem:[#allocation17_spill] sm:$0xff] }
 0x4ee   :  { %v2228_v36 = vpop.eup %2227  ;;  %v1250_v34 = vmul.f32 %v2226_v39, %v2224_v30  ;;  %v4234_v30 = vld [vmem:[#allocation9_spill] sm:$0xff]  ;;  %v4235_v39 = vld [vmem:[#allocation19_spill] sm:$0xff] }
 0x4ef   :  { %2231 = vtanh.f32 %v3696_v53  ;;  %v1248_v50 = vmul.f32 %v2228_v36, %v3586_v23  ;;  %v2230_v58 = vpop.eup %2229  ;;  %v4236_v36 = vld [vmem:[#allocation10_spill] sm:$0xff] }
 0x4f0   :  { %2233 = vrcp.f32 %v1242_v29  ;;  %v4237_v29 = vld [vmem:[#allocation21_spill] sm:$0xff] }
 0x4f1   :  { %v3700_v21 = vadd.f32 %v1250_v34, %v1248_v50  ;;  %v4238_v34 = vld [vmem:[#allocation12_spill] sm:$0xff]  ;;  %v4239_v50 = vld [vmem:[#allocation23_spill] sm:$0xff] }
 0x4f3   :  { %2235 = vtanh.f32 %v3700_v21 }
 0x4fc   :  { %v2232_v32 = vpop.eup %2231 }
 0x4fd   :  { %v1255_v26 = vmul.f32 %v2232_v32, %v2230_v58  ;;  %v2234_v37 = vpop.eup %2233  ;;  %v4240_v58 = vld [vmem:[#allocation14_spill] sm:$0xff]  ;;  %v4241_v32 = vld [vmem:[#allocation24_spill] sm:$0xff] }
 0x4ff   :  { %2026 = vst [vmem:[%s3980_s3 + $0x40] sm:$0xff] %v1255_v26  ;;  %1342 = vmatmul.mubr.f32.vlgmr.msra.gmra.mxu0 %v1255_v26  ;;  %1419 = vmatmul.mubr.f32.vlgmr.msra.gmra.mxu1 %v1255_v26  ;;  %v4242_v26 = vld [vmem:[#allocation16_spill] sm:$0xff] }
 0x500   :  { %v2236_v27 = vpop.eup %2235  ;;  %1347 = vmatprep.mubr.f32.mxu0 %v4119_v48  ;;  %1424 = vmatprep.mubr.f32.mxu1 %v4119_v48 }
 0x501   :  { %v1256_v23 = vmul.f32 %v2236_v27, %v2234_v37  ;;  %1508 = vmatpush1.msra.mxu0 %v3173_v43  ;;  %1585 = vmatpush1.msra.mxu1 %v3179_v45  ;;  %v4243_v37 = vld [vmem:[#allocation25_spill] sm:$0xff]  ;;  %v4244_v27 = vld [vmem:[#allocation18_spill] sm:$0xff] }
 0x502   :  { %1509 = vmatprep.subr.mxu0 %v3185_v3  ;;  %1586 = vmatprep.subr.mxu1 %v3191_v56 }
 0x503   :  { %2027 = vst [vmem:[%s3980_s3 + $0x48] sm:$0xff] %v1256_v23  ;;  %1348 = vmatmul.mubr.f32.gmra.mxu0 %v1256_v23  ;;  %1425 = vmatmul.mubr.f32.gmra.mxu1 %v1256_v23  ;;  %v4245_v23 = vld [vmem:[#allocation26_spill] sm:$0xff] }
 0x504   :  { %1510 = vmatpush1.msra.mxu0 %v3200_v44  ;;  %1587 = vmatpush1.msra.mxu1 %v3206_v47 }
 0x505   :  { %1511 = vmatprep.subr.mxu0 %v3212_v40  ;;  %1588 = vmatprep.subr.mxu1 %v3218_v60 }
 0x506   :  { %1512 = vmatpush1.msra.mxu0 %v3224_v42  ;;  %1589 = vmatpush1.msra.mxu1 %v3230_v54 }
 0x507   :  { %1513 = vmatprep.subr.mxu0 %v3236_v55  ;;  %1590 = vmatprep.subr.mxu1 %v3242_v61 }
 0x508   :  { %1514 = vmatpush1.msra.mxu0 %v3248_v0  ;;  %1591 = vmatpush1.msra.mxu1 %v3254_v51 }
 0x509   :  { %1515 = vmatprep.subr.mxu0 %v3260_v38  ;;  %1592 = vmatprep.subr.mxu1 %v3266_v62 }
 0x50a   :  { %1516 = vmatpush1.msra.mxu0 %v3272_v59  ;;  %1593 = vmatpush1.msra.mxu1 %v3278_v9 }
 0x50b   :  { %1517 = vmatprep.subr.mxu0 %v3284_v57  ;;  %1594 = vmatprep.subr.mxu1 %v3290_v46 }
 0x50c   :  { %1518 = vmatpush1.msra.mxu0 %v3296_v52  ;;  %1595 = vmatpush1.msra.mxu1 %v3302_v1 }
 0x50d   :  { %1519 = vmatprep.subr.mxu0 %v3308_v2  ;;  %1596 = vmatprep.subr.mxu1 %v3314_v4 }
 0x50e   :  { %1520 = vmatpush1.msra.mxu0 %v3320_v5  ;;  %1597 = vmatpush1.msra.mxu1 %v3326_v6 }
 0x50f   :  { %1521 = vmatprep.subr.mxu0 %v3332_v7  ;;  %1598 = vmatprep.subr.mxu1 %v3338_v8 }
 0x510   :  { %1522 = vmatpush1.msra.mxu0 %v3344_v10  ;;  %1599 = vmatpush1.msra.mxu1 %v3350_v11 }
 0x511   :  { %1523 = vmatprep.subr.mxu0 %v3356_v12  ;;  %1600 = vmatprep.subr.mxu1 %v3362_v13 }
 0x512   :  { %1524 = vmatpush1.msra.mxu0 %v3368_v14  ;;  %1601 = vmatpush1.msra.mxu1 %v3374_v15 }
 0x513   :  { %1525 = vmatprep.subr.mxu0 %v3380_v16  ;;  %1602 = vmatprep.subr.mxu1 %v3386_v17 }
 0x514   :  { %1526 = vmatpush1.msra.mxu0 %v3392_v18  ;;  %1603 = vmatpush1.msra.mxu1 %v3398_v19 }
 0x515   :  { %1527 = vmatprep.subr.mxu0 %v3404_v20  ;;  %1604 = vmatprep.subr.mxu1 %v4226_v31  ;;  %v4252_v31 = vld [vmem:[#allocation31_spill] sm:$0xff] }
 0x516   :  { %1528 = vmatpush1.msra.mxu0 %v4227_v33  ;;  %1605 = vmatpush1.msra.mxu1 %v4228_v22 }
 0x517   :  { %1529 = vmatprep.subr.mxu0 %v4229_v25  ;;  %1606 = vmatprep.subr.mxu1 %v4230_v24 }
 0x518   :  { %1530 = vmatpush1.msra.mxu0 %v4231_v41  ;;  %1607 = vmatpush1.msra.mxu1 %v4232_v28 }
 0x519   :  { %1531 = vmatprep.subr.mxu0 %v4233_v35  ;;  %1608 = vmatprep.subr.mxu1 %v4234_v30 }
 0x51a   :  { %1532 = vmatpush1.msra.mxu0 %v4235_v39  ;;  %1609 = vmatpush1.msra.mxu1 %v4236_v36  ;;  %v4246_v39 = vld [vmem:[#allocation20_spill] sm:$0xff]  ;;  %v4247_v36 = vld [vmem:[#allocation27_spill] sm:$0xff] }
 0x51b   :  { %1533 = vmatprep.subr.mxu0 %v4237_v29  ;;  %1610 = vmatprep.subr.mxu1 %v4238_v34  ;;  %v4248_v34 = vld [vmem:[#allocation22_spill] sm:$0xff] }
 0x51c   :  { %1534 = vmatpush1.msra.mxu0 %v4239_v50  ;;  %1611 = vmatpush1.msra.mxu1 %v4240_v58  ;;  %v4249_v58 = vld [vmem:[#allocation4_spill] sm:$0xff] }
 0x51d   :  { %1535 = vmatprep.subr.mxu0 %v4241_v32  ;;  %1612 = vmatprep.subr.mxu1 %v4242_v26  ;;  %v4250_v32 = vld [vmem:[#allocation5_spill] sm:$0xff] }
 0x51e   :  { %1536 = vmatpush1.msra.mxu0 %v4243_v37  ;;  %1613 = vmatpush1.msra.mxu1 %v4244_v27  ;;  %v2028_v27 = vld [vmem:[%s3979_s0 + $0x140] sm:$0xff] }
 0x51f   :  { %1537 = vmatprep.subr.mxu0 %v4245_v23  ;;  %1614 = vmatprep.subr.mxu1 %v4246_v39  ;;  %v2029_v39 = vld [vmem:[%s3979_s0 + $0x148] sm:$0xff]  ;;  %v4251_v23 = vld [vmem:[#allocation30_spill] sm:$0xff] }
 0x520   :  { %1538 = vmatpush1.msra.mxu0 %v4247_v36  ;;  %1571 = vmatprep.mubr.f32.mxu0 %v4119_v48  ;;  %v1269_v36 = vadd.f32 %v2028_v27, %v4147_v49  ;;  %v1270_v37 = vadd.f32 %v2029_v39, %v4251_v23  ;;  %v2031_v39 = vld [vmem:[%s3979_s0 + $0x158] sm:$0xff] }
 0x521   :  { %1615 = vmatpush1.msra.mxu1 %v4248_v34  ;;  %1648 = vmatprep.mubr.f32.mxu1 %v4119_v48  ;;  %v2032_v34 = vld [vmem:[%s3979_s0 + $0x160] sm:$0xff] }
 0x522   :  { %1737 = vmatprep.subr.mxu0 %v4249_v58  ;;  %1814 = vmatprep.subr.mxu1 %v4250_v32  ;;  %v2033_v58 = vld [vmem:[%s3979_s0 + $0x168] sm:$0xff]  ;;  %v1273_v29 = vadd.f32 %v2032_v34, %v4147_v49  ;;  %v1272_v34 = vadd.f32 %v2031_v39, %v4252_v31 }
 0x523   :  { %v1274_v27 = vadd.f32 %v2033_v58, %v4251_v23 }
 0x5bf   :  { %v1343_v26 = vpop.f32.mrf.mxu0  ;;  %v1420_v50 = vpop.f32.mrf.mxu1 }
 0x5c0   :  { %v1431_v32 = vadd.f32 %v1343_v26, %v1269_v36 }
 0x5c1   :  { %v1345_v30 = vpop.f32.mrf.mxu0  ;;  %v1422_v25 = vpop.f32.mrf.mxu1 }
 0x5c2   :  { %v2036_v35 = vmul.f32 -1.442695, %v1431_v32  ;;  %v1432_v28 = vadd.f32 %v1345_v30, %v1270_v37  ;;  %v1434_v37 = vadd.f32 %v1422_v25, %v1272_v34 }
 0x5c3   :  { %v1349_v41 = vpop.f32.mrf.mxu0  ;;  %v1426_v32 = vpop.f32.mrf.mxu1 }
 0x5c4   :  { %2237 = vpow2.f32 %v2036_v35  ;;  %v2038_v24 = vmul.f32 -1.442695, %v1432_v28  ;;  %v1435_v22 = vadd.f32 %v1349_v41, %v1273_v29  ;;  %v2035_v35 = vld [vmem:[%s3979_s0 + $0x178] sm:$0xff]  ;;  %v2030_v28 = vld [vmem:[%s3979_s0 + $0x150] sm:$0xff]  ;;  %v2040_v29 = vmul.f32 -1.442695, %v1434_v37 }
 0x5c5   :  { %v1351_v33 = vpop.f32.mrf.mxu0  ;;  %v1276_v41 = vadd.f32 %v2035_v35, %v4252_v31 }
 0x5c6   :  { %2239 = vpow2.f32 %v2038_v24  ;;  %v2037_v36 = vmul.f32 -1.442695, %v1435_v22  ;;  %v1436_v26 = vadd.f32 %v1351_v33, %v1274_v27  ;;  %v1428_v24 = vpop.f32.mrf.mxu1  ;;  %v1271_v33 = vadd.f32 %v2030_v28, %v2906_v63  ;;  %v2034_v22 = vld [vmem:[%s3979_s0 + $0x170] sm:$0xff] }
 0x5c7   :  { %v1438_v58 = vadd.f32 %v1428_v24, %v1276_v41 }
 0x5c8   :  { %2241 = vpow2.f32 %v2037_v36  ;;  %v2039_v30 = vmul.f32 -1.442695, %v1436_v26  ;;  %v1433_v39 = vadd.f32 %v1420_v50, %v1271_v33  ;;  %v1275_v36 = vadd.f32 %v2034_v22, %v2906_v63 }
 0x5ca   :  { %2243 = vpow2.f32 %v2039_v30  ;;  %v2041_v30 = vmul.f32 -1.442695, %v1438_v58  ;;  %v1437_v35 = vadd.f32 %v1426_v32, %v1275_v36 }
 0x5cb   :  { %2245 = vpow2.f32 %v2040_v29 }
 0x5d1   :  { %v2238_v27 = vpop.eup %2237 }
 0x5d2   :  { %v1445_v26 = vadd.f32 1.0, %v2238_v27 }
 0x5d3   :  { %v2240_v23 = vpop.eup %2239 }
 0x5d4   :  { %2247 = vrcp.f32 %v1445_v26  ;;  %v1457_v25 = vadd.f32 1.0, %v2240_v23 }
 0x5d5   :  { %v2242_v34 = vpop.eup %2241  ;;  %2249 = vtanh.f32 %v1433_v39 }
 0x5d6   :  { %2251 = vrcp.f32 %v1457_v25  ;;  %v1446_v28 = vadd.f32 1.0, %v2242_v34 }
 0x5d7   :  { %v2244_v31 = vpop.eup %2243  ;;  %2253 = vpow2.f32 %v2041_v30 }
 0x5d8   :  { %2255 = vrcp.f32 %v1446_v28  ;;  %v1458_v37 = vadd.f32 1.0, %v2244_v31  ;;  %v2246_v50 = vpop.eup %2245 }
 0x5d9   :  { %2257 = vtanh.f32 %v1437_v35  ;;  %v1471_v22 = vadd.f32 1.0, %v2246_v50 }
 0x5da   :  { %2259 = vrcp.f32 %v1458_v37 }
 0x5db   :  { %2261 = vrcp.f32 %v1471_v22 }
 0x5e1   :  { %v2248_v41 = vpop.eup %2247 }
 0x5e2   :  { %v2250_v24 = vpop.eup %2249 }
 0x5e3   :  { %v2252_v33 = vpop.eup %2251  ;;  %v1479_v58 = vmul.f32 %v2250_v24, %v2248_v41  ;;  %v2047_v41 = vld [vmem:[%s3979_s0 + $0x198] sm:$0xff] }
 0x5e4   :  { %v2254_v29 = vpop.eup %2253  ;;  %v1477_v23 = vmul.f32 %v2252_v33, %v3696_v53 }
 0x5e5   :  { %v2256_v27 = vpop.eup %2255  ;;  %v1472_v26 = vadd.f32 1.0, %v2254_v29 }
 0x5e6   :  { %v2258_v39 = vpop.eup %2257  ;;  %v3810_v32 = vadd.f32 %v1479_v58, %v1477_v23  ;;  %v4277_v23 = vld [vmem:[#allocation31_spill] sm:$0xff] }
 0x5e7   :  { %v2260_v36 = vpop.eup %2259  ;;  %v1480_v31 = vmul.f32 %v2258_v39, %v2256_v27  ;;  %v1502_v27 = vadd.f32 %v2047_v41, %v4277_v23 }
 0x5e8   :  { %2263 = vtanh.f32 %v3810_v32  ;;  %v1478_v30 = vmul.f32 %v2260_v36, %v3700_v21  ;;  %v2262_v34 = vpop.eup %2261 }
 0x5e9   :  { %2265 = vrcp.f32 %v1472_v26  ;;  %v2051_v26 = vld [vmem:[%s3979_s0 + $0x1b8] sm:$0xff] }
 0x5ea   :  { %v3814_v25 = vadd.f32 %v1480_v31, %v1478_v30  ;;  %v2046_v31 = vld [vmem:[%s3979_s0 + $0x190] sm:$0xff] }
 0x5ec   :  { %2267 = vtanh.f32 %v3814_v25 }
 0x5f5   :  { %v2264_v35 = vpop.eup %2263 }
 0x5f6   :  { %v1485_v53 = vmul.f32 %v2264_v35, %v2262_v34  ;;  %v2266_v28 = vpop.eup %2265  ;;  %v1506_v34 = vadd.f32 %v2051_v26, %v4277_v23 }
 0x5f8   :  { %2042 = vst [vmem:[%s3980_s3 + $0x50] sm:$0xff] %v1485_v53  ;;  %1572 = vmatmul.mubr.f32.vlgmr.msra.gmra.mxu0 %v1485_v53  ;;  %1649 = vmatmul.mubr.f32.vlgmr.msra.gmra.mxu1 %v1485_v53  ;;  %v1501_v53 = vadd.f32 %v2046_v31, %v2906_v63 }
 0x5f9   :  { %v2268_v37 = vpop.eup %2267  ;;  %1577 = vmatprep.mubr.f32.mxu0 %v4119_v48  ;;  %1654 = vmatprep.mubr.f32.mxu1 %v4119_v48 }
 0x5fa   :  { %v1486_v21 = vmul.f32 %v2268_v37, %v2266_v28  ;;  %1738 = vmatpush1.msra.mxu0 %v3173_v43  ;;  %1815 = vmatpush1.msra.mxu1 %v3179_v45  ;;  %v4253_v43 = vld [vmem:[#allocation29_spill] sm:$0xff]  ;;  %v4254_v45 = vld [vmem:[#allocation11_spill] sm:$0xff]  ;;  %v2050_v28 = vld [vmem:[%s3979_s0 + $0x1b0] sm:$0xff] }
 0x5fb   :  { %1739 = vmatprep.subr.mxu0 %v3185_v3  ;;  %1816 = vmatprep.subr.mxu1 %v3191_v56  ;;  %v4255_v3 = vld [vmem:[#allocation6_spill] sm:$0xff]  ;;  %v4256_v56 = vld [vmem:[#allocation13_spill] sm:$0xff] }
 0x5fc   :  { %2043 = vst [vmem:[%s3980_s3 + $0x58] sm:$0xff] %v1486_v21  ;;  %1578 = vmatmul.mubr.f32.gmra.mxu0 %v1486_v21  ;;  %1655 = vmatmul.mubr.f32.gmra.mxu1 %v1486_v21 }
 0x5fd   :  { %1740 = vmatpush1.msra.mxu0 %v3200_v44  ;;  %1817 = vmatpush1.msra.mxu1 %v3206_v47  ;;  %v4257_v44 = vld [vmem:[#allocation7_spill] sm:$0xff] }
 0x5fe   :  { %1741 = vmatprep.subr.mxu0 %v3212_v40  ;;  %1818 = vmatprep.subr.mxu1 %v3218_v60  ;;  %v4258_v47 = vld [vmem:[#allocation15_spill] sm:$0xff]  ;;  %v4259_v40 = vld [vmem:[#allocation8_spill] sm:$0xff]  ;;  %v4260_v60 = vld [vmem:[#allocation17_spill] sm:$0xff] }
 0x5ff   :  { %1742 = vmatpush1.msra.mxu0 %v3224_v42  ;;  %1819 = vmatpush1.msra.mxu1 %v3230_v54  ;;  %v4261_v42 = vld [vmem:[#allocation9_spill] sm:$0xff]  ;;  %v4262_v54 = vld [vmem:[#allocation19_spill] sm:$0xff] }
 0x600   :  { %1743 = vmatprep.subr.mxu0 %v3236_v55  ;;  %1820 = vmatprep.subr.mxu1 %v3242_v61  ;;  %v4263_v55 = vld [vmem:[#allocation10_spill] sm:$0xff]  ;;  %v4264_v61 = vld [vmem:[#allocation21_spill] sm:$0xff] }
 0x601   :  { %1744 = vmatpush1.msra.mxu0 %v3248_v0  ;;  %1821 = vmatpush1.msra.mxu1 %v3254_v51  ;;  %v4265_v0 = vld [vmem:[#allocation12_spill] sm:$0xff]  ;;  %v4266_v51 = vld [vmem:[#allocation23_spill] sm:$0xff] }
 0x602   :  { %1745 = vmatprep.subr.mxu0 %v3260_v38  ;;  %1822 = vmatprep.subr.mxu1 %v3266_v62  ;;  %v4267_v38 = vld [vmem:[#allocation14_spill] sm:$0xff]  ;;  %v4268_v62 = vld [vmem:[#allocation24_spill] sm:$0xff] }
 0x603   :  { %1746 = vmatpush1.msra.mxu0 %v3272_v59  ;;  %1823 = vmatpush1.msra.mxu1 %v3278_v9  ;;  %v4269_v59 = vld [vmem:[#allocation16_spill] sm:$0xff]  ;;  %v4270_v9 = vld [vmem:[#allocation25_spill] sm:$0xff] }
 0x604   :  { %1747 = vmatprep.subr.mxu0 %v3284_v57  ;;  %1824 = vmatprep.subr.mxu1 %v3290_v46  ;;  %v4271_v57 = vld [vmem:[#allocation18_spill] sm:$0xff] }
 0x605   :  { %1748 = vmatpush1.msra.mxu0 %v3296_v52  ;;  %1825 = vmatpush1.msra.mxu1 %v3302_v1  ;;  %v4272_v46 = vld [vmem:[#allocation26_spill] sm:$0xff]  ;;  %v4273_v52 = vld [vmem:[#allocation20_spill] sm:$0xff]  ;;  %v4274_v1 = vld [vmem:[#allocation27_spill] sm:$0xff] }
 0x606   :  { %1749 = vmatprep.subr.mxu0 %v3308_v2  ;;  %1826 = vmatprep.subr.mxu1 %v3314_v4  ;;  %v4275_v2 = vld [vmem:[#allocation22_spill] sm:$0xff]  ;;  %v2044_v4 = vld [vmem:[%s3979_s0 + $0x180] sm:$0xff] }
 0x607   :  { %1750 = vmatpush1.msra.mxu0 %v3320_v5  ;;  %1827 = vmatpush1.msra.mxu1 %v3326_v6  ;;  %v2045_v5 = vld [vmem:[%s3979_s0 + $0x188] sm:$0xff]  ;;  %v1499_v6 = vadd.f32 %v2044_v4, %v4147_v49 }
 0x608   :  { %1751 = vmatprep.subr.mxu0 %v3332_v7  ;;  %1828 = vmatprep.subr.mxu1 %v3338_v8  ;;  %v2048_v7 = vld [vmem:[%s3979_s0 + $0x1a0] sm:$0xff]  ;;  %v4276_v8 = vld [vmem:[#allocation30_spill] sm:$0xff] }
 0x609   :  { %1752 = vmatpush1.msra.mxu0 %v3344_v10  ;;  %1829 = vmatpush1.msra.mxu1 %v3350_v11  ;;  %v1500_v10 = vadd.f32 %v2045_v5, %v4276_v8 }
 0x60a   :  { %1753 = vmatprep.subr.mxu0 %v3356_v12  ;;  %1830 = vmatprep.subr.mxu1 %v3362_v13  ;;  %v2049_v12 = vld [vmem:[%s3979_s0 + $0x1a8] sm:$0xff] }
 0x60b   :  { %1754 = vmatpush1.msra.mxu0 %v3368_v14  ;;  %1831 = vmatpush1.msra.mxu1 %v3374_v15  ;;  %v1503_v15 = vadd.f32 %v2048_v7, %v4147_v49 }
 0x60c   :  { %1755 = vmatprep.subr.mxu0 %v3380_v16  ;;  %1832 = vmatprep.subr.mxu1 %v3386_v17 }
 0x60d   :  { %1756 = vmatpush1.msra.mxu0 %v3392_v18  ;;  %1833 = vmatpush1.msra.mxu1 %v3398_v19  ;;  %v1504_v19 = vadd.f32 %v2049_v12, %v4276_v8 }
 0x60e   :  { %1757 = vmatprep.subr.mxu0 %v3404_v20  ;;  %1834 = vmatprep.subr.mxu1 %v4253_v43 }
 0x60f   :  { %1758 = vmatpush1.msra.mxu0 %v4254_v45  ;;  %1835 = vmatpush1.msra.mxu1 %v4255_v3  ;;  %v1505_v3 = vadd.f32 %v2050_v28, %v2906_v63 }
 0x610   :  { %1759 = vmatprep.subr.mxu0 %v4256_v56  ;;  %1836 = vmatprep.subr.mxu1 %v4257_v44 }
 0x611   :  { %1760 = vmatpush1.msra.mxu0 %v4258_v47  ;;  %1837 = vmatpush1.msra.mxu1 %v4259_v40 }
 0x612   :  { %1761 = vmatprep.subr.mxu0 %v4260_v60  ;;  %1838 = vmatprep.subr.mxu1 %v4261_v42 }
 0x613   :  { %1762 = vmatpush1.msra.mxu0 %v4262_v54  ;;  %1839 = vmatpush1.msra.mxu1 %v4263_v55 }
 0x614   :  { %1763 = vmatprep.subr.mxu0 %v4264_v61  ;;  %1840 = vmatprep.subr.mxu1 %v4265_v0 }
 0x615   :  { %1764 = vmatpush1.msra.mxu0 %v4266_v51  ;;  %1841 = vmatpush1.msra.mxu1 %v4267_v38 }
 0x616   :  { %1765 = vmatprep.subr.mxu0 %v4268_v62  ;;  %1842 = vmatprep.subr.mxu1 %v4269_v59 }
 0x617   :  { %1766 = vmatpush1.msra.mxu0 %v4270_v9  ;;  %1843 = vmatpush1.msra.mxu1 %v4271_v57 }
 0x618   :  { %1767 = vmatprep.subr.mxu0 %v4272_v46  ;;  %1844 = vmatprep.subr.mxu1 %v4273_v52 }
 0x619   :  { %1768 = vmatpush1.msra.mxu0 %v4274_v1  ;;  %1801 = vmatprep.mubr.f32.mxu0 %v4119_v48 }
 0x61a   :  { %1845 = vmatpush1.msra.mxu1 %v4275_v2  ;;  %1878 = vmatprep.mubr.f32.mxu1 %v4119_v48 }
 0x6b8   :  { %v1573_v11 = vpop.f32.mrf.mxu0  ;;  %v1650_v14 = vpop.f32.mrf.mxu1 }
 0x6b9   :  { %v1661_v13 = vadd.f32 %v1573_v11, %v1499_v6  ;;  %v1663_v45 = vadd.f32 %v1650_v14, %v1501_v53 }
 0x6ba   :  { %v1575_v16 = vpop.f32.mrf.mxu0  ;;  %v1652_v24 = vpop.f32.mrf.mxu1 }
 0x6bb   :  { %v2052_v17 = vmul.f32 -1.442695, %v1661_v13  ;;  %v1662_v18 = vadd.f32 %v1575_v16, %v1500_v10  ;;  %v1664_v30 = vadd.f32 %v1652_v24, %v1502_v27  ;;  %v2061_v16 = vld [vmem:[%s3979_s0 + $0x1c8] sm:$0xff] }
 0x6bc   :  { %v1579_v20 = vpop.f32.mrf.mxu0  ;;  %v1656_v39 = vpop.f32.mrf.mxu1 }
 0x6bd   :  { %2269 = vpow2.f32 %v2052_v17  ;;  %v2054_v50 = vmul.f32 -1.442695, %v1662_v18  ;;  %v1665_v33 = vadd.f32 %v1579_v20, %v1503_v15  ;;  %v2056_v37 = vmul.f32 -1.442695, %v1664_v30  ;;  %v2060_v15 = vld [vmem:[%s3979_s0 + $0x1c0] sm:$0xff]  ;;  %v2065_v20 = vld [vmem:[%s3979_s0 + $0x1e8] sm:$0xff] }
 0x6be   :  { %v1581_v22 = vpop.f32.mrf.mxu0  ;;  %v1658_v35 = vpop.f32.mrf.mxu1  ;;  %v1667_v42 = vadd.f32 %v1656_v39, %v1505_v3  ;;  %v1729_v17 = vadd.f32 %v2060_v15, %v4147_v49  ;;  %v1730_v18 = vadd.f32 %v2061_v16, %v4276_v8 }
 0x6bf   :  { %2271 = vpow2.f32 %v2054_v50  ;;  %v2053_v29 = vmul.f32 -1.442695, %v1665_v33  ;;  %v1666_v58 = vadd.f32 %v1581_v22, %v1504_v19  ;;  %v1668_v21 = vadd.f32 %v1658_v35, %v1506_v34 }
 0x6c1   :  { %2273 = vpow2.f32 %v2053_v29  ;;  %v2055_v36 = vmul.f32 -1.442695, %v1666_v58  ;;  %v2057_v47 = vmul.f32 -1.442695, %v1668_v21  ;;  %v1734_v58 = vadd.f32 %v2065_v20, %v4276_v8  ;;  %v2067_v8 = vld [vmem:[%s3979_s0 + $0x1f8] sm:$0xff] }
 0x6c3   :  { %2275 = vpow2.f32 %v2055_v36  ;;  %v2063_v36 = vld [vmem:[%s3979_s0 + $0x1d8] sm:$0xff] }
 0x6c4   :  { %2277 = vpow2.f32 %v2056_v37  ;;  %v2062_v37 = vld [vmem:[%s3979_s0 + $0x1d0] sm:$0xff] }
 0x6c5   :  { %v1731_v3 = vadd.f32 %v2062_v37, %v2906_v63 }
 0x6ca   :  { %v2270_v43 = vpop.eup %2269 }
 0x6cb   :  { %v1675_v56 = vadd.f32 1.0, %v2270_v43  ;;  %v1736_v43 = vadd.f32 %v2067_v8, %v4277_v23 }
 0x6cc   :  { %v2272_v44 = vpop.eup %2271 }
 0x6cd   :  { %2279 = vrcp.f32 %v1675_v56  ;;  %v1687_v40 = vadd.f32 1.0, %v2272_v44  ;;  %v2066_v56 = vld [vmem:[%s3979_s0 + $0x1f0] sm:$0xff] }
 0x6ce   :  { %v2274_v60 = vpop.eup %2273  ;;  %2281 = vtanh.f32 %v1663_v45 }
 0x6cf   :  { %2283 = vrcp.f32 %v1687_v40  ;;  %v1676_v54 = vadd.f32 1.0, %v2274_v60 }
 0x6d0   :  { %v2276_v55 = vpop.eup %2275  ;;  %2285 = vpow2.f32 %v2057_v47 }
 0x6d1   :  { %2287 = vrcp.f32 %v1676_v54  ;;  %v1688_v61 = vadd.f32 1.0, %v2276_v55  ;;  %v2278_v0 = vpop.eup %2277 }
 0x6d2   :  { %2289 = vtanh.f32 %v1667_v42  ;;  %v1701_v59 = vadd.f32 1.0, %v2278_v0  ;;  %v1735_v42 = vadd.f32 %v2066_v56, %v2906_v63 }
 0x6d3   :  { %2291 = vrcp.f32 %v1688_v61 }
 0x6d4   :  { %2293 = vrcp.f32 %v1701_v59 }
 0x6da   :  { %v2280_v51 = vpop.eup %2279 }
 0x6db   :  { %v2282_v38 = vpop.eup %2281 }
 0x6dc   :  { %v2284_v62 = vpop.eup %2283  ;;  %v1709_v57 = vmul.f32 %v2282_v38, %v2280_v51 }
 0x6dd   :  { %v2286_v9 = vpop.eup %2285  ;;  %v1707_v46 = vmul.f32 %v2284_v62, %v3810_v32 }
 0x6de   :  { %v2288_v52 = vpop.eup %2287  ;;  %v1702_v5 = vadd.f32 1.0, %v2286_v9 }
 0x6df   :  { %v2290_v1 = vpop.eup %2289  ;;  %v3922_v2 = vadd.f32 %v1709_v57, %v1707_v46 }
 0x6e0   :  { %v2292_v4 = vpop.eup %2291  ;;  %v1710_v6 = vmul.f32 %v2290_v1, %v2288_v52 }
 0x6e1   :  { %2295 = vtanh.f32 %v3922_v2  ;;  %v1708_v7 = vmul.f32 %v2292_v4, %v3814_v25  ;;  %v2294_v11 = vpop.eup %2293 }
 0x6e2   :  { %2297 = vrcp.f32 %v1702_v5 }
 0x6e3   :  { %v3926_v10 = vadd.f32 %v1710_v6, %v1708_v7 }
 0x6e5   :  { %2299 = vtanh.f32 %v3926_v10 }
 0x6ee   :  { %v2296_v12 = vpop.eup %2295 }
 0x6ef   :  { %v1715_v32 = vmul.f32 %v2296_v12, %v2294_v11  ;;  %v2298_v13 = vpop.eup %2297 }
 0x6f1   :  { %2058 = vst [vmem:[%s3980_s3 + $0x60] sm:$0xff] %v1715_v32  ;;  %1802 = vmatmul.mubr.f32.vlgmr.msra.gmra.mxu0 %v1715_v32  ;;  %1879 = vmatmul.mubr.f32.vlgmr.msra.gmra.mxu1 %v1715_v32 }
 0x6f2   :  { %v2300_v14 = vpop.eup %2299  ;;  %1807 = vmatprep.mubr.f32.mxu0 %v4119_v48  ;;  %1884 = vmatprep.mubr.f32.mxu1 %v4119_v48  ;;  %v2064_v48 = vld [vmem:[%s3979_s0 + $0x1e0] sm:$0xff] }
 0x6f3   :  { %v1716_v25 = vmul.f32 %v2300_v14, %v2298_v13  ;;  %v1733_v24 = vadd.f32 %v2064_v48, %v4147_v49  ;;  %v1732_v49 = vadd.f32 %v2063_v36, %v4277_v23 }
 0x6f5   :  { %2059 = vst [vmem:[%s3980_s3 + $0x68] sm:$0xff] %v1716_v25  ;;  %1808 = vmatmul.mubr.f32.gmra.mxu0 %v1716_v25  ;;  %1885 = vmatmul.mubr.f32.gmra.mxu1 %v1716_v25 }
 0x7b1   :  { %v1803_v19 = vpop.f32.mrf.mxu0  ;;  %v1880_v41 = vpop.f32.mrf.mxu1 }
 0x7b2   :  { %v1891_v50 = vadd.f32 %v1803_v19, %v1729_v17  ;;  %v1893_v60 = vadd.f32 %v1880_v41, %v1731_v3 }
 0x7b3   :  { %v1805_v33 = vpop.f32.mrf.mxu0  ;;  %v1882_v26 = vpop.f32.mrf.mxu1 }
 0x7b4   :  { %v2068_v22 = vmul.f32 -1.442695, %v1891_v50  ;;  %v1892_v29 = vadd.f32 %v1805_v33, %v1730_v18  ;;  %v1894_v21 = vadd.f32 %v1882_v26, %v1732_v49 }
 0x7b5   :  { %v1809_v27 = vpop.f32.mrf.mxu0  ;;  %v1886_v53 = vpop.f32.mrf.mxu1 }
 0x7b6   :  { %2301 = vpow2.f32 %v2068_v22  ;;  %v2070_v39 = vmul.f32 -1.442695, %v1892_v29  ;;  %v1895_v31 = vadd.f32 %v1809_v27, %v1733_v24  ;;  %v2072_v44 = vmul.f32 -1.442695, %v1894_v21 }
 0x7b7   :  { %v1811_v30 = vpop.f32.mrf.mxu0  ;;  %v1888_v45 = vpop.f32.mrf.mxu1  ;;  %v1897_v51 = vadd.f32 %v1886_v53, %v1735_v42 }
 0x7b8   :  { %2303 = vpow2.f32 %v2070_v39  ;;  %v2069_v34 = vmul.f32 -1.442695, %v1895_v31  ;;  %v1896_v35 = vadd.f32 %v1811_v30, %v1734_v58  ;;  %v1898_v47 = vadd.f32 %v1888_v45, %v1736_v43 }
 0x7ba   :  { %2305 = vpow2.f32 %v2069_v34  ;;  %v2071_v28 = vmul.f32 -1.442695, %v1896_v35  ;;  %v2073_v61 = vmul.f32 -1.442695, %v1898_v47 }
 0x7bc   :  { %2307 = vpow2.f32 %v2071_v28 }
 0x7bd   :  { %2309 = vpow2.f32 %v2072_v44 }
 0x7c3   :  { %v2302_v40 = vpop.eup %2301 }
 0x7c4   :  { %v1905_v54 = vadd.f32 1.0, %v2302_v40 }
 0x7c5   :  { %v2304_v55 = vpop.eup %2303 }
 0x7c6   :  { %2311 = vrcp.f32 %v1905_v54  ;;  %v1917_v0 = vadd.f32 1.0, %v2304_v55 }
 0x7c7   :  { %v2306_v23 = vpop.eup %2305  ;;  %2313 = vtanh.f32 %v1893_v60 }
 0x7c8   :  { %2315 = vrcp.f32 %v1917_v0  ;;  %v1906_v38 = vadd.f32 1.0, %v2306_v23 }
 0x7c9   :  { %v2308_v62 = vpop.eup %2307  ;;  %2317 = vpow2.f32 %v2073_v61 }
 0x7ca   :  { %2319 = vrcp.f32 %v1906_v38  ;;  %v1918_v59 = vadd.f32 1.0, %v2308_v62  ;;  %v2310_v9 = vpop.eup %2309 }
 0x7cb   :  { %2321 = vtanh.f32 %v1897_v51  ;;  %v1931_v52 = vadd.f32 1.0, %v2310_v9 }
 0x7cc   :  { %2323 = vrcp.f32 %v1918_v59 }
 0x7cd   :  { %2325 = vrcp.f32 %v1931_v52 }
 0x7d3   :  { %v2312_v57 = vpop.eup %2311 }
 0x7d4   :  { %v2314_v63 = vpop.eup %2313 }
 0x7d5   :  { %v2316_v46 = vpop.eup %2315  ;;  %v1939_v4 = vmul.f32 %v2314_v63, %v2312_v57 }
 0x7d6   :  { %v2318_v1 = vpop.eup %2317  ;;  %v1937_v5 = vmul.f32 %v2316_v46, %v3922_v2 }
 0x7d7   :  { %v2320_v6 = vpop.eup %2319  ;;  %v1932_v32 = vadd.f32 1.0, %v2318_v1 }
 0x7d8   :  { %v2322_v7 = vpop.eup %2321  ;;  %v1941_v11 = vadd.f32 %v1939_v4, %v1937_v5 }
 0x7d9   :  { %v2324_v12 = vpop.eup %2323  ;;  %v1940_v13 = vmul.f32 %v2322_v7, %v2320_v6 }
 0x7da   :  { %2327 = vtanh.f32 %v1941_v11  ;;  %v1938_v14 = vmul.f32 %v2324_v12, %v3926_v10  ;;  %v2326_v15 = vpop.eup %2325 }
 0x7db   :  { %2329 = vrcp.f32 %v1932_v32 }
 0x7dc   :  { %v1942_v25 = vadd.f32 %v1940_v13, %v1938_v14 }
 0x7de   :  { %2331 = vtanh.f32 %v1942_v25 }
 0x7e7   :  { %v2328_v16 = vpop.eup %2327 }
 0x7e8   :  { %v1945_v17 = vmul.f32 %v2328_v16, %v2326_v15  ;;  %v2330_v48 = vpop.eup %2329 }
 0x7ea   :  { %2074 = vst [vmem:[%s3980_s3 + $0x70] sm:$0xff] %v1945_v17 }
 0x7eb   :  { %v2332_v2 = vpop.eup %2331 }
 0x7ec   :  { %v1946_v18 = vmul.f32 %v2332_v2, %v2330_v48 }
 0x7ee   :  { %2075 = vst [vmem:[%s3980_s3 + $0x78] sm:$0xff] %v1946_v18 }

// kernel: _rnn_forward_padded.3
= control target key start
LH: loop header
LB: loop body
LE: loop exit
PB: predicated region body
PF: predicated region fallthrough
CT: control target
= control target key end

     0   :  { %v4168_v4 = vmov 0.0   ;;  %s4160_s0 = inlined_call_operand.vmem [shape: f32[8,16,512], index: 0, kind: input, shape index: {}]   ;;  %s4161_s1 = inlined_call_operand.vmem [shape: f32[1,512], index: 1, kind: input, shape index: {}]   ;;  %s4162_s2 = inlined_call_operand.vmem [shape: f32[128,512], index: 2, kind: input, shape index: {}]   ;;  %s4163_s3 = inlined_call_operand.vmem [shape: f32[128,128], index: 3, kind: input, shape index: {}]   ;;  %s4164_s4 = inlined_call_operand.vmem [shape: f32[1,128], index: 4, kind: input, shape index: {}]   ;;  %s4165_s5 = inlined_call_operand.hbm [shape: f32[16,128], index: 5, kind: output, shape index: {}]  }
   0x1   :  { %v2598_v0 = vld [vmem:[%s4162_s2 + $0x1e8] sm:$0xff]  ;;  %v2603_v1 = vld [vmem:[%s4162_s2 + $0x1e0] sm:$0xff]  ;;  %199 = vmatprep.mubr.f32.mxu0 %v4168_v4  ;;  %276 = vmatprep.mubr.f32.mxu1 %v4168_v4  ;;  %v2645_v9 = vld [vmem:[%s4162_s2 + $0x1f8] sm:$0xff] }
   0x2   :  { %4278 = vst [vmem:[#allocation7_spill] sm:$0xff] %v2598_v0  ;;  %v2608_v2 = vld [vmem:[%s4162_s2 + $0x1c8] sm:$0xff]  ;;  %135 = vmatprep.subr.mxu0 %v2598_v0  ;;  %v2614_v3 = vld [vmem:[%s4162_s2 + $0x1c0] sm:$0xff]  ;;  %4279 = vst [vmem:[#allocation8_spill] sm:$0xff] %v2645_v9  ;;  %212 = vmatprep.subr.mxu1 %v2645_v9 }
   0x3   :  { %136 = vmatpush1.msra.mxu0 %v2603_v1  ;;  %v2621_v5 = vld [vmem:[%s4162_s2 + $0x1a8] sm:$0xff]  ;;  %v2628_v6 = vld [vmem:[%s4162_s2 + $0x1a0] sm:$0xff]  ;;  %v2657_v11 = vld [vmem:[%s4162_s2 + $0x1f0] sm:$0xff] }
   0x4   :  { %137 = vmatprep.subr.mxu0 %v2608_v2  ;;  %v2634_v7 = vld [vmem:[%s4162_s2 + $0x188] sm:$0xff]  ;;  %v2640_v8 = vld [vmem:[%s4162_s2 + $0x180] sm:$0xff]  ;;  %213 = vmatpush1.msra.mxu1 %v2657_v11  ;;  %v2669_v13 = vld [vmem:[%s4162_s2 + $0x1d8] sm:$0xff] }
   0x5   :  { %138 = vmatpush1.msra.mxu0 %v2614_v3  ;;  %v2651_v10 = vld [vmem:[%s4162_s2 + $0x168] sm:$0xff]  ;;  %v2663_v12 = vld [vmem:[%s4162_s2 + $0x160] sm:$0xff]  ;;  %v2674_v14 = vld [vmem:[%s4162_s2 + $0x1d0] sm:$0xff]  ;;  %214 = vmatprep.subr.mxu1 %v2669_v13 }
   0x6   :  { %139 = vmatprep.subr.mxu0 %v2621_v5  ;;  %v2680_v15 = vld [vmem:[%s4162_s2 + $0x148] sm:$0xff]  ;;  %v2686_v16 = vld [vmem:[%s4162_s2 + $0x1b8] sm:$0xff]  ;;  %v2692_v17 = vld [vmem:[%s4162_s2 + $0x140] sm:$0xff]  ;;  %215 = vmatpush1.msra.mxu1 %v2674_v14 }
   0x7   :  { %140 = vmatpush1.msra.mxu0 %v2628_v6  ;;  %v2698_v18 = vld [vmem:[%s4162_s2 + $0x1b0] sm:$0xff]  ;;  %v2703_v19 = vld [vmem:[%s4162_s2 + $0x198] sm:$0xff]  ;;  %v2709_v20 = vld [vmem:[%s4162_s2 + $0x128] sm:$0xff]  ;;  %216 = vmatprep.subr.mxu1 %v2686_v16 }
   0x8   :  { %141 = vmatprep.subr.mxu0 %v2634_v7  ;;  %v2715_v21 = vld [vmem:[%s4162_s2 + $0x190] sm:$0xff]  ;;  %v2721_v22 = vld [vmem:[%s4162_s2 + $0x120] sm:$0xff]  ;;  %217 = vmatpush1.msra.mxu1 %v2698_v18  ;;  %v2727_v23 = vld [vmem:[%s4162_s2 + $0x178] sm:$0xff] }
   0x9   :  { %142 = vmatpush1.msra.mxu0 %v2640_v8  ;;  %v2733_v24 = vld [vmem:[%s4162_s2 + $0x108] sm:$0xff]  ;;  %218 = vmatprep.subr.mxu1 %v2703_v19  ;;  %v2739_v25 = vld [vmem:[%s4162_s2 + $0x170] sm:$0xff]  ;;  %v2745_v26 = vld [vmem:[%s4162_s2 + $0x100] sm:$0xff] }
   0xa   :  { %143 = vmatprep.subr.mxu0 %v2651_v10  ;;  %219 = vmatpush1.msra.mxu1 %v2715_v21  ;;  %v2751_v27 = vld [vmem:[%s4162_s2 + $0x158] sm:$0xff]  ;;  %v2757_v28 = vld [vmem:[%s4162_s2 + $0xe8] sm:$0xff]  ;;  %v2763_v29 = vld [vmem:[%s4162_s2 + $0x150] sm:$0xff] }
   0xb   :  { %144 = vmatpush1.msra.mxu0 %v2663_v12  ;;  %220 = vmatprep.subr.mxu1 %v2727_v23  ;;  %v2769_v30 = vld [vmem:[%s4162_s2 + $0xe0] sm:$0xff]  ;;  %v2775_v31 = vld [vmem:[%s4162_s2 + $0x138] sm:$0xff]  ;;  %v2781_v32 = vld [vmem:[%s4162_s2 + $0xc8] sm:$0xff] }
   0xc   :  { %145 = vmatprep.subr.mxu0 %v2680_v15  ;;  %221 = vmatpush1.msra.mxu1 %v2739_v25  ;;  %v2787_v33 = vld [vmem:[%s4162_s2 + $0x130] sm:$0xff]  ;;  %v2793_v34 = vld [vmem:[%s4162_s2 + $0xc0] sm:$0xff]  ;;  %v2799_v35 = vld [vmem:[%s4162_s2 + $0x118] sm:$0xff] }
   0xd   :  { %146 = vmatpush1.msra.mxu0 %v2692_v17  ;;  %222 = vmatprep.subr.mxu1 %v2751_v27  ;;  %v2805_v36 = vld [vmem:[%s4162_s2 + $0xa8] sm:$0xff]  ;;  %v2811_v37 = vld [vmem:[%s4162_s2 + $0x110] sm:$0xff]  ;;  %v2817_v38 = vld [vmem:[%s4162_s2 + $0xa0] sm:$0xff] }
   0xe   :  { %147 = vmatprep.subr.mxu0 %v2709_v20  ;;  %223 = vmatpush1.msra.mxu1 %v2763_v29  ;;  %4280 = vst [vmem:[#allocation9_spill] sm:$0xff] %v2817_v38  ;;  %v2823_v39 = vld [vmem:[%s4162_s2 + $0xf8] sm:$0xff]  ;;  %v2829_v40 = vld [vmem:[%s4162_s2 + $0x88] sm:$0xff]  ;;  %v2835_v41 = vld [vmem:[%s4162_s2 + $0xf0] sm:$0xff] }
   0xf   :  { %148 = vmatpush1.msra.mxu0 %v2721_v22  ;;  %224 = vmatprep.subr.mxu1 %v2775_v31  ;;  %4281 = vst [vmem:[#allocation10_spill] sm:$0xff] %v2829_v40  ;;  %v2841_v42 = vld [vmem:[%s4162_s2 + $0x80] sm:$0xff]  ;;  %v2847_v43 = vld [vmem:[%s4162_s2 + $0xd8] sm:$0xff]  ;;  %v2853_v44 = vld [vmem:[%s4162_s2 + $0x68] sm:$0xff] }
  0x10   :  { %149 = vmatprep.subr.mxu0 %v2733_v24  ;;  %225 = vmatpush1.msra.mxu1 %v2787_v33  ;;  %4282 = vst [vmem:[#allocation11_spill] sm:$0xff] %v2841_v42  ;;  %4283 = vst [vmem:[#allocation12_spill] sm:$0xff] %v2853_v44  ;;  %v2859_v45 = vld [vmem:[%s4162_s2 + $0xd0] sm:$0xff] }
  0x11   :  { %150 = vmatpush1.msra.mxu0 %v2745_v26  ;;  %226 = vmatprep.subr.mxu1 %v2799_v35 }
  0x12   :  { %151 = vmatprep.subr.mxu0 %v2757_v28  ;;  %227 = vmatpush1.msra.mxu1 %v2811_v37 }
  0x13   :  { %152 = vmatpush1.msra.mxu0 %v2769_v30  ;;  %228 = vmatprep.subr.mxu1 %v2823_v39 }
  0x14   :  { %153 = vmatprep.subr.mxu0 %v2781_v32 }
  0x15   :  { %154 = vmatpush1.msra.mxu0 %v2793_v34 }
  0x16   :  { %155 = vmatprep.subr.mxu0 %v2805_v36 }
  0x17   :  { %156 = vmatpush1.msra.mxu0 %v2817_v38 }
  0x18   :  { %10 = vsyncpa [#allocation5], 0  ;;  %157 = vmatprep.subr.mxu0 %v2829_v40  ;;  %v2865_v46 = vld [vmem:[%s4162_s2 + $0x60] sm:$0xff]  ;;  %229 = vmatpush1.msra.mxu1 %v2835_v41  ;;  %v2871_v47 = vld [vmem:[%s4162_s2 + $0xb8] sm:$0xff] }
  0x19   :  { %4284 = vst [vmem:[#allocation13_spill] sm:$0xff] %v2865_v46  ;;  %4285 = vst [vmem:[#allocation14_spill] sm:$0xff] %v2871_v47  ;;  %158 = vmatpush1.msra.mxu0 %v2841_v42  ;;  %v2877_v48 = vld [vmem:[%s4162_s2 + $0x48] sm:$0xff]  ;;  %230 = vmatprep.subr.mxu1 %v2847_v43  ;;  %v2883_v49 = vld [vmem:[%s4162_s2 + $0xb0] sm:$0xff] }
  0x1a   :  { %4286 = vst [vmem:[#allocation15_spill] sm:$0xff] %v2877_v48  ;;  %4287 = vst [vmem:[#allocation16_spill] sm:$0xff] %v2883_v49  ;;  %159 = vmatprep.subr.mxu0 %v2853_v44  ;;  %v2889_v50 = vld [vmem:[%s4162_s2 + $0x40] sm:$0xff]  ;;  %231 = vmatpush1.msra.mxu1 %v2859_v45  ;;  %v2895_v51 = vld [vmem:[%s4162_s2 + $0x98] sm:$0xff] }
  0x1b   :  { %4288 = vst [vmem:[#allocation17_spill] sm:$0xff] %v2889_v50  ;;  %4289 = vst [vmem:[#allocation18_spill] sm:$0xff] %v2895_v51  ;;  %160 = vmatpush1.msra.mxu0 %v2865_v46  ;;  %v2901_v52 = vld [vmem:[%s4162_s2 + $0x28] sm:$0xff]  ;;  %232 = vmatprep.subr.mxu1 %v2871_v47  ;;  %v2907_v53 = vld [vmem:[%s4162_s2 + $0x90] sm:$0xff] }
  0x1c   :  { %4290 = vst [vmem:[#allocation19_spill] sm:$0xff] %v2901_v52  ;;  %4291 = vst [vmem:[#allocation20_spill] sm:$0xff] %v2907_v53  ;;  %161 = vmatprep.subr.mxu0 %v2877_v48  ;;  %v2913_v54 = vld [vmem:[%s4162_s2 + $0x20] sm:$0xff]  ;;  %233 = vmatpush1.msra.mxu1 %v2883_v49  ;;  %v2919_v55 = vld [vmem:[%s4162_s2 + $0x78] sm:$0xff] }
  0x1d   :  { %4292 = vst [vmem:[#allocation21_spill] sm:$0xff] %v2913_v54  ;;  %4293 = vst [vmem:[#allocation22_spill] sm:$0xff] %v2919_v55  ;;  %162 = vmatpush1.msra.mxu0 %v2889_v50  ;;  %v2925_v56 = vld [vmem:[%s4162_s2 + $0x8] sm:$0xff]  ;;  %234 = vmatprep.subr.mxu1 %v2895_v51  ;;  %v2931_v57 = vld [vmem:[%s4162_s2 + $0x70] sm:$0xff] }
  0x1e   :  { %4294 = vst [vmem:[#allocation23_spill] sm:$0xff] %v2925_v56  ;;  %4295 = vst [vmem:[#allocation24_spill] sm:$0xff] %v2931_v57  ;;  %163 = vmatprep.subr.mxu0 %v2901_v52  ;;  %v2937_v58 = vld [vmem:[%s4162_s2] sm:$0xff]  ;;  %235 = vmatpush1.msra.mxu1 %v2907_v53  ;;  %v2943_v59 = vld [vmem:[%s4162_s2 + $0x58] sm:$0xff] }
  0x1f   :  { %4296 = vst [vmem:[#allocation25_spill] sm:$0xff] %v2937_v58  ;;  %4297 = vst [vmem:[#allocation26_spill] sm:$0xff] %v2943_v59  ;;  %164 = vmatpush1.msra.mxu0 %v2913_v54  ;;  %236 = vmatprep.subr.mxu1 %v2919_v55  ;;  %v2950_v60 = vld [vmem:[%s4162_s2 + $0x50] sm:$0xff]  ;;  %v2957_v61 = vld [vmem:[%s4162_s2 + $0x38] sm:$0xff] }
  0x20   :  { %4298 = vst [vmem:[#allocation27_spill] sm:$0xff] %v2950_v60  ;;  %165 = vmatprep.subr.mxu0 %v2925_v56  ;;  %237 = vmatpush1.msra.mxu1 %v2931_v57  ;;  %4299 = vst [vmem:[#allocation28_spill] sm:$0xff] %v2957_v61  ;;  %v2964_v62 = vld [vmem:[%s4162_s2 + $0x30] sm:$0xff]  ;;  %v2971_v63 = vld [vmem:[%s4162_s2 + $0x18] sm:$0xff] }
  0x21   :  { %166 = vmatpush1.msra.mxu0 %v2937_v58  ;;  %238 = vmatprep.subr.mxu1 %v2943_v59  ;;  %4300 = vst [vmem:[#allocation29_spill] sm:$0xff] %v2964_v62  ;;  %4301 = vst [vmem:[#allocation30_spill] sm:$0xff] %v2971_v63  ;;  %v2978_v58 = vld [vmem:[%s4162_s2 + $0x10] sm:$0xff] }
  0x22   :  { %200 = vmatmul.mubr.f32.vlgmr.msra.gmra.mxu0 %v4168_v4  ;;  %239 = vmatpush1.msra.mxu1 %v2950_v60  ;;  %4302 = vst [vmem:[#allocation31_spill] sm:$0xff] %v2978_v58 }
  0x23   :  { %205 = vmatprep.mubr.f32.mxu0 %v4168_v4  ;;  %240 = vmatprep.subr.mxu1 %v2957_v61 }
  0x24   :  { %241 = vmatpush1.msra.mxu1 %v2964_v62  ;;  %362 = vmatprep.subr.mxu0 %v2598_v0 }
  0x25   :  { %242 = vmatprep.subr.mxu1 %v2971_v63  ;;  %363 = vmatpush1.msra.mxu0 %v2603_v1 }
  0x26   :  { %206 = vmatmul.mubr.f32.gmra.mxu0 %v4168_v4  ;;  %243 = vmatpush1.msra.mxu1 %v2978_v58 }
  0x27   :  { %277 = vmatmul.mubr.f32.vlgmr.msra.gmra.mxu1 %v4168_v4  ;;  %439 = vmatprep.subr.mxu1 %v2645_v9 }
  0x28   :  { %282 = vmatprep.mubr.f32.mxu1 %v4168_v4  ;;  %440 = vmatpush1.msra.mxu1 %v2657_v11 }
  0x29   :  { %364 = vmatprep.subr.mxu0 %v2608_v2  ;;  %441 = vmatprep.subr.mxu1 %v2669_v13 }
  0x2a   :  { %365 = vmatpush1.msra.mxu0 %v2614_v3  ;;  %442 = vmatpush1.msra.mxu1 %v2674_v14 }
  0x2b   :  { %283 = vmatmul.mubr.f32.gmra.mxu1 %v4168_v4  ;;  %366 = vmatprep.subr.mxu0 %v2621_v5  ;;  %v4303_v4 = vld [vmem:[#allocation25_spill] sm:$0xff] }
  0x2c   :  { %443 = vmatprep.subr.mxu1 %v2686_v16  ;;  %367 = vmatpush1.msra.mxu0 %v2628_v6 }
  0x2d   :  { %444 = vmatpush1.msra.mxu1 %v2698_v18  ;;  %368 = vmatprep.subr.mxu0 %v2634_v7 }
  0x2e   :  { %445 = vmatprep.subr.mxu1 %v2703_v19  ;;  %369 = vmatpush1.msra.mxu0 %v2640_v8 }
  0x2f   :  { %446 = vmatpush1.msra.mxu1 %v2715_v21  ;;  %370 = vmatprep.subr.mxu0 %v2651_v10 }
  0x30   :  { %447 = vmatprep.subr.mxu1 %v2727_v23  ;;  %371 = vmatpush1.msra.mxu0 %v2663_v12 }
  0x31   :  { %448 = vmatpush1.msra.mxu1 %v2739_v25  ;;  %372 = vmatprep.subr.mxu0 %v2680_v15 }
  0x32   :  { %449 = vmatprep.subr.mxu1 %v2751_v27  ;;  %373 = vmatpush1.msra.mxu0 %v2692_v17 }
  0x33   :  { %450 = vmatpush1.msra.mxu1 %v2763_v29  ;;  %374 = vmatprep.subr.mxu0 %v2709_v20 }
  0x34   :  { %451 = vmatprep.subr.mxu1 %v2775_v31  ;;  %375 = vmatpush1.msra.mxu0 %v2721_v22 }
  0x35   :  { %452 = vmatpush1.msra.mxu1 %v2787_v33  ;;  %376 = vmatprep.subr.mxu0 %v2733_v24 }
  0x36   :  { %453 = vmatprep.subr.mxu1 %v2799_v35  ;;  %377 = vmatpush1.msra.mxu0 %v2745_v26 }
  0x37   :  { %454 = vmatpush1.msra.mxu1 %v2811_v37  ;;  %378 = vmatprep.subr.mxu0 %v2757_v28 }
  0x38   :  { %455 = vmatprep.subr.mxu1 %v2823_v39  ;;  %379 = vmatpush1.msra.mxu0 %v2769_v30 }
  0x39   :  { %456 = vmatpush1.msra.mxu1 %v2835_v41  ;;  %380 = vmatprep.subr.mxu0 %v2781_v32 }
  0x3a   :  { %457 = vmatprep.subr.mxu1 %v2847_v43  ;;  %381 = vmatpush1.msra.mxu0 %v2793_v34 }
  0x3b   :  { %458 = vmatpush1.msra.mxu1 %v2859_v45  ;;  %382 = vmatprep.subr.mxu0 %v2805_v36 }
  0x3c   :  { %459 = vmatprep.subr.mxu1 %v2871_v47  ;;  %383 = vmatpush1.msra.mxu0 %v2817_v38  ;;  %v101_v38 = vld [vmem:[%s4160_s0 + $0x18] sm:$0xff] }
  0x3d   :  { %460 = vmatpush1.msra.mxu1 %v2883_v49  ;;  %384 = vmatprep.subr.mxu0 %v2829_v40 }
  0x3e   :  { %461 = vmatprep.subr.mxu1 %v2895_v51  ;;  %385 = vmatpush1.msra.mxu0 %v2841_v42 }
  0x3f   :  { %462 = vmatpush1.msra.mxu1 %v2907_v53  ;;  %386 = vmatprep.subr.mxu0 %v2853_v44 }
  0x40   :  { %463 = vmatprep.subr.mxu1 %v2919_v55  ;;  %387 = vmatpush1.msra.mxu0 %v2865_v46 }
  0x41   :  { %464 = vmatpush1.msra.mxu1 %v2931_v57  ;;  %388 = vmatprep.subr.mxu0 %v2877_v48  ;;  %v4304_v48 = vmov 0.0  }
  0x42   :  { %465 = vmatprep.subr.mxu1 %v2943_v59  ;;  %389 = vmatpush1.msra.mxu0 %v2889_v50  ;;  %v103_v50 = vld [vmem:[%s4160_s0 + $0x28] sm:$0xff] }
  0x43   :  { %466 = vmatpush1.msra.mxu1 %v2950_v60  ;;  %390 = vmatprep.subr.mxu0 %v2901_v52 }
  0x44   :  { %467 = vmatprep.subr.mxu1 %v2957_v61  ;;  %391 = vmatpush1.msra.mxu0 %v2913_v54  ;;  %v107_v61 = vlaneseq }
  0x45   :  { %468 = vmatpush1.msra.mxu1 %v2964_v62  ;;  %392 = vmatprep.subr.mxu0 %v2925_v56  ;;  %v93_v56 = vld [vmem:[%s4161_s1] sm:$0xf] }
  0x46   :  { %469 = vmatprep.subr.mxu1 %v2971_v63  ;;  %393 = vmatpush1.msra.mxu0 %v4303_v4  ;;  %v108_v54 = vshrl.u32 %v107_v61, 7 }
  0x47   :  { %426 = vmatprep.mubr.f32.mxu0 %v4304_v48  ;;  %470 = vmatpush1.msra.mxu1 %v2978_v58  ;;  %v98_v58 = vld [vmem:[%s4160_s0] sm:$0xff] }
  0x48   :  { %503 = vmatprep.mubr.f32.mxu1 %v4304_v48  ;;  %589 = vmatprep.subr.mxu0 %v2598_v0  ;;  %v109_v52 = vsub.s32 0, %v108_v54  ;;  %v113_v63 = vsub.s32 1, %v108_v54  ;;  %v102_v0 = vld [vmem:[%s4160_s0 + $0x20] sm:$0xff]  ;;  %v121_v59 = vsub.s32 3, %v108_v54  ;;  %v117_v53 = vsub.s32 2, %v108_v54 }
  0x49   :  { %666 = vmatprep.subr.mxu1 %v2645_v9  ;;  %v99_v9 = vld [vmem:[%s4160_s0 + $0x8] sm:$0xff] }
  0x4a   :  { %v3058_v62 = vrot.slane %v93_v56, %v109_v52  ;;  %v3063_v4 = vrot.slane %v93_v56, %v113_v63  ;;  %v3078_v51 = vrot.slane %v93_v56, %v121_v59 }
  0x4c   :  { %4305 = vst [vmem:[#allocation32_spill] sm:$0xff] %v3058_v62  ;;  %4306 = vst [vmem:[#allocation33_spill] sm:$0xff] %v3063_v4  ;;  %v127_v61 = vadd.f32 %v3058_v62, %v98_v58  ;;  %v128_v60 = vadd.f32 %v3063_v4, %v99_v9  ;;  %v131_v57 = vadd.f32 %v3058_v62, %v102_v0 }
  0x4d   :  { %v132_v58 = vadd.f32 %v3063_v4, %v103_v50  ;;  %4307 = vst [vmem:[#allocation34_spill] sm:$0xff] %v3078_v51  ;;  %v100_v50 = vld [vmem:[%s4160_s0 + $0x10] sm:$0xff]  ;;  %v130_v54 = vadd.f32 %v3078_v51, %v101_v38 }
  0xe2   :  { %v201_v52 = vpop.f32.mrf.mxu0 }
  0xe3   :  { %v289_v63 = vadd.f32 %v201_v52, %v127_v61 }
  0xe4   :  { %v203_v46 = vpop.f32.mrf.mxu0 }
  0xe5   :  { %v2057_v55 = vmul.f32 -1.442695, %v289_v63  ;;  %v290_v44 = vadd.f32 %v203_v46, %v128_v60  ;;  %v3083_v63 = vrot.slane %v93_v56, %v117_v53  ;;  %v104_v53 = vld [vmem:[%s4160_s0 + $0x30] sm:$0xff] }
  0xe6   :  { %v207_v42 = vpop.f32.mrf.mxu0 }
  0xe7   :  { %2219 = vpow2.f32 %v2057_v55  ;;  %v2059_v9 = vmul.f32 -1.442695, %v290_v44  ;;  %v293_v40 = vadd.f32 %v207_v42, %v131_v57  ;;  %v278_v49 = vpop.f32.mrf.mxu1  ;;  %v105_v55 = vld [vmem:[%s4160_s0 + $0x38] sm:$0xff]  ;;  %v133_v38 = vadd.f32 %v3083_v63, %v104_v53 }
  0xe8   :  { %v209_v61 = vpop.f32.mrf.mxu0  ;;  %v134_v57 = vadd.f32 %v3078_v51, %v105_v55 }
  0xe9   :  { %2221 = vpow2.f32 %v2059_v9  ;;  %v2058_v0 = vmul.f32 -1.442695, %v293_v40  ;;  %v294_v52 = vadd.f32 %v209_v61, %v132_v58  ;;  %v280_v46 = vpop.f32.mrf.mxu1  ;;  %v129_v40 = vadd.f32 %v3083_v63, %v100_v50 }
  0xea   :  { %v292_v56 = vadd.f32 %v280_v46, %v130_v54 }
  0xeb   :  { %2223 = vpow2.f32 %v2058_v0  ;;  %v2060_v42 = vmul.f32 -1.442695, %v294_v52  ;;  %v284_v44 = vpop.f32.mrf.mxu1  ;;  %v291_v60 = vadd.f32 %v278_v49, %v129_v40 }
  0xec   :  { %v2061_v58 = vmul.f32 -1.442695, %v292_v56  ;;  %v295_v0 = vadd.f32 %v284_v44, %v133_v38 }
  0xed   :  { %2225 = vpow2.f32 %v2060_v42  ;;  %v286_v59 = vpop.f32.mrf.mxu1 }
  0xee   :  { %v296_v9 = vadd.f32 %v286_v59, %v134_v57  ;;  %2227 = vtanh.f32 %v291_v60 }
  0xef   :  { %2229 = vpow2.f32 %v2061_v58 }
  0xf0   :  { %v2062_v50 = vmul.f32 -1.442695, %v296_v9 }
  0xf4   :  { %v2220_v61 = vpop.eup %2219 }
  0xf5   :  { %v303_v52 = vadd.f32 1.0, %v2220_v61 }
  0xf6   :  { %v2222_v42 = vpop.eup %2221 }
  0xf7   :  { %2231 = vrcp.f32 %v303_v52  ;;  %v315_v4 = vadd.f32 1.0, %v2222_v42 }
  0xf8   :  { %v2224_v62 = vpop.eup %2223  ;;  %2233 = vtanh.f32 %v295_v0 }
  0xf9   :  { %2235 = vrcp.f32 %v315_v4  ;;  %v304_v46 = vadd.f32 1.0, %v2224_v62 }
  0xfa   :  { %v2226_v54 = vpop.eup %2225  ;;  %2237 = vpow2.f32 %v2062_v50 }
  0xfb   :  { %2239 = vrcp.f32 %v304_v46  ;;  %v316_v55 = vadd.f32 1.0, %v2226_v54  ;;  %v2228_v49 = vpop.eup %2227 }
  0xfc   :  { %v2230_v40 = vpop.eup %2229 }
  0xfd   :  { %2241 = vrcp.f32 %v316_v55  ;;  %v329_v57 = vadd.f32 1.0, %v2230_v40  ;;  %v4308_v40 = vld [vmem:[#allocation9_spill] sm:$0xff] }
  0xff   :  { %2243 = vrcp.f32 %v329_v57  ;;  %v4312_v57 = vld [vmem:[#allocation11_spill] sm:$0xff] }
 0x104   :  { %v2232_v53 = vpop.eup %2231 }
 0x105   :  { %v2234_v44 = vpop.eup %2233  ;;  %v337_v60 = vmul.f32 %v2232_v53, %v2228_v49  ;;  %v4309_v53 = vld [vmem:[#allocation16_spill] sm:$0xff] }
 0x106   :  { %v2236_v56 = vpop.eup %2235 }
 0x107   :  { %v2238_v59 = vpop.eup %2237  ;;  %v335_v38 = vmul.f32 0.0, %v2236_v56  ;;  %v4311_v56 = vld [vmem:[#allocation18_spill] sm:$0xff] }
 0x108   :  { %v2240_v58 = vpop.eup %2239  ;;  %v330_v4 = vadd.f32 1.0, %v2238_v59  ;;  %v4313_v59 = vld [vmem:[#allocation20_spill] sm:$0xff] }
 0x109   :  { %v3098_v9 = vadd.f32 %v337_v60, %v335_v38  ;;  %v338_v0 = vmul.f32 %v2240_v58, %v2234_v44  ;;  %v4310_v44 = vld [vmem:[#allocation10_spill] sm:$0xff]  ;;  %v4314_v38 = vld [vmem:[#allocation12_spill] sm:$0xff]  ;;  %v4316_v58 = vld [vmem:[#allocation13_spill] sm:$0xff] }
 0x10a   :  { %v2242_v61 = vpop.eup %2241  ;;  %v4315_v60 = vld [vmem:[#allocation22_spill] sm:$0xff] }
 0x10b   :  { %v336_v62 = vmul.f32 0.0, %v2242_v61  ;;  %2245 = vtanh.f32 %v3098_v9  ;;  %v4317_v61 = vld [vmem:[#allocation24_spill] sm:$0xff] }
 0x10c   :  { %2247 = vrcp.f32 %v330_v4  ;;  %v2244_v42 = vpop.eup %2243  ;;  %v4318_v4 = vld [vmem:[#allocation15_spill] sm:$0xff] }
 0x10d   :  { %v3101_v52 = vadd.f32 %v338_v0, %v336_v62  ;;  %v4319_v62 = vld [vmem:[#allocation26_spill] sm:$0xff]  ;;  %v4320_v0 = vld [vmem:[#allocation17_spill] sm:$0xff] }
 0x10f   :  { %2249 = vtanh.f32 %v3101_v52 }
 0x118   :  { %v2246_v50 = vpop.eup %2245 }
 0x119   :  { %v343_v46 = vmul.f32 %v2246_v50, %v2244_v42  ;;  %v2248_v54 = vpop.eup %2247  ;;  %v4321_v42 = vld [vmem:[#allocation27_spill] sm:$0xff] }
 0x11a   :  { %v4322_v50 = vld [vmem:[#allocation19_spill] sm:$0xff] }
 0x11b   :  { %427 = vmatmul.mubr.f32.vlgmr.msra.gmra.mxu0 %v343_v46  ;;  %504 = vmatmul.mubr.f32.vlgmr.msra.gmra.mxu1 %v343_v46  ;;  %v4323_v46 = vld [vmem:[#allocation28_spill] sm:$0xff] }
 0x11c   :  { %v2250_v55 = vpop.eup %2249  ;;  %432 = vmatprep.mubr.f32.mxu0 %v4304_v48  ;;  %509 = vmatprep.mubr.f32.mxu1 %v4304_v48 }
 0x11d   :  { %v344_v49 = vmul.f32 %v2250_v55, %v2248_v54  ;;  %590 = vmatpush1.msra.mxu0 %v2603_v1  ;;  %667 = vmatpush1.msra.mxu1 %v2657_v11  ;;  %v4324_v54 = vld [vmem:[#allocation21_spill] sm:$0xff] }
 0x11e   :  { %591 = vmatprep.subr.mxu0 %v2608_v2  ;;  %668 = vmatprep.subr.mxu1 %v2669_v13  ;;  %v4325_v55 = vld [vmem:[#allocation29_spill] sm:$0xff] }
 0x11f   :  { %433 = vmatmul.mubr.f32.gmra.mxu0 %v344_v49  ;;  %510 = vmatmul.mubr.f32.gmra.mxu1 %v344_v49  ;;  %v4326_v49 = vld [vmem:[#allocation23_spill] sm:$0xff] }
 0x120   :  { %592 = vmatpush1.msra.mxu0 %v2614_v3  ;;  %669 = vmatpush1.msra.mxu1 %v2674_v14 }
 0x121   :  { %593 = vmatprep.subr.mxu0 %v2621_v5  ;;  %670 = vmatprep.subr.mxu1 %v2686_v16 }
 0x122   :  { %594 = vmatpush1.msra.mxu0 %v2628_v6  ;;  %671 = vmatpush1.msra.mxu1 %v2698_v18 }
 0x123   :  { %595 = vmatprep.subr.mxu0 %v2634_v7  ;;  %672 = vmatprep.subr.mxu1 %v2703_v19 }
 0x124   :  { %596 = vmatpush1.msra.mxu0 %v2640_v8  ;;  %673 = vmatpush1.msra.mxu1 %v2715_v21 }
 0x125   :  { %597 = vmatprep.subr.mxu0 %v2651_v10  ;;  %674 = vmatprep.subr.mxu1 %v2727_v23 }
 0x126   :  { %598 = vmatpush1.msra.mxu0 %v2663_v12  ;;  %675 = vmatpush1.msra.mxu1 %v2739_v25 }
 0x127   :  { %599 = vmatprep.subr.mxu0 %v2680_v15  ;;  %676 = vmatprep.subr.mxu1 %v2751_v27 }
 0x128   :  { %600 = vmatpush1.msra.mxu0 %v2692_v17  ;;  %677 = vmatpush1.msra.mxu1 %v2763_v29 }
 0x129   :  { %601 = vmatprep.subr.mxu0 %v2709_v20  ;;  %678 = vmatprep.subr.mxu1 %v2775_v31 }
 0x12a   :  { %602 = vmatpush1.msra.mxu0 %v2721_v22  ;;  %679 = vmatpush1.msra.mxu1 %v2787_v33 }
 0x12b   :  { %603 = vmatprep.subr.mxu0 %v2733_v24  ;;  %680 = vmatprep.subr.mxu1 %v2799_v35 }
 0x12c   :  { %604 = vmatpush1.msra.mxu0 %v2745_v26  ;;  %681 = vmatpush1.msra.mxu1 %v2811_v37 }
 0x12d   :  { %605 = vmatprep.subr.mxu0 %v2757_v28  ;;  %682 = vmatprep.subr.mxu1 %v2823_v39 }
 0x12e   :  { %606 = vmatpush1.msra.mxu0 %v2769_v30  ;;  %683 = vmatpush1.msra.mxu1 %v2835_v41 }
 0x12f   :  { %607 = vmatprep.subr.mxu0 %v2781_v32  ;;  %684 = vmatprep.subr.mxu1 %v2847_v43 }
 0x130   :  { %608 = vmatpush1.msra.mxu0 %v2793_v34  ;;  %685 = vmatpush1.msra.mxu1 %v2859_v45 }
 0x131   :  { %609 = vmatprep.subr.mxu0 %v2805_v36  ;;  %686 = vmatprep.subr.mxu1 %v2871_v47 }
 0x132   :  { %610 = vmatpush1.msra.mxu0 %v4308_v40  ;;  %687 = vmatpush1.msra.mxu1 %v4309_v53 }
 0x133   :  { %611 = vmatprep.subr.mxu0 %v4310_v44  ;;  %688 = vmatprep.subr.mxu1 %v4311_v56 }
 0x134   :  { %612 = vmatpush1.msra.mxu0 %v4312_v57  ;;  %689 = vmatpush1.msra.mxu1 %v4313_v59 }
 0x135   :  { %613 = vmatprep.subr.mxu0 %v4314_v38  ;;  %690 = vmatprep.subr.mxu1 %v4315_v60 }
 0x136   :  { %614 = vmatpush1.msra.mxu0 %v4316_v58  ;;  %691 = vmatpush1.msra.mxu1 %v4317_v61  ;;  %v4327_v58 = vld [vmem:[#allocation30_spill] sm:$0xff]  ;;  %v4328_v61 = vld [vmem:[#allocation25_spill] sm:$0xff] }
 0x137   :  { %615 = vmatprep.subr.mxu0 %v4318_v4  ;;  %692 = vmatprep.subr.mxu1 %v4319_v62  ;;  %v4329_v62 = vld [vmem:[#allocation31_spill] sm:$0xff] }
 0x138   :  { %616 = vmatpush1.msra.mxu0 %v4320_v0  ;;  %693 = vmatpush1.msra.mxu1 %v4321_v42  ;;  %v4330_v42 = vld [vmem:[#allocation7_spill] sm:$0xff] }
 0x139   :  { %617 = vmatprep.subr.mxu0 %v4322_v50  ;;  %694 = vmatprep.subr.mxu1 %v4323_v46  ;;  %v4331_v50 = vld [vmem:[#allocation8_spill] sm:$0xff] }
 0x13a   :  { %618 = vmatpush1.msra.mxu0 %v4324_v54  ;;  %695 = vmatpush1.msra.mxu1 %v4325_v55  ;;  %v2063_v55 = vld [vmem:[%s4160_s0 + $0x40] sm:$0xff] }
 0x13b   :  { %619 = vmatprep.subr.mxu0 %v4326_v49  ;;  %696 = vmatprep.subr.mxu1 %v4327_v58  ;;  %v2064_v58 = vld [vmem:[%s4160_s0 + $0x48] sm:$0xff]  ;;  %v4332_v49 = vld [vmem:[#allocation32_spill] sm:$0xff]  ;;  %v4333_v54 = vld [vmem:[#allocation33_spill] sm:$0xff] }
 0x13c   :  { %620 = vmatpush1.msra.mxu0 %v4328_v61  ;;  %653 = vmatprep.mubr.f32.mxu0 %v4304_v48  ;;  %v354_v61 = vadd.f32 %v2063_v55, %v4332_v49  ;;  %v355_v46 = vadd.f32 %v2064_v58, %v4333_v54  ;;  %v2066_v58 = vld [vmem:[%s4160_s0 + $0x58] sm:$0xff] }
 0x13d   :  { %697 = vmatpush1.msra.mxu1 %v4329_v62  ;;  %730 = vmatprep.mubr.f32.mxu1 %v4304_v48  ;;  %v2067_v62 = vld [vmem:[%s4160_s0 + $0x60] sm:$0xff] }
 0x13e   :  { %816 = vmatprep.subr.mxu0 %v4330_v42  ;;  %893 = vmatprep.subr.mxu1 %v4331_v50  ;;  %v2068_v42 = vld [vmem:[%s4160_s0 + $0x68] sm:$0xff]  ;;  %v358_v60 = vadd.f32 %v2067_v62, %v4332_v49  ;;  %v357_v62 = vadd.f32 %v2066_v58, %v3078_v51 }
 0x13f   :  { %v359_v55 = vadd.f32 %v2068_v42, %v4333_v54 }
 0x1db   :  { %v428_v0 = vpop.f32.mrf.mxu0  ;;  %v505_v4 = vpop.f32.mrf.mxu1 }
 0x1dc   :  { %v516_v50 = vadd.f32 %v428_v0, %v354_v61 }
 0x1dd   :  { %v430_v38 = vpop.f32.mrf.mxu0  ;;  %v507_v53 = vpop.f32.mrf.mxu1 }
 0x1de   :  { %v2071_v59 = vmul.f32 -1.442695, %v516_v50  ;;  %v517_v57 = vadd.f32 %v430_v38, %v355_v46  ;;  %v519_v46 = vadd.f32 %v507_v53, %v357_v62 }
 0x1df   :  { %v434_v56 = vpop.f32.mrf.mxu0  ;;  %v511_v50 = vpop.f32.mrf.mxu1 }
 0x1e0   :  { %2251 = vpow2.f32 %v2071_v59  ;;  %v2073_v44 = vmul.f32 -1.442695, %v517_v57  ;;  %v520_v40 = vadd.f32 %v434_v56, %v358_v60  ;;  %v2070_v59 = vld [vmem:[%s4160_s0 + $0x78] sm:$0xff]  ;;  %v2065_v57 = vld [vmem:[%s4160_s0 + $0x50] sm:$0xff]  ;;  %v2075_v60 = vmul.f32 -1.442695, %v519_v46 }
 0x1e1   :  { %v436_v47 = vpop.f32.mrf.mxu0  ;;  %v361_v56 = vadd.f32 %v2070_v59, %v3078_v51 }
 0x1e2   :  { %2253 = vpow2.f32 %v2073_v44  ;;  %v2072_v61 = vmul.f32 -1.442695, %v520_v40  ;;  %v521_v0 = vadd.f32 %v436_v47, %v359_v55  ;;  %v513_v44 = vpop.f32.mrf.mxu1  ;;  %v356_v47 = vadd.f32 %v2065_v57, %v3083_v63  ;;  %v2069_v40 = vld [vmem:[%s4160_s0 + $0x70] sm:$0xff] }
 0x1e3   :  { %v523_v42 = vadd.f32 %v513_v44, %v361_v56 }
 0x1e4   :  { %2255 = vpow2.f32 %v2072_v61  ;;  %v2074_v38 = vmul.f32 -1.442695, %v521_v0  ;;  %v518_v58 = vadd.f32 %v505_v4, %v356_v47  ;;  %v360_v61 = vadd.f32 %v2069_v40, %v3083_v63 }
 0x1e6   :  { %2257 = vpow2.f32 %v2074_v38  ;;  %v2076_v38 = vmul.f32 -1.442695, %v523_v42  ;;  %v522_v59 = vadd.f32 %v511_v50, %v360_v61 }
 0x1e7   :  { %2259 = vpow2.f32 %v2075_v60 }
 0x1ed   :  { %v2252_v55 = vpop.eup %2251 }
 0x1ee   :  { %v530_v0 = vadd.f32 1.0, %v2252_v55 }
 0x1ef   :  { %v2254_v54 = vpop.eup %2253 }
 0x1f0   :  { %2261 = vrcp.f32 %v530_v0  ;;  %v542_v53 = vadd.f32 1.0, %v2254_v54 }
 0x1f1   :  { %v2256_v62 = vpop.eup %2255  ;;  %2263 = vtanh.f32 %v518_v58 }
 0x1f2   :  { %2265 = vrcp.f32 %v542_v53  ;;  %v531_v57 = vadd.f32 1.0, %v2256_v62 }
 0x1f3   :  { %v2258_v51 = vpop.eup %2257  ;;  %2267 = vpow2.f32 %v2076_v38 }
 0x1f4   :  { %2269 = vrcp.f32 %v531_v57  ;;  %v543_v46 = vadd.f32 1.0, %v2258_v51  ;;  %v2260_v4 = vpop.eup %2259 }
 0x1f5   :  { %2271 = vtanh.f32 %v522_v59  ;;  %v556_v40 = vadd.f32 1.0, %v2260_v4 }
 0x1f6   :  { %2273 = vrcp.f32 %v543_v46 }
 0x1f7   :  { %2275 = vrcp.f32 %v556_v40 }
 0x1fd   :  { %v2262_v56 = vpop.eup %2261 }
 0x1fe   :  { %v2264_v44 = vpop.eup %2263 }
 0x1ff   :  { %v2266_v47 = vpop.eup %2265  ;;  %v564_v42 = vmul.f32 %v2264_v44, %v2262_v56 }
 0x200   :  { %v2268_v60 = vpop.eup %2267  ;;  %v562_v54 = vmul.f32 %v2266_v47, %v3098_v9  ;;  %v2080_v47 = vld [vmem:[%s4160_s0 + $0x98] sm:$0xff] }
 0x201   :  { %v2270_v55 = vpop.eup %2269  ;;  %v557_v0 = vadd.f32 1.0, %v2268_v60 }
 0x202   :  { %v2272_v58 = vpop.eup %2271  ;;  %v3205_v50 = vadd.f32 %v564_v42, %v562_v54 }
 0x203   :  { %v2274_v61 = vpop.eup %2273  ;;  %v565_v51 = vmul.f32 %v2272_v58, %v2270_v55  ;;  %v4360_v58 = vld [vmem:[#allocation34_spill] sm:$0xff] }
 0x204   :  { %2277 = vtanh.f32 %v3205_v50  ;;  %v563_v38 = vmul.f32 %v2274_v61, %v3101_v52  ;;  %v2276_v62 = vpop.eup %2275  ;;  %v584_v61 = vadd.f32 %v2080_v47, %v4360_v58  ;;  %v3365_v47 = vld [vmem:[%s4162_s2 + $0x1d0] sm:$0xff] }
 0x205   :  { %2279 = vrcp.f32 %v557_v0 }
 0x206   :  { %v3209_v53 = vadd.f32 %v565_v51, %v563_v38  ;;  %v2084_v38 = vld [vmem:[%s4160_s0 + $0xb8] sm:$0xff] }
 0x208   :  { %2281 = vtanh.f32 %v3209_v53 }
 0x211   :  { %v2278_v59 = vpop.eup %2277 }
 0x212   :  { %v570_v9 = vmul.f32 %v2278_v59, %v2276_v62  ;;  %v2280_v57 = vpop.eup %2279  ;;  %v2079_v62 = vld [vmem:[%s4160_s0 + $0x90] sm:$0xff] }
 0x214   :  { %654 = vmatmul.mubr.f32.vlgmr.msra.gmra.mxu0 %v570_v9  ;;  %731 = vmatmul.mubr.f32.vlgmr.msra.gmra.mxu1 %v570_v9  ;;  %v588_v9 = vadd.f32 %v2084_v38, %v4360_v58  ;;  %v3419_v38 = vld [vmem:[%s4162_s2 + $0x168] sm:$0xff] }
 0x215   :  { %v2282_v46 = vpop.eup %2281  ;;  %659 = vmatprep.mubr.f32.mxu0 %v4304_v48  ;;  %736 = vmatprep.mubr.f32.mxu1 %v4304_v48 }
 0x216   :  { %v571_v4 = vmul.f32 %v2282_v46, %v2280_v57  ;;  %817 = vmatpush1.msra.mxu0 %v2603_v1  ;;  %894 = vmatpush1.msra.mxu1 %v2657_v11  ;;  %v4334_v1 = vld [vmem:[#allocation14_spill] sm:$0xff]  ;;  %v583_v46 = vadd.f32 %v2079_v62, %v3083_v63  ;;  %v3425_v62 = vld [vmem:[%s4162_s2 + $0x178] sm:$0xff] }
 0x217   :  { %818 = vmatprep.subr.mxu0 %v2608_v2  ;;  %895 = vmatprep.subr.mxu1 %v2669_v13  ;;  %v4335_v2 = vld [vmem:[#allocation9_spill] sm:$0xff]  ;;  %v4342_v11 = vld [vmem:[#allocation22_spill] sm:$0xff]  ;;  %v4344_v13 = vld [vmem:[#allocation24_spill] sm:$0xff] }
 0x218   :  { %660 = vmatmul.mubr.f32.gmra.mxu0 %v571_v4  ;;  %737 = vmatmul.mubr.f32.gmra.mxu1 %v571_v4  ;;  %v2083_v4 = vld [vmem:[%s4160_s0 + $0xb0] sm:$0xff] }
 0x219   :  { %819 = vmatpush1.msra.mxu0 %v2614_v3  ;;  %896 = vmatpush1.msra.mxu1 %v2674_v14  ;;  %v4336_v3 = vld [vmem:[#allocation16_spill] sm:$0xff]  ;;  %v4345_v14 = vld [vmem:[#allocation15_spill] sm:$0xff] }
 0x21a   :  { %820 = vmatprep.subr.mxu0 %v2621_v5  ;;  %897 = vmatprep.subr.mxu1 %v2686_v16  ;;  %v4337_v5 = vld [vmem:[#allocation10_spill] sm:$0xff]  ;;  %v4347_v16 = vld [vmem:[#allocation17_spill] sm:$0xff] }
 0x21b   :  { %821 = vmatpush1.msra.mxu0 %v2628_v6  ;;  %898 = vmatpush1.msra.mxu1 %v2698_v18  ;;  %v4338_v6 = vld [vmem:[#allocation18_spill] sm:$0xff]  ;;  %v4349_v18 = vld [vmem:[#allocation19_spill] sm:$0xff] }
 0x21c   :  { %822 = vmatprep.subr.mxu0 %v2634_v7  ;;  %899 = vmatprep.subr.mxu1 %v2703_v19  ;;  %v4339_v7 = vld [vmem:[#allocation11_spill] sm:$0xff]  ;;  %v4350_v19 = vld [vmem:[#allocation28_spill] sm:$0xff] }
 0x21d   :  { %823 = vmatpush1.msra.mxu0 %v2640_v8  ;;  %900 = vmatpush1.msra.mxu1 %v2715_v21  ;;  %v4340_v8 = vld [vmem:[#allocation20_spill] sm:$0xff]  ;;  %v4352_v21 = vld [vmem:[#allocation29_spill] sm:$0xff] }
 0x21e   :  { %824 = vmatprep.subr.mxu0 %v2651_v10  ;;  %901 = vmatprep.subr.mxu1 %v2727_v23  ;;  %v4341_v10 = vld [vmem:[#allocation12_spill] sm:$0xff]  ;;  %v4354_v23 = vld [vmem:[#allocation30_spill] sm:$0xff] }
 0x21f   :  { %825 = vmatpush1.msra.mxu0 %v2663_v12  ;;  %902 = vmatpush1.msra.mxu1 %v2739_v25  ;;  %v4343_v12 = vld [vmem:[#allocation13_spill] sm:$0xff]  ;;  %v4356_v25 = vld [vmem:[#allocation31_spill] sm:$0xff] }
 0x220   :  { %826 = vmatprep.subr.mxu0 %v2680_v15  ;;  %903 = vmatprep.subr.mxu1 %v2751_v27  ;;  %v4346_v15 = vld [vmem:[#allocation26_spill] sm:$0xff]  ;;  %v3287_v27 = vld [vmem:[%s4162_s2 + $0x1f8] sm:$0xff] }
 0x221   :  { %827 = vmatpush1.msra.mxu0 %v2692_v17  ;;  %904 = vmatpush1.msra.mxu1 %v2763_v29  ;;  %v4348_v17 = vld [vmem:[#allocation27_spill] sm:$0xff]  ;;  %4358 = vst [vmem:[#allocation8_spill] sm:$0xff] %v3287_v27  ;;  %v2078_v29 = vld [vmem:[%s4160_s0 + $0x88] sm:$0xff] }
 0x222   :  { %828 = vmatprep.subr.mxu0 %v2709_v20  ;;  %905 = vmatprep.subr.mxu1 %v2775_v31  ;;  %v4351_v20 = vld [vmem:[#allocation21_spill] sm:$0xff] }
 0x223   :  { %829 = vmatpush1.msra.mxu0 %v2721_v22  ;;  %906 = vmatpush1.msra.mxu1 %v2787_v33  ;;  %v4353_v22 = vld [vmem:[#allocation23_spill] sm:$0xff]  ;;  %v2081_v31 = vld [vmem:[%s4160_s0 + $0xa0] sm:$0xff] }
 0x224   :  { %830 = vmatprep.subr.mxu0 %v2733_v24  ;;  %907 = vmatprep.subr.mxu1 %v2799_v35  ;;  %v4355_v24 = vld [vmem:[#allocation25_spill] sm:$0xff]  ;;  %v2082_v35 = vld [vmem:[%s4160_s0 + $0xa8] sm:$0xff] }
 0x225   :  { %831 = vmatpush1.msra.mxu0 %v2745_v26  ;;  %908 = vmatpush1.msra.mxu1 %v2811_v37  ;;  %v3281_v26 = vld [vmem:[%s4162_s2 + $0x1e8] sm:$0xff] }
 0x226   :  { %832 = vmatprep.subr.mxu0 %v2757_v28  ;;  %909 = vmatprep.subr.mxu1 %v2823_v39  ;;  %4357 = vst [vmem:[#allocation7_spill] sm:$0xff] %v3281_v26  ;;  %v2077_v28 = vld [vmem:[%s4160_s0 + $0x80] sm:$0xff]  ;;  %v585_v39 = vadd.f32 %v2081_v31, %v4332_v49 }
 0x227   :  { %833 = vmatpush1.msra.mxu0 %v2769_v30  ;;  %910 = vmatpush1.msra.mxu1 %v2835_v41  ;;  %v581_v30 = vadd.f32 %v2077_v28, %v4332_v49 }
 0x228   :  { %834 = vmatprep.subr.mxu0 %v2781_v32  ;;  %911 = vmatprep.subr.mxu1 %v2847_v43  ;;  %v4359_v32 = vld [vmem:[#allocation33_spill] sm:$0xff] }
 0x229   :  { %835 = vmatpush1.msra.mxu0 %v2793_v34  ;;  %912 = vmatpush1.msra.mxu1 %v2859_v45  ;;  %v582_v33 = vadd.f32 %v2078_v29, %v4359_v32  ;;  %v586_v52 = vadd.f32 %v2082_v35, %v4359_v32 }
 0x22a   :  { %836 = vmatprep.subr.mxu0 %v2805_v36  ;;  %913 = vmatprep.subr.mxu1 %v4334_v1 }
 0x22b   :  { %837 = vmatpush1.msra.mxu0 %v4335_v2  ;;  %914 = vmatpush1.msra.mxu1 %v4336_v3 }
 0x22c   :  { %838 = vmatprep.subr.mxu0 %v4337_v5  ;;  %915 = vmatprep.subr.mxu1 %v4338_v6  ;;  %v587_v6 = vadd.f32 %v2083_v4, %v3083_v63  ;;  %v3455_v4 = vld [vmem:[%s4162_s2 + $0x140] sm:$0xff] }
 0x22d   :  { %839 = vmatpush1.msra.mxu0 %v4339_v7  ;;  %916 = vmatpush1.msra.mxu1 %v4340_v8 }
 0x22e   :  { %840 = vmatprep.subr.mxu0 %v4341_v10  ;;  %917 = vmatprep.subr.mxu1 %v4342_v11 }
 0x22f   :  { %841 = vmatpush1.msra.mxu0 %v4343_v12  ;;  %918 = vmatpush1.msra.mxu1 %v4344_v13 }
 0x230   :  { %842 = vmatprep.subr.mxu0 %v4345_v14  ;;  %919 = vmatprep.subr.mxu1 %v4346_v15 }
 0x231   :  { %843 = vmatpush1.msra.mxu0 %v4347_v16  ;;  %920 = vmatpush1.msra.mxu1 %v4348_v17 }
 0x232   :  { %844 = vmatprep.subr.mxu0 %v4349_v18  ;;  %921 = vmatprep.subr.mxu1 %v4350_v19 }
 0x233   :  { %845 = vmatpush1.msra.mxu0 %v4351_v20  ;;  %922 = vmatpush1.msra.mxu1 %v4352_v21 }
 0x234   :  { %846 = vmatprep.subr.mxu0 %v4353_v22  ;;  %923 = vmatprep.subr.mxu1 %v4354_v23 }
 0x235   :  { %847 = vmatpush1.msra.mxu0 %v4355_v24  ;;  %880 = vmatprep.mubr.f32.mxu0 %v4304_v48 }
 0x236   :  { %924 = vmatpush1.msra.mxu1 %v4356_v25  ;;  %957 = vmatprep.mubr.f32.mxu1 %v4304_v48 }
 0x237   :  { %1043 = vmatprep.subr.mxu0 %v3281_v26  ;;  %1120 = vmatprep.subr.mxu1 %v3287_v27 }
 0x2d4   :  { %v655_v34 = vpop.f32.mrf.mxu0  ;;  %v732_v37 = vpop.f32.mrf.mxu1 }
 0x2d5   :  { %v743_v36 = vadd.f32 %v655_v34, %v581_v30  ;;  %v745_v5 = vadd.f32 %v732_v37, %v583_v46  ;;  %v3449_v46 = vld [vmem:[%s4162_s2 + $0x158] sm:$0xff] }
 0x2d6   :  { %v657_v41 = vpop.f32.mrf.mxu0  ;;  %v734_v40 = vpop.f32.mrf.mxu1 }
 0x2d7   :  { %v2085_v43 = vmul.f32 -1.442695, %v743_v36  ;;  %v744_v45 = vadd.f32 %v657_v41, %v582_v33  ;;  %v746_v59 = vadd.f32 %v734_v40, %v584_v61  ;;  %v3371_v40 = vld [vmem:[%s4162_s2 + $0x1a8] sm:$0xff]  ;;  %v3401_v61 = vld [vmem:[%s4162_s2 + $0x198] sm:$0xff] }
 0x2d8   :  { %v661_v56 = vpop.f32.mrf.mxu0  ;;  %v738_v0 = vpop.f32.mrf.mxu1 }
 0x2d9   :  { %2283 = vpow2.f32 %v2085_v43  ;;  %v2087_v44 = vmul.f32 -1.442695, %v744_v45  ;;  %v747_v60 = vadd.f32 %v661_v56, %v585_v39  ;;  %v2089_v1 = vmul.f32 -1.442695, %v746_v59  ;;  %v3341_v45 = vld [vmem:[%s4162_s2 + $0x1f0] sm:$0xff]  ;;  %v3353_v56 = vld [vmem:[%s4162_s2 + $0x1d8] sm:$0xff] }
 0x2da   :  { %v663_v42 = vpop.f32.mrf.mxu0  ;;  %v740_v57 = vpop.f32.mrf.mxu1  ;;  %v749_v13 = vadd.f32 %v738_v0, %v587_v6  ;;  %v3407_v0 = vld [vmem:[%s4162_s2 + $0x180] sm:$0xff]  ;;  %v3485_v6 = vld [vmem:[%s4162_s2 + $0x130] sm:$0xff] }
 0x2db   :  { %2285 = vpow2.f32 %v2087_v44  ;;  %v2086_v54 = vmul.f32 -1.442695, %v747_v60  ;;  %v748_v55 = vadd.f32 %v663_v42, %v586_v52  ;;  %v750_v2 = vadd.f32 %v740_v57, %v588_v9  ;;  %v3347_v52 = vld [vmem:[%s4162_s2 + $0x1c8] sm:$0xff]  ;;  %v3359_v44 = vld [vmem:[%s4162_s2 + $0x1c0] sm:$0xff]  ;;  %v3377_v60 = vld [vmem:[%s4162_s2 + $0x1b8] sm:$0xff] }
 0x2dc   :  { %v3383_v42 = vld [vmem:[%s4162_s2 + $0x1a0] sm:$0xff]  ;;  %v3437_v9 = vld [vmem:[%s4162_s2 + $0x170] sm:$0xff]  ;;  %v3443_v57 = vld [vmem:[%s4162_s2 + $0x148] sm:$0xff] }
 0x2dd   :  { %2287 = vpow2.f32 %v2086_v54  ;;  %v2088_v51 = vmul.f32 -1.442695, %v748_v55  ;;  %v2090_v10 = vmul.f32 -1.442695, %v750_v2  ;;  %v3389_v54 = vld [vmem:[%s4162_s2 + $0x1b0] sm:$0xff]  ;;  %v3395_v55 = vld [vmem:[%s4162_s2 + $0x188] sm:$0xff] }
 0x2de   :  { %v3431_v59 = vld [vmem:[%s4162_s2 + $0x160] sm:$0xff]  ;;  %v3467_v2 = vld [vmem:[%s4162_s2 + $0x128] sm:$0xff] }
 0x2df   :  { %2289 = vpow2.f32 %v2088_v51  ;;  %v3413_v51 = vld [vmem:[%s4162_s2 + $0x190] sm:$0xff] }
 0x2e0   :  { %2291 = vpow2.f32 %v2089_v1  ;;  %v3461_v1 = vld [vmem:[%s4162_s2 + $0x150] sm:$0xff] }
 0x2e6   :  { %v2284_v3 = vpop.eup %2283 }
 0x2e7   :  { %v757_v7 = vadd.f32 1.0, %v2284_v3  ;;  %v3473_v3 = vld [vmem:[%s4162_s2 + $0x138] sm:$0xff] }
 0x2e8   :  { %v2286_v8 = vpop.eup %2285 }
 0x2e9   :  { %2293 = vrcp.f32 %v757_v7  ;;  %v769_v11 = vadd.f32 1.0, %v2286_v8  ;;  %v3491_v7 = vld [vmem:[%s4162_s2 + $0x108] sm:$0xff]  ;;  %v3497_v8 = vld [vmem:[%s4162_s2 + $0x118] sm:$0xff] }
 0x2ea   :  { %v2288_v12 = vpop.eup %2287  ;;  %2295 = vtanh.f32 %v745_v5  ;;  %v3479_v5 = vld [vmem:[%s4162_s2 + $0x120] sm:$0xff] }
 0x2eb   :  { %2297 = vrcp.f32 %v769_v11  ;;  %v758_v14 = vadd.f32 1.0, %v2288_v12  ;;  %v3509_v11 = vld [vmem:[%s4162_s2 + $0x110] sm:$0xff]  ;;  %v3515_v12 = vld [vmem:[%s4162_s2 + $0xe8] sm:$0xff] }
 0x2ec   :  { %v2290_v15 = vpop.eup %2289  ;;  %2299 = vpow2.f32 %v2090_v10  ;;  %v3503_v10 = vld [vmem:[%s4162_s2 + $0x100] sm:$0xff] }
 0x2ed   :  { %2301 = vrcp.f32 %v758_v14  ;;  %v770_v16 = vadd.f32 1.0, %v2290_v15  ;;  %v2292_v17 = vpop.eup %2291  ;;  %v3527_v14 = vld [vmem:[%s4162_s2 + $0xe0] sm:$0xff]  ;;  %v3533_v15 = vld [vmem:[%s4162_s2 + $0xf0] sm:$0xff] }
 0x2ee   :  { %2303 = vtanh.f32 %v749_v13  ;;  %v783_v21 = vadd.f32 1.0, %v2292_v17  ;;  %v3521_v13 = vld [vmem:[%s4162_s2 + $0xf8] sm:$0xff] }
 0x2ef   :  { %2305 = vrcp.f32 %v770_v16  ;;  %v3539_v16 = vld [vmem:[%s4162_s2 + $0xc8] sm:$0xff]  ;;  %v3545_v17 = vld [vmem:[%s4162_s2 + $0xd8] sm:$0xff] }
 0x2f0   :  { %2307 = vrcp.f32 %v783_v21  ;;  %v3569_v21 = vld [vmem:[%s4162_s2 + $0xb8] sm:$0xff] }
 0x2f1   :  { %4361 = vst [vmem:[#allocation32_spill] sm:$0xff] %v3569_v21 }
 0x2f6   :  { %v2294_v18 = vpop.eup %2293 }
 0x2f7   :  { %v2296_v19 = vpop.eup %2295 }
 0x2f8   :  { %v2298_v20 = vpop.eup %2297  ;;  %v791_v23 = vmul.f32 %v2296_v19, %v2294_v18  ;;  %v3551_v18 = vld [vmem:[%s4162_s2 + $0xc0] sm:$0xff]  ;;  %v3557_v19 = vld [vmem:[%s4162_s2 + $0xd0] sm:$0xff] }
 0x2f9   :  { %v2300_v22 = vpop.eup %2299  ;;  %v789_v24 = vmul.f32 %v2298_v20, %v3205_v50  ;;  %v3563_v20 = vld [vmem:[%s4162_s2 + $0xa8] sm:$0xff] }
 0x2fa   :  { %v2302_v25 = vpop.eup %2301  ;;  %v784_v31 = vadd.f32 1.0, %v2300_v22  ;;  %v3575_v22 = vld [vmem:[%s4162_s2 + $0xa0] sm:$0xff] }
 0x2fb   :  { %v2304_v28 = vpop.eup %2303  ;;  %v3323_v29 = vadd.f32 %v791_v23, %v789_v24  ;;  %4362 = vst [vmem:[#allocation14_spill] sm:$0xff] %v3575_v22  ;;  %v3581_v23 = vld [vmem:[%s4162_s2 + $0xb0] sm:$0xff]  ;;  %v3587_v24 = vld [vmem:[%s4162_s2 + $0x88] sm:$0xff] }
 0x2fc   :  { %v2306_v30 = vpop.eup %2305  ;;  %v792_v33 = vmul.f32 %v2304_v28, %v2302_v25  ;;  %4363 = vst [vmem:[#allocation9_spill] sm:$0xff] %v3581_v23  ;;  %4364 = vst [vmem:[#allocation16_spill] sm:$0xff] %v3587_v24  ;;  %v3593_v25 = vld [vmem:[%s4162_s2 + $0x98] sm:$0xff]  ;;  %v3599_v28 = vld [vmem:[%s4162_s2 + $0x80] sm:$0xff] }
 0x2fd   :  { %2309 = vtanh.f32 %v3323_v29  ;;  %v790_v34 = vmul.f32 %v2306_v30, %v3209_v53  ;;  %v2308_v36 = vpop.eup %2307  ;;  %v3335_v53 = vld [vmem:[%s4162_s2 + $0x1e0] sm:$0xff]  ;;  %4365 = vst [vmem:[#allocation10_spill] sm:$0xff] %v3593_v25  ;;  %4366 = vst [vmem:[#allocation18_spill] sm:$0xff] %v3599_v28  ;;  %v3605_v30 = vld [vmem:[%s4162_s2 + $0x90] sm:$0xff] }
 0x2fe   :  { %2311 = vrcp.f32 %v784_v31  ;;  %4367 = vst [vmem:[#allocation11_spill] sm:$0xff] %v3605_v30  ;;  %v3611_v31 = vld [vmem:[%s4162_s2 + $0x68] sm:$0xff] }
 0x2ff   :  { %v3327_v35 = vadd.f32 %v792_v33, %v790_v34  ;;  %4368 = vst [vmem:[#allocation20_spill] sm:$0xff] %v3611_v31  ;;  %v3617_v33 = vld [vmem:[%s4162_s2 + $0x78] sm:$0xff]  ;;  %v3623_v34 = vld [vmem:[%s4162_s2 + $0x60] sm:$0xff] }
 0x300   :  { %4369 = vst [vmem:[#allocation12_spill] sm:$0xff] %v3617_v33  ;;  %4370 = vst [vmem:[#allocation22_spill] sm:$0xff] %v3623_v34 }
 0x301   :  { %2313 = vtanh.f32 %v3327_v35 }
 0x30a   :  { %v2310_v37 = vpop.eup %2309 }
 0x30b   :  { %v797_v50 = vmul.f32 %v2310_v37, %v2308_v36  ;;  %v2312_v39 = vpop.eup %2311  ;;  %v3629_v36 = vld [vmem:[%s4162_s2 + $0x70] sm:$0xff]  ;;  %v3635_v37 = vld [vmem:[%s4162_s2 + $0x48] sm:$0xff] }
 0x30c   :  { %4371 = vst [vmem:[#allocation13_spill] sm:$0xff] %v3629_v36  ;;  %4372 = vst [vmem:[#allocation24_spill] sm:$0xff] %v3635_v37 }
 0x30d   :  { %881 = vmatmul.mubr.f32.vlgmr.msra.gmra.mxu0 %v797_v50  ;;  %958 = vmatmul.mubr.f32.vlgmr.msra.gmra.mxu1 %v797_v50  ;;  %v3641_v50 = vld [vmem:[%s4162_s2 + $0x58] sm:$0xff] }
 0x30e   :  { %v2314_v41 = vpop.eup %2313  ;;  %886 = vmatprep.mubr.f32.mxu0 %v4304_v48  ;;  %963 = vmatprep.mubr.f32.mxu1 %v4304_v48  ;;  %4373 = vst [vmem:[#allocation15_spill] sm:$0xff] %v3641_v50 }
 0x30f   :  { %v798_v43 = vmul.f32 %v2314_v41, %v2312_v39  ;;  %1044 = vmatpush1.msra.mxu0 %v3335_v53  ;;  %1121 = vmatpush1.msra.mxu1 %v3341_v45  ;;  %v3647_v39 = vld [vmem:[%s4162_s2 + $0x40] sm:$0xff]  ;;  %v3653_v41 = vld [vmem:[%s4162_s2 + $0x50] sm:$0xff] }
 0x310   :  { %1045 = vmatprep.subr.mxu0 %v3347_v52  ;;  %1122 = vmatprep.subr.mxu1 %v3353_v56  ;;  %4374 = vst [vmem:[#allocation26_spill] sm:$0xff] %v3647_v39  ;;  %4375 = vst [vmem:[#allocation17_spill] sm:$0xff] %v3653_v41 }
 0x311   :  { %887 = vmatmul.mubr.f32.gmra.mxu0 %v798_v43  ;;  %964 = vmatmul.mubr.f32.gmra.mxu1 %v798_v43  ;;  %v3659_v43 = vld [vmem:[%s4162_s2 + $0x28] sm:$0xff] }
 0x312   :  { %1046 = vmatpush1.msra.mxu0 %v3359_v44  ;;  %1123 = vmatpush1.msra.mxu1 %v3365_v47  ;;  %4376 = vst [vmem:[#allocation27_spill] sm:$0xff] %v3659_v43 }
 0x313   :  { %1047 = vmatprep.subr.mxu0 %v3371_v40  ;;  %1124 = vmatprep.subr.mxu1 %v3377_v60 }
 0x314   :  { %1048 = vmatpush1.msra.mxu0 %v3383_v42  ;;  %1125 = vmatpush1.msra.mxu1 %v3389_v54 }
 0x315   :  { %1049 = vmatprep.subr.mxu0 %v3395_v55  ;;  %1126 = vmatprep.subr.mxu1 %v3401_v61 }
 0x316   :  { %1050 = vmatpush1.msra.mxu0 %v3407_v0  ;;  %1127 = vmatpush1.msra.mxu1 %v3413_v51 }
 0x317   :  { %1051 = vmatprep.subr.mxu0 %v3419_v38  ;;  %1128 = vmatprep.subr.mxu1 %v3425_v62 }
 0x318   :  { %1052 = vmatpush1.msra.mxu0 %v3431_v59  ;;  %1129 = vmatpush1.msra.mxu1 %v3437_v9 }
 0x319   :  { %1053 = vmatprep.subr.mxu0 %v3443_v57  ;;  %1130 = vmatprep.subr.mxu1 %v3449_v46 }
 0x31a   :  { %1054 = vmatpush1.msra.mxu0 %v3455_v4  ;;  %1131 = vmatpush1.msra.mxu1 %v3461_v1 }
 0x31b   :  { %1055 = vmatprep.subr.mxu0 %v3467_v2  ;;  %1132 = vmatprep.subr.mxu1 %v3473_v3 }
 0x31c   :  { %1056 = vmatpush1.msra.mxu0 %v3479_v5  ;;  %1133 = vmatpush1.msra.mxu1 %v3485_v6 }
 0x31d   :  { %1057 = vmatprep.subr.mxu0 %v3491_v7  ;;  %1134 = vmatprep.subr.mxu1 %v3497_v8 }
 0x31e   :  { %1058 = vmatpush1.msra.mxu0 %v3503_v10  ;;  %1135 = vmatpush1.msra.mxu1 %v3509_v11 }
 0x31f   :  { %1059 = vmatprep.subr.mxu0 %v3515_v12  ;;  %1136 = vmatprep.subr.mxu1 %v3521_v13 }
 0x320   :  { %1060 = vmatpush1.msra.mxu0 %v3527_v14  ;;  %1137 = vmatpush1.msra.mxu1 %v3533_v15 }
 0x321   :  { %1061 = vmatprep.subr.mxu0 %v3539_v16  ;;  %1138 = vmatprep.subr.mxu1 %v3545_v17 }
 0x322   :  { %1062 = vmatpush1.msra.mxu0 %v3551_v18  ;;  %1139 = vmatpush1.msra.mxu1 %v3557_v19 }
 0x323   :  { %1063 = vmatprep.subr.mxu0 %v3563_v20  ;;  %1140 = vmatprep.subr.mxu1 %v3569_v21 }
 0x324   :  { %1064 = vmatpush1.msra.mxu0 %v3575_v22  ;;  %1141 = vmatpush1.msra.mxu1 %v3581_v23 }
 0x325   :  { %1065 = vmatprep.subr.mxu0 %v3587_v24  ;;  %1142 = vmatprep.subr.mxu1 %v3593_v25 }
 0x326   :  { %1066 = vmatpush1.msra.mxu0 %v3599_v28  ;;  %1143 = vmatpush1.msra.mxu1 %v3605_v30 }
 0x327   :  { %1067 = vmatprep.subr.mxu0 %v3611_v31  ;;  %1144 = vmatprep.subr.mxu1 %v3617_v33 }
 0x328   :  { %1068 = vmatpush1.msra.mxu0 %v3623_v34  ;;  %1145 = vmatpush1.msra.mxu1 %v3629_v36 }
 0x329   :  { %1069 = vmatprep.subr.mxu0 %v3635_v37  ;;  %1146 = vmatprep.subr.mxu1 %v3641_v50  ;;  %v3665_v50 = vld [vmem:[%s4162_s2 + $0x38] sm:$0xff] }
 0x32a   :  { %1070 = vmatpush1.msra.mxu0 %v3647_v39  ;;  %1147 = vmatpush1.msra.mxu1 %v3653_v41  ;;  %4377 = vst [vmem:[#allocation19_spill] sm:$0xff] %v3665_v50  ;;  %v3671_v39 = vld [vmem:[%s4162_s2 + $0x20] sm:$0xff]  ;;  %v3677_v41 = vld [vmem:[%s4162_s2 + $0x30] sm:$0xff] }
 0x32b   :  { %1071 = vmatprep.subr.mxu0 %v3659_v43  ;;  %1148 = vmatprep.subr.mxu1 %v3665_v50  ;;  %4378 = vst [vmem:[#allocation28_spill] sm:$0xff] %v3671_v39  ;;  %4379 = vst [vmem:[#allocation21_spill] sm:$0xff] %v3677_v41  ;;  %v3683_v43 = vld [vmem:[%s4162_s2 + $0x8] sm:$0xff]  ;;  %v3689_v50 = vld [vmem:[%s4162_s2 + $0x18] sm:$0xff] }
 0x32c   :  { %1072 = vmatpush1.msra.mxu0 %v3671_v39  ;;  %1149 = vmatpush1.msra.mxu1 %v3677_v41  ;;  %4380 = vst [vmem:[#allocation29_spill] sm:$0xff] %v3683_v43  ;;  %4381 = vst [vmem:[#allocation23_spill] sm:$0xff] %v3689_v50  ;;  %v3695_v39 = vld [vmem:[%s4162_s2] sm:$0xff] }
 0x32d   :  { %1073 = vmatprep.subr.mxu0 %v3683_v43  ;;  %1150 = vmatprep.subr.mxu1 %v3689_v50  ;;  %4382 = vst [vmem:[#allocation30_spill] sm:$0xff] %v3695_v39  ;;  %v3702_v43 = vld [vmem:[%s4162_s2 + $0x10] sm:$0xff]  ;;  %v2091_v50 = vld [vmem:[%s4160_s0 + $0xc0] sm:$0xff]  ;;  %s2562_s2 = smov [#allocation4]  }
 0x32e   :  { %1074 = vmatpush1.msra.mxu0 %v3695_v39  ;;  %1107 = vmatprep.mubr.f32.mxu0 %v4304_v48  ;;  %4383 = vst [vmem:[#allocation25_spill] sm:$0xff] %v3702_v43  ;;  %v2092_v39 = vld [vmem:[%s4160_s0 + $0xc8] sm:$0xff]  ;;  %v808_v41 = vadd.f32 %v2091_v50, %v4332_v49  ;;  %s2046_s21 = sshll.u32 %s2562_s2, 4  ;;  %s2047_s21 = int_to_ptr.vmem [resolvable:$true] %s2046_s21 }
 0x32f   :  { %1151 = vmatpush1.msra.mxu1 %v3702_v43  ;;  %1184 = vmatprep.mubr.f32.mxu1 %v4304_v48  ;;  %v2095_v43 = vld [vmem:[%s4160_s0 + $0xe0] sm:$0xff]  ;;  %v809_v37 = vadd.f32 %v2092_v39, %v4359_v32  ;;  %v2094_v39 = vld [vmem:[%s4160_s0 + $0xd8] sm:$0xff]  ;;  %s2539_s22 = scalar_lea.vmem %s2047_s21, 256  ;;  %p2544_p1 = scmp.lt.s32.totalorder %s2047_s21, %s2047_s21 }
 0x330   :  { %1270 = vmatprep.subr.mxu0 %v3281_v26  ;;  %1347 = vmatprep.subr.mxu1 %v3287_v27  ;;  %v2096_v27 = vld [vmem:[%s4160_s0 + $0xe8] sm:$0xff]  ;;  %v812_v33 = vadd.f32 %v2095_v43, %v4332_v49  ;;  %v811_v43 = vadd.f32 %v2094_v39, %v4360_v58  ;;  %p2540_p0 = scmp.ne.s32.totalorder %s2047_s21, %s2539_s22  ;;  %p2545_p2 = scmp.lt.s32.totalorder %s2539_s22, %s2539_s22 }
 0x331   :  { %v813_v50 = vadd.f32 %v2096_v27, %v4359_v32  ;;  %v2098_v27 = vld [vmem:[%s4160_s0 + $0xf8] sm:$0xff] }
 0x332   :  { %p2546_p3 = por %p2545_p2, %p2544_p1 }
 0x334   :  { %p2547_p4 = pnand %p2546_p3, %p2540_p0 }
 0x3cd   :  { %v882_v36 = vpop.f32.mrf.mxu0  ;;  %v959_v34 = vpop.f32.mrf.mxu1 }
 0x3ce   :  { %v970_v26 = vadd.f32 %v882_v36, %v808_v41 }
 0x3cf   :  { %v884_v31 = vpop.f32.mrf.mxu0  ;;  %v961_v23 = vpop.f32.mrf.mxu1 }
 0x3d0   :  { %v2099_v30 = vmul.f32 -1.442695, %v970_v26  ;;  %v971_v28 = vadd.f32 %v884_v31, %v809_v37 }
 0x3d1   :  { %v888_v25 = vpop.f32.mrf.mxu0  ;;  %v965_v26 = vpop.f32.mrf.mxu1 }
 0x3d2   :  { %2315 = vpow2.f32 %v2099_v30  ;;  %v2101_v24 = vmul.f32 -1.442695, %v971_v28  ;;  %v974_v22 = vadd.f32 %v888_v25, %v812_v33  ;;  %v2093_v28 = vld [vmem:[%s4160_s0 + $0xd0] sm:$0xff]  ;;  %v973_v30 = vadd.f32 %v961_v23, %v811_v43 }
 0x3d3   :  { %v890_v21 = vpop.f32.mrf.mxu0  ;;  %v815_v25 = vadd.f32 %v2098_v27, %v4360_v58 }
 0x3d4   :  { %2317 = vpow2.f32 %v2101_v24  ;;  %v2100_v36 = vmul.f32 -1.442695, %v974_v22  ;;  %v975_v41 = vadd.f32 %v890_v21, %v813_v50  ;;  %v967_v24 = vpop.f32.mrf.mxu1  ;;  %v810_v21 = vadd.f32 %v2093_v28, %v3083_v63  ;;  %v2097_v22 = vld [vmem:[%s4160_s0 + $0xf0] sm:$0xff] }
 0x3d5   :  { %v2103_v33 = vmul.f32 -1.442695, %v973_v30  ;;  %v977_v37 = vadd.f32 %v967_v24, %v815_v25 }
 0x3d6   :  { %2319 = vpow2.f32 %v2100_v36  ;;  %v2102_v31 = vmul.f32 -1.442695, %v975_v41  ;;  %v972_v39 = vadd.f32 %v959_v34, %v810_v21  ;;  %v814_v36 = vadd.f32 %v2097_v22, %v3083_v63 }
 0x3d8   :  { %2321 = vpow2.f32 %v2102_v31  ;;  %v2104_v31 = vmul.f32 -1.442695, %v977_v37  ;;  %v976_v27 = vadd.f32 %v965_v26, %v814_v36 }
 0x3d9   :  { %2323 = vpow2.f32 %v2103_v33 }
 0x3df   :  { %v2316_v50 = vpop.eup %2315 }
 0x3e0   :  { %v984_v41 = vadd.f32 1.0, %v2316_v50 }
 0x3e1   :  { %v2318_v32 = vpop.eup %2317 }
 0x3e2   :  { %2325 = vrcp.f32 %v984_v41  ;;  %v996_v23 = vadd.f32 1.0, %v2318_v32 }
 0x3e3   :  { %v2320_v43 = vpop.eup %2319  ;;  %2327 = vtanh.f32 %v972_v39 }
 0x3e4   :  { %2329 = vrcp.f32 %v996_v23  ;;  %v985_v28 = vadd.f32 1.0, %v2320_v43 }
 0x3e5   :  { %v2322_v58 = vpop.eup %2321  ;;  %2331 = vpow2.f32 %v2104_v31 }
 0x3e6   :  { %2333 = vrcp.f32 %v985_v28  ;;  %v997_v30 = vadd.f32 1.0, %v2322_v58  ;;  %v2324_v34 = vpop.eup %2323 }
 0x3e7   :  { %2335 = vtanh.f32 %v976_v27  ;;  %v1010_v22 = vadd.f32 1.0, %v2324_v34 }
 0x3e8   :  { %2337 = vrcp.f32 %v997_v30 }
 0x3e9   :  { %2339 = vrcp.f32 %v1010_v22  ;;  %v4388_v22 = vld [vmem:[#allocation10_spill] sm:$0xff] }
 0x3ef   :  { %v2326_v25 = vpop.eup %2325 }
 0x3f0   :  { %v2328_v24 = vpop.eup %2327 }
 0x3f1   :  { %v2330_v21 = vpop.eup %2329  ;;  %v1018_v37 = vmul.f32 %v2328_v24, %v2326_v25  ;;  %v4385_v25 = vld [vmem:[#allocation14_spill] sm:$0xff]  ;;  %v4386_v24 = vld [vmem:[#allocation9_spill] sm:$0xff] }
 0x3f2   :  { %v2332_v33 = vpop.eup %2331  ;;  %v1016_v32 = vmul.f32 %v2330_v21, %v3323_v29  ;;  %v4387_v21 = vld [vmem:[#allocation16_spill] sm:$0xff] }
 0x3f3   :  { %v2334_v50 = vpop.eup %2333  ;;  %v1011_v41 = vadd.f32 1.0, %v2332_v33  ;;  %v4389_v33 = vld [vmem:[#allocation18_spill] sm:$0xff] }
 0x3f4   :  { %v2336_v39 = vpop.eup %2335  ;;  %v3741_v26 = vadd.f32 %v1018_v37, %v1016_v32  ;;  %v4390_v37 = vld [vmem:[#allocation11_spill] sm:$0xff]  ;;  %v4391_v32 = vld [vmem:[#allocation20_spill] sm:$0xff] }
 0x3f5   :  { %v2338_v36 = vpop.eup %2337  ;;  %v1019_v58 = vmul.f32 %v2336_v39, %v2334_v50  ;;  %v4392_v50 = vld [vmem:[#allocation12_spill] sm:$0xff]  ;;  %v4393_v39 = vld [vmem:[#allocation22_spill] sm:$0xff] }
 0x3f6   :  { %2341 = vtanh.f32 %v3741_v26  ;;  %v1017_v31 = vmul.f32 %v2338_v36, %v3327_v35  ;;  %v2340_v43 = vpop.eup %2339  ;;  %v4384_v35 = vld [vmem:[#allocation32_spill] sm:$0xff]  ;;  %v4394_v36 = vld [vmem:[#allocation13_spill] sm:$0xff] }
 0x3f7   :  { %2343 = vrcp.f32 %v1011_v41  ;;  %v4395_v41 = vld [vmem:[#allocation24_spill] sm:$0xff] }
 0x3f8   :  { %v3745_v23 = vadd.f32 %v1019_v58, %v1017_v31  ;;  %v4396_v58 = vld [vmem:[#allocation15_spill] sm:$0xff]  ;;  %v4397_v31 = vld [vmem:[#allocation26_spill] sm:$0xff] }
 0x3fa   :  { %2345 = vtanh.f32 %v3745_v23 }
 0x403   :  { %v2342_v27 = vpop.eup %2341 }
 0x404   :  { %v1024_v29 = vmul.f32 %v2342_v27, %v2340_v43  ;;  %v2344_v28 = vpop.eup %2343  ;;  %v4398_v43 = vld [vmem:[#allocation17_spill] sm:$0xff]  ;;  %v4399_v27 = vld [vmem:[#allocation27_spill] sm:$0xff] }
 0x406   :  { %1108 = vmatmul.mubr.f32.vlgmr.msra.gmra.mxu0 %v1024_v29  ;;  %1185 = vmatmul.mubr.f32.vlgmr.msra.gmra.mxu1 %v1024_v29  ;;  %v4400_v29 = vld [vmem:[#allocation19_spill] sm:$0xff] }
 0x407   :  { %v2346_v30 = vpop.eup %2345  ;;  %1113 = vmatprep.mubr.f32.mxu0 %v4304_v48  ;;  %1190 = vmatprep.mubr.f32.mxu1 %v4304_v48 }
 0x408   :  { %v1025_v34 = vmul.f32 %v2346_v30, %v2344_v28  ;;  %1271 = vmatpush1.msra.mxu0 %v3335_v53  ;;  %1348 = vmatpush1.msra.mxu1 %v3341_v45  ;;  %v4401_v28 = vld [vmem:[#allocation28_spill] sm:$0xff]  ;;  %v4402_v30 = vld [vmem:[#allocation21_spill] sm:$0xff] }
 0x409   :  { %1272 = vmatprep.subr.mxu0 %v3347_v52  ;;  %1349 = vmatprep.subr.mxu1 %v3353_v56 }
 0x40a   :  { %1114 = vmatmul.mubr.f32.gmra.mxu0 %v1025_v34  ;;  %1191 = vmatmul.mubr.f32.gmra.mxu1 %v1025_v34  ;;  %v4403_v34 = vld [vmem:[#allocation29_spill] sm:$0xff] }
 0x40b   :  { %1273 = vmatpush1.msra.mxu0 %v3359_v44  ;;  %1350 = vmatpush1.msra.mxu1 %v3365_v47 }
 0x40c   :  { %1274 = vmatprep.subr.mxu0 %v3371_v40  ;;  %1351 = vmatprep.subr.mxu1 %v3377_v60 }
 0x40d   :  { %1275 = vmatpush1.msra.mxu0 %v3383_v42  ;;  %1352 = vmatpush1.msra.mxu1 %v3389_v54 }
 0x40e   :  { %1276 = vmatprep.subr.mxu0 %v3395_v55  ;;  %1353 = vmatprep.subr.mxu1 %v3401_v61 }
 0x40f   :  { %1277 = vmatpush1.msra.mxu0 %v3407_v0  ;;  %1354 = vmatpush1.msra.mxu1 %v3413_v51 }
 0x410   :  { %1278 = vmatprep.subr.mxu0 %v3419_v38  ;;  %1355 = vmatprep.subr.mxu1 %v3425_v62 }
 0x411   :  { %1279 = vmatpush1.msra.mxu0 %v3431_v59  ;;  %1356 = vmatpush1.msra.mxu1 %v3437_v9 }
 0x412   :  { %1280 = vmatprep.subr.mxu0 %v3443_v57  ;;  %1357 = vmatprep.subr.mxu1 %v3449_v46 }
 0x413   :  { %1281 = vmatpush1.msra.mxu0 %v3455_v4  ;;  %1358 = vmatpush1.msra.mxu1 %v3461_v1 }
 0x414   :  { %1282 = vmatprep.subr.mxu0 %v3467_v2  ;;  %1359 = vmatprep.subr.mxu1 %v3473_v3 }
 0x415   :  { %1283 = vmatpush1.msra.mxu0 %v3479_v5  ;;  %1360 = vmatpush1.msra.mxu1 %v3485_v6 }
 0x416   :  { %1284 = vmatprep.subr.mxu0 %v3491_v7  ;;  %1361 = vmatprep.subr.mxu1 %v3497_v8 }
 0x417   :  { %1285 = vmatpush1.msra.mxu0 %v3503_v10  ;;  %1362 = vmatpush1.msra.mxu1 %v3509_v11 }
 0x418   :  { %1286 = vmatprep.subr.mxu0 %v3515_v12  ;;  %1363 = vmatprep.subr.mxu1 %v3521_v13 }
 0x419   :  { %1287 = vmatpush1.msra.mxu0 %v3527_v14  ;;  %1364 = vmatpush1.msra.mxu1 %v3533_v15 }
 0x41a   :  { %1288 = vmatprep.subr.mxu0 %v3539_v16  ;;  %1365 = vmatprep.subr.mxu1 %v3545_v17 }
 0x41b   :  { %1289 = vmatpush1.msra.mxu0 %v3551_v18  ;;  %1366 = vmatpush1.msra.mxu1 %v3557_v19 }
 0x41c   :  { %1290 = vmatprep.subr.mxu0 %v3563_v20  ;;  %1367 = vmatprep.subr.mxu1 %v4384_v35  ;;  %v4410_v35 = vld [vmem:[#allocation34_spill] sm:$0xff] }
 0x41d   :  { %1291 = vmatpush1.msra.mxu0 %v4385_v25  ;;  %1368 = vmatpush1.msra.mxu1 %v4386_v24 }
 0x41e   :  { %1292 = vmatprep.subr.mxu0 %v4387_v21  ;;  %1369 = vmatprep.subr.mxu1 %v4388_v22 }
 0x41f   :  { %1293 = vmatpush1.msra.mxu0 %v4389_v33  ;;  %1370 = vmatpush1.msra.mxu1 %v4390_v37 }
 0x420   :  { %1294 = vmatprep.subr.mxu0 %v4391_v32  ;;  %1371 = vmatprep.subr.mxu1 %v4392_v50 }
 0x421   :  { %1295 = vmatpush1.msra.mxu0 %v4393_v39  ;;  %1372 = vmatpush1.msra.mxu1 %v4394_v36  ;;  %v4404_v39 = vld [vmem:[#allocation23_spill] sm:$0xff]  ;;  %v4405_v36 = vld [vmem:[#allocation30_spill] sm:$0xff] }
 0x422   :  { %1296 = vmatprep.subr.mxu0 %v4395_v41  ;;  %1373 = vmatprep.subr.mxu1 %v4396_v58  ;;  %v4406_v58 = vld [vmem:[#allocation25_spill] sm:$0xff] }
 0x423   :  { %1297 = vmatpush1.msra.mxu0 %v4397_v31  ;;  %1374 = vmatpush1.msra.mxu1 %v4398_v43  ;;  %v4407_v43 = vld [vmem:[#allocation7_spill] sm:$0xff] }
 0x424   :  { %1298 = vmatprep.subr.mxu0 %v4399_v27  ;;  %1375 = vmatprep.subr.mxu1 %v4400_v29  ;;  %v4408_v27 = vld [vmem:[#allocation8_spill] sm:$0xff] }
 0x425   :  { %1299 = vmatpush1.msra.mxu0 %v4401_v28  ;;  %1376 = vmatpush1.msra.mxu1 %v4402_v30  ;;  %v2105_v30 = vld [vmem:[%s4160_s0 + $0x100] sm:$0xff] }
 0x426   :  { %1300 = vmatprep.subr.mxu0 %v4403_v34  ;;  %1377 = vmatprep.subr.mxu1 %v4404_v39  ;;  %v2106_v39 = vld [vmem:[%s4160_s0 + $0x108] sm:$0xff]  ;;  %v4409_v34 = vld [vmem:[#allocation33_spill] sm:$0xff] }
 0x427   :  { %1301 = vmatpush1.msra.mxu0 %v4405_v36  ;;  %1334 = vmatprep.mubr.f32.mxu0 %v4304_v48  ;;  %v1035_v36 = vadd.f32 %v2105_v30, %v4332_v49  ;;  %v1036_v28 = vadd.f32 %v2106_v39, %v4409_v34  ;;  %v2108_v39 = vld [vmem:[%s4160_s0 + $0x118] sm:$0xff] }
 0x428   :  { %1378 = vmatpush1.msra.mxu1 %v4406_v58  ;;  %1411 = vmatprep.mubr.f32.mxu1 %v4304_v48  ;;  %v2109_v58 = vld [vmem:[%s4160_s0 + $0x120] sm:$0xff] }
 0x429   :  { %1497 = vmatprep.subr.mxu0 %v4407_v43  ;;  %1574 = vmatprep.subr.mxu1 %v4408_v27  ;;  %v2110_v27 = vld [vmem:[%s4160_s0 + $0x128] sm:$0xff]  ;;  %v1039_v41 = vadd.f32 %v2109_v58, %v4332_v49  ;;  %v1038_v58 = vadd.f32 %v2108_v39, %v4410_v35 }
 0x42a   :  { %v1040_v30 = vadd.f32 %v2110_v27, %v4409_v34 }
 0x4c6   :  { %v1109_v29 = vpop.f32.mrf.mxu0  ;;  %v1186_v31 = vpop.f32.mrf.mxu1 }
 0x4c7   :  { %v1197_v43 = vadd.f32 %v1109_v29, %v1035_v36 }
 0x4c8   :  { %v1111_v50 = vpop.f32.mrf.mxu0  ;;  %v1188_v21 = vpop.f32.mrf.mxu1 }
 0x4c9   :  { %v2113_v32 = vmul.f32 -1.442695, %v1197_v43  ;;  %v1198_v37 = vadd.f32 %v1111_v50, %v1036_v28  ;;  %v1200_v27 = vadd.f32 %v1188_v21, %v1038_v58 }
 0x4ca   :  { %v1115_v33 = vpop.f32.mrf.mxu0  ;;  %v1192_v43 = vpop.f32.mrf.mxu1 }
 0x4cb   :  { %2347 = vpow2.f32 %v2113_v32  ;;  %v2115_v22 = vmul.f32 -1.442695, %v1198_v37  ;;  %v1201_v24 = vadd.f32 %v1115_v33, %v1039_v41  ;;  %v2112_v32 = vld [vmem:[%s4160_s0 + $0x138] sm:$0xff]  ;;  %v2107_v37 = vld [vmem:[%s4160_s0 + $0x110] sm:$0xff]  ;;  %v2117_v41 = vmul.f32 -1.442695, %v1200_v27 }
 0x4cc   :  { %v1117_v25 = vpop.f32.mrf.mxu0  ;;  %v1042_v33 = vadd.f32 %v2112_v32, %v4410_v35 }
 0x4cd   :  { %2349 = vpow2.f32 %v2115_v22  ;;  %v2114_v36 = vmul.f32 -1.442695, %v1201_v24  ;;  %v1202_v29 = vadd.f32 %v1117_v25, %v1040_v30  ;;  %v1194_v22 = vpop.f32.mrf.mxu1  ;;  %v1037_v25 = vadd.f32 %v2107_v37, %v3083_v63  ;;  %v2111_v24 = vld [vmem:[%s4160_s0 + $0x130] sm:$0xff] }
 0x4ce   :  { %v1204_v28 = vadd.f32 %v1194_v22, %v1042_v33 }
 0x4cf   :  { %2351 = vpow2.f32 %v2114_v36  ;;  %v2116_v50 = vmul.f32 -1.442695, %v1202_v29  ;;  %v1199_v39 = vadd.f32 %v1186_v31, %v1037_v25  ;;  %v1041_v36 = vadd.f32 %v2111_v24, %v3083_v63 }
 0x4d1   :  { %2353 = vpow2.f32 %v2116_v50  ;;  %v2118_v50 = vmul.f32 -1.442695, %v1204_v28  ;;  %v1203_v32 = vadd.f32 %v1192_v43, %v1041_v36 }
 0x4d2   :  { %2355 = vpow2.f32 %v2117_v41 }
 0x4d8   :  { %v2348_v30 = vpop.eup %2347 }
 0x4d9   :  { %v1211_v29 = vadd.f32 1.0, %v2348_v30 }
 0x4da   :  { %v2350_v34 = vpop.eup %2349 }
 0x4db   :  { %2357 = vrcp.f32 %v1211_v29  ;;  %v1223_v21 = vadd.f32 1.0, %v2350_v34 }
 0x4dc   :  { %v2352_v58 = vpop.eup %2351  ;;  %2359 = vtanh.f32 %v1199_v39 }
 0x4dd   :  { %2361 = vrcp.f32 %v1223_v21  ;;  %v1212_v37 = vadd.f32 1.0, %v2352_v58 }
 0x4de   :  { %v2354_v35 = vpop.eup %2353  ;;  %2363 = vpow2.f32 %v2118_v50 }
 0x4df   :  { %2365 = vrcp.f32 %v1212_v37  ;;  %v1224_v27 = vadd.f32 1.0, %v2354_v35  ;;  %v2356_v31 = vpop.eup %2355 }
 0x4e0   :  { %2367 = vtanh.f32 %v1203_v32  ;;  %v1237_v24 = vadd.f32 1.0, %v2356_v31 }
 0x4e1   :  { %2369 = vrcp.f32 %v1224_v27 }
 0x4e2   :  { %2371 = vrcp.f32 %v1237_v24  ;;  %v4415_v24 = vld [vmem:[#allocation10_spill] sm:$0xff] }
 0x4e8   :  { %v2358_v33 = vpop.eup %2357 }
 0x4e9   :  { %v2360_v22 = vpop.eup %2359 }
 0x4ea   :  { %v2362_v25 = vpop.eup %2361  ;;  %v1245_v28 = vmul.f32 %v2360_v22, %v2358_v33  ;;  %v4412_v33 = vld [vmem:[#allocation14_spill] sm:$0xff]  ;;  %v4413_v22 = vld [vmem:[#allocation9_spill] sm:$0xff] }
 0x4eb   :  { %v2364_v41 = vpop.eup %2363  ;;  %v1243_v34 = vmul.f32 %v2362_v25, %v3741_v26  ;;  %v4414_v25 = vld [vmem:[#allocation16_spill] sm:$0xff] }
 0x4ec   :  { %v2366_v30 = vpop.eup %2365  ;;  %v1238_v29 = vadd.f32 1.0, %v2364_v41  ;;  %v4416_v41 = vld [vmem:[#allocation18_spill] sm:$0xff] }
 0x4ed   :  { %v2368_v39 = vpop.eup %2367  ;;  %v3849_v43 = vadd.f32 %v1245_v28, %v1243_v34  ;;  %v4417_v28 = vld [vmem:[#allocation11_spill] sm:$0xff]  ;;  %v4418_v34 = vld [vmem:[#allocation20_spill] sm:$0xff] }
 0x4ee   :  { %v2370_v36 = vpop.eup %2369  ;;  %v1246_v35 = vmul.f32 %v2368_v39, %v2366_v30  ;;  %v4419_v30 = vld [vmem:[#allocation12_spill] sm:$0xff]  ;;  %v4420_v39 = vld [vmem:[#allocation22_spill] sm:$0xff] }
 0x4ef   :  { %2373 = vtanh.f32 %v3849_v43  ;;  %v1244_v50 = vmul.f32 %v2370_v36, %v3745_v23  ;;  %v2372_v58 = vpop.eup %2371  ;;  %v4411_v23 = vld [vmem:[#allocation32_spill] sm:$0xff]  ;;  %v4421_v36 = vld [vmem:[#allocation13_spill] sm:$0xff] }
 0x4f0   :  { %2375 = vrcp.f32 %v1238_v29  ;;  %v4422_v29 = vld [vmem:[#allocation24_spill] sm:$0xff] }
 0x4f1   :  { %v3853_v21 = vadd.f32 %v1246_v35, %v1244_v50  ;;  %v4423_v35 = vld [vmem:[#allocation15_spill] sm:$0xff]  ;;  %v4424_v50 = vld [vmem:[#allocation26_spill] sm:$0xff] }
 0x4f3   :  { %2377 = vtanh.f32 %v3853_v21 }
 0x4fc   :  { %v2374_v32 = vpop.eup %2373 }
 0x4fd   :  { %v1251_v26 = vmul.f32 %v2374_v32, %v2372_v58  ;;  %v2376_v37 = vpop.eup %2375  ;;  %v4425_v58 = vld [vmem:[#allocation17_spill] sm:$0xff]  ;;  %v4426_v32 = vld [vmem:[#allocation27_spill] sm:$0xff] }
 0x4ff   :  { %1335 = vmatmul.mubr.f32.vlgmr.msra.gmra.mxu0 %v1251_v26  ;;  %1412 = vmatmul.mubr.f32.vlgmr.msra.gmra.mxu1 %v1251_v26  ;;  %v4427_v26 = vld [vmem:[#allocation19_spill] sm:$0xff] }
 0x500   :  { %v2378_v27 = vpop.eup %2377  ;;  %1340 = vmatprep.mubr.f32.mxu0 %v4304_v48  ;;  %1417 = vmatprep.mubr.f32.mxu1 %v4304_v48 }
 0x501   :  { %v1252_v31 = vmul.f32 %v2378_v27, %v2376_v37  ;;  %1498 = vmatpush1.msra.mxu0 %v3335_v53  ;;  %1575 = vmatpush1.msra.mxu1 %v3341_v45  ;;  %v4428_v37 = vld [vmem:[#allocation28_spill] sm:$0xff]  ;;  %v4429_v27 = vld [vmem:[#allocation21_spill] sm:$0xff] }
 0x502   :  { %1499 = vmatprep.subr.mxu0 %v3347_v52  ;;  %1576 = vmatprep.subr.mxu1 %v3353_v56 }
 0x503   :  { %1341 = vmatmul.mubr.f32.gmra.mxu0 %v1252_v31  ;;  %1418 = vmatmul.mubr.f32.gmra.mxu1 %v1252_v31  ;;  %v4430_v31 = vld [vmem:[#allocation29_spill] sm:$0xff] }
 0x504   :  { %1500 = vmatpush1.msra.mxu0 %v3359_v44  ;;  %1577 = vmatpush1.msra.mxu1 %v3365_v47 }
 0x505   :  { %1501 = vmatprep.subr.mxu0 %v3371_v40  ;;  %1578 = vmatprep.subr.mxu1 %v3377_v60 }
 0x506   :  { %1502 = vmatpush1.msra.mxu0 %v3383_v42  ;;  %1579 = vmatpush1.msra.mxu1 %v3389_v54 }
 0x507   :  { %1503 = vmatprep.subr.mxu0 %v3395_v55  ;;  %1580 = vmatprep.subr.mxu1 %v3401_v61 }
 0x508   :  { %1504 = vmatpush1.msra.mxu0 %v3407_v0  ;;  %1581 = vmatpush1.msra.mxu1 %v3413_v51 }
 0x509   :  { %1505 = vmatprep.subr.mxu0 %v3419_v38  ;;  %1582 = vmatprep.subr.mxu1 %v3425_v62 }
 0x50a   :  { %1506 = vmatpush1.msra.mxu0 %v3431_v59  ;;  %1583 = vmatpush1.msra.mxu1 %v3437_v9 }
 0x50b   :  { %1507 = vmatprep.subr.mxu0 %v3443_v57  ;;  %1584 = vmatprep.subr.mxu1 %v3449_v46 }
 0x50c   :  { %1508 = vmatpush1.msra.mxu0 %v3455_v4  ;;  %1585 = vmatpush1.msra.mxu1 %v3461_v1 }
 0x50d   :  { %1509 = vmatprep.subr.mxu0 %v3467_v2  ;;  %1586 = vmatprep.subr.mxu1 %v3473_v3 }
 0x50e   :  { %1510 = vmatpush1.msra.mxu0 %v3479_v5  ;;  %1587 = vmatpush1.msra.mxu1 %v3485_v6 }
 0x50f   :  { %1511 = vmatprep.subr.mxu0 %v3491_v7  ;;  %1588 = vmatprep.subr.mxu1 %v3497_v8 }
 0x510   :  { %1512 = vmatpush1.msra.mxu0 %v3503_v10  ;;  %1589 = vmatpush1.msra.mxu1 %v3509_v11 }
 0x511   :  { %1513 = vmatprep.subr.mxu0 %v3515_v12  ;;  %1590 = vmatprep.subr.mxu1 %v3521_v13 }
 0x512   :  { %1514 = vmatpush1.msra.mxu0 %v3527_v14  ;;  %1591 = vmatpush1.msra.mxu1 %v3533_v15 }
 0x513   :  { %1515 = vmatprep.subr.mxu0 %v3539_v16  ;;  %1592 = vmatprep.subr.mxu1 %v3545_v17 }
 0x514   :  { %1516 = vmatpush1.msra.mxu0 %v3551_v18  ;;  %1593 = vmatpush1.msra.mxu1 %v3557_v19 }
 0x515   :  { %1517 = vmatprep.subr.mxu0 %v3563_v20  ;;  %1594 = vmatprep.subr.mxu1 %v4411_v23  ;;  %v4437_v23 = vld [vmem:[#allocation34_spill] sm:$0xff] }
 0x516   :  { %1518 = vmatpush1.msra.mxu0 %v4412_v33  ;;  %1595 = vmatpush1.msra.mxu1 %v4413_v22 }
 0x517   :  { %1519 = vmatprep.subr.mxu0 %v4414_v25  ;;  %1596 = vmatprep.subr.mxu1 %v4415_v24 }
 0x518   :  { %1520 = vmatpush1.msra.mxu0 %v4416_v41  ;;  %1597 = vmatpush1.msra.mxu1 %v4417_v28 }
 0x519   :  { %1521 = vmatprep.subr.mxu0 %v4418_v34  ;;  %1598 = vmatprep.subr.mxu1 %v4419_v30 }
 0x51a   :  { %1522 = vmatpush1.msra.mxu0 %v4420_v39  ;;  %1599 = vmatpush1.msra.mxu1 %v4421_v36  ;;  %v4431_v39 = vld [vmem:[#allocation23_spill] sm:$0xff]  ;;  %v4432_v36 = vld [vmem:[#allocation30_spill] sm:$0xff] }
 0x51b   :  { %1523 = vmatprep.subr.mxu0 %v4422_v29  ;;  %1600 = vmatprep.subr.mxu1 %v4423_v35  ;;  %v4433_v35 = vld [vmem:[#allocation25_spill] sm:$0xff] }
 0x51c   :  { %1524 = vmatpush1.msra.mxu0 %v4424_v50  ;;  %1601 = vmatpush1.msra.mxu1 %v4425_v58  ;;  %v4434_v58 = vld [vmem:[#allocation7_spill] sm:$0xff] }
 0x51d   :  { %1525 = vmatprep.subr.mxu0 %v4426_v32  ;;  %1602 = vmatprep.subr.mxu1 %v4427_v26  ;;  %v4435_v32 = vld [vmem:[#allocation8_spill] sm:$0xff] }
 0x51e   :  { %1526 = vmatpush1.msra.mxu0 %v4428_v37  ;;  %1603 = vmatpush1.msra.mxu1 %v4429_v27  ;;  %v2119_v27 = vld [vmem:[%s4160_s0 + $0x140] sm:$0xff] }
 0x51f   :  { %1527 = vmatprep.subr.mxu0 %v4430_v31  ;;  %1604 = vmatprep.subr.mxu1 %v4431_v39  ;;  %v2120_v39 = vld [vmem:[%s4160_s0 + $0x148] sm:$0xff]  ;;  %v4436_v31 = vld [vmem:[#allocation33_spill] sm:$0xff] }
 0x520   :  { %1528 = vmatpush1.msra.mxu0 %v4432_v36  ;;  %1561 = vmatprep.mubr.f32.mxu0 %v4304_v48  ;;  %v1262_v36 = vadd.f32 %v2119_v27, %v4332_v49  ;;  %v1263_v37 = vadd.f32 %v2120_v39, %v4436_v31  ;;  %v2122_v39 = vld [vmem:[%s4160_s0 + $0x158] sm:$0xff] }
 0x521   :  { %1605 = vmatpush1.msra.mxu1 %v4433_v35  ;;  %1638 = vmatprep.mubr.f32.mxu1 %v4304_v48  ;;  %v2123_v35 = vld [vmem:[%s4160_s0 + $0x160] sm:$0xff] }
 0x522   :  { %1724 = vmatprep.subr.mxu0 %v4434_v58  ;;  %1801 = vmatprep.subr.mxu1 %v4435_v32  ;;  %v2124_v58 = vld [vmem:[%s4160_s0 + $0x168] sm:$0xff]  ;;  %v1266_v29 = vadd.f32 %v2123_v35, %v4332_v49  ;;  %v1265_v35 = vadd.f32 %v2122_v39, %v4437_v23 }
 0x523   :  { %v1267_v27 = vadd.f32 %v2124_v58, %v4436_v31 }
 0x5bf   :  { %v1336_v26 = vpop.f32.mrf.mxu0  ;;  %v1413_v50 = vpop.f32.mrf.mxu1 }
 0x5c0   :  { %v1424_v32 = vadd.f32 %v1336_v26, %v1262_v36 }
 0x5c1   :  { %v1338_v30 = vpop.f32.mrf.mxu0  ;;  %v1415_v25 = vpop.f32.mrf.mxu1 }
 0x5c2   :  { %v2127_v34 = vmul.f32 -1.442695, %v1424_v32  ;;  %v1425_v28 = vadd.f32 %v1338_v30, %v1263_v37  ;;  %v1427_v37 = vadd.f32 %v1415_v25, %v1265_v35 }
 0x5c3   :  { %v1342_v41 = vpop.f32.mrf.mxu0  ;;  %v1419_v32 = vpop.f32.mrf.mxu1 }
 0x5c4   :  { %2379 = vpow2.f32 %v2127_v34  ;;  %v2129_v24 = vmul.f32 -1.442695, %v1425_v28  ;;  %v1428_v22 = vadd.f32 %v1342_v41, %v1266_v29  ;;  %v2126_v34 = vld [vmem:[%s4160_s0 + $0x178] sm:$0xff]  ;;  %v2121_v28 = vld [vmem:[%s4160_s0 + $0x150] sm:$0xff]  ;;  %v2131_v29 = vmul.f32 -1.442695, %v1427_v37 }
 0x5c5   :  { %v1344_v33 = vpop.f32.mrf.mxu0  ;;  %v1269_v41 = vadd.f32 %v2126_v34, %v4437_v23 }
 0x5c6   :  { %2381 = vpow2.f32 %v2129_v24  ;;  %v2128_v36 = vmul.f32 -1.442695, %v1428_v22  ;;  %v1429_v26 = vadd.f32 %v1344_v33, %v1267_v27  ;;  %v1421_v24 = vpop.f32.mrf.mxu1  ;;  %v1264_v33 = vadd.f32 %v2121_v28, %v3083_v63  ;;  %v2125_v22 = vld [vmem:[%s4160_s0 + $0x170] sm:$0xff] }
 0x5c7   :  { %v1431_v58 = vadd.f32 %v1421_v24, %v1269_v41 }
 0x5c8   :  { %2383 = vpow2.f32 %v2128_v36  ;;  %v2130_v30 = vmul.f32 -1.442695, %v1429_v26  ;;  %v1426_v39 = vadd.f32 %v1413_v50, %v1264_v33  ;;  %v1268_v36 = vadd.f32 %v2125_v22, %v3083_v63 }
 0x5ca   :  { %2385 = vpow2.f32 %v2130_v30  ;;  %v2132_v30 = vmul.f32 -1.442695, %v1431_v58  ;;  %v1430_v34 = vadd.f32 %v1419_v32, %v1268_v36 }
 0x5cb   :  { %2387 = vpow2.f32 %v2131_v29 }
 0x5d1   :  { %v2380_v27 = vpop.eup %2379 }
 0x5d2   :  { %v1438_v26 = vadd.f32 1.0, %v2380_v27 }
 0x5d3   :  { %v2382_v31 = vpop.eup %2381 }
 0x5d4   :  { %2389 = vrcp.f32 %v1438_v26  ;;  %v1450_v25 = vadd.f32 1.0, %v2382_v31 }
 0x5d5   :  { %v2384_v35 = vpop.eup %2383  ;;  %2391 = vtanh.f32 %v1426_v39 }
 0x5d6   :  { %2393 = vrcp.f32 %v1450_v25  ;;  %v1439_v28 = vadd.f32 1.0, %v2384_v35 }
 0x5d7   :  { %v2386_v23 = vpop.eup %2385  ;;  %2395 = vpow2.f32 %v2132_v30 }
 0x5d8   :  { %2397 = vrcp.f32 %v1439_v28  ;;  %v1451_v37 = vadd.f32 1.0, %v2386_v23  ;;  %v2388_v50 = vpop.eup %2387 }
 0x5d9   :  { %2399 = vtanh.f32 %v1430_v34  ;;  %v1464_v22 = vadd.f32 1.0, %v2388_v50 }
 0x5da   :  { %2401 = vrcp.f32 %v1451_v37 }
 0x5db   :  { %2403 = vrcp.f32 %v1464_v22 }
 0x5e1   :  { %v2390_v41 = vpop.eup %2389 }
 0x5e2   :  { %v2392_v24 = vpop.eup %2391 }
 0x5e3   :  { %v2394_v33 = vpop.eup %2393  ;;  %v1472_v58 = vmul.f32 %v2392_v24, %v2390_v41  ;;  %v2136_v41 = vld [vmem:[%s4160_s0 + $0x198] sm:$0xff] }
 0x5e4   :  { %v2396_v29 = vpop.eup %2395  ;;  %v1470_v31 = vmul.f32 %v2394_v33, %v3849_v43 }
 0x5e5   :  { %v2398_v27 = vpop.eup %2397  ;;  %v1465_v26 = vadd.f32 1.0, %v2396_v29 }
 0x5e6   :  { %v2400_v39 = vpop.eup %2399  ;;  %v3957_v32 = vadd.f32 %v1472_v58, %v1470_v31  ;;  %v4462_v31 = vld [vmem:[#allocation34_spill] sm:$0xff] }
 0x5e7   :  { %v2402_v36 = vpop.eup %2401  ;;  %v1473_v23 = vmul.f32 %v2400_v39, %v2398_v27  ;;  %v1492_v27 = vadd.f32 %v2136_v41, %v4462_v31  ;;  %v1948_v41 = vld [vmem:[%s4163_s3 + $0x38] sm:$0xff] }
 0x5e8   :  { %2405 = vtanh.f32 %v3957_v32  ;;  %v1471_v30 = vmul.f32 %v2402_v36, %v3853_v21  ;;  %v2404_v35 = vpop.eup %2403 }
 0x5e9   :  { %2407 = vrcp.f32 %v1465_v26  ;;  %v2140_v26 = vld [vmem:[%s4160_s0 + $0x1b8] sm:$0xff] }
 0x5ea   :  { %v3961_v25 = vadd.f32 %v1473_v23, %v1471_v30  ;;  %v2135_v23 = vld [vmem:[%s4160_s0 + $0x190] sm:$0xff] }
 0x5ec   :  { %2409 = vtanh.f32 %v3961_v25 }
 0x5f5   :  { %v2406_v34 = vpop.eup %2405 }
 0x5f6   :  { %v1478_v43 = vmul.f32 %v2406_v34, %v2404_v35  ;;  %v2408_v28 = vpop.eup %2407  ;;  %v1496_v35 = vadd.f32 %v2140_v26, %v4462_v31  ;;  %v2148_v26 = vld [vmem:[%s4160_s0 + $0x1c8] sm:$0xff] }
 0x5f8   :  { %1562 = vmatmul.mubr.f32.vlgmr.msra.gmra.mxu0 %v1478_v43  ;;  %1639 = vmatmul.mubr.f32.vlgmr.msra.gmra.mxu1 %v1478_v43  ;;  %v1491_v43 = vadd.f32 %v2135_v23, %v3083_v63 }
 0x5f9   :  { %v2410_v37 = vpop.eup %2409  ;;  %1567 = vmatprep.mubr.f32.mxu0 %v4304_v48  ;;  %1644 = vmatprep.mubr.f32.mxu1 %v4304_v48 }
 0x5fa   :  { %v1479_v50 = vmul.f32 %v2410_v37, %v2408_v28  ;;  %1725 = vmatpush1.msra.mxu0 %v3335_v53  ;;  %1802 = vmatpush1.msra.mxu1 %v3341_v45  ;;  %v4438_v53 = vld [vmem:[#allocation32_spill] sm:$0xff]  ;;  %v4439_v45 = vld [vmem:[#allocation14_spill] sm:$0xff]  ;;  %v2139_v28 = vld [vmem:[%s4160_s0 + $0x1b0] sm:$0xff] }
 0x5fb   :  { %1726 = vmatprep.subr.mxu0 %v3347_v52  ;;  %1803 = vmatprep.subr.mxu1 %v3353_v56  ;;  %v4440_v52 = vld [vmem:[#allocation9_spill] sm:$0xff]  ;;  %v4441_v56 = vld [vmem:[#allocation16_spill] sm:$0xff] }
 0x5fc   :  { %1568 = vmatmul.mubr.f32.gmra.mxu0 %v1479_v50  ;;  %1645 = vmatmul.mubr.f32.gmra.mxu1 %v1479_v50 }
 0x5fd   :  { %1727 = vmatpush1.msra.mxu0 %v3359_v44  ;;  %1804 = vmatpush1.msra.mxu1 %v3365_v47  ;;  %v4442_v44 = vld [vmem:[#allocation10_spill] sm:$0xff] }
 0x5fe   :  { %1728 = vmatprep.subr.mxu0 %v3371_v40  ;;  %1805 = vmatprep.subr.mxu1 %v3377_v60  ;;  %v4443_v47 = vld [vmem:[#allocation18_spill] sm:$0xff]  ;;  %v4444_v40 = vld [vmem:[#allocation11_spill] sm:$0xff]  ;;  %v4445_v60 = vld [vmem:[#allocation20_spill] sm:$0xff] }
 0x5ff   :  { %1729 = vmatpush1.msra.mxu0 %v3383_v42  ;;  %1806 = vmatpush1.msra.mxu1 %v3389_v54  ;;  %v4446_v42 = vld [vmem:[#allocation12_spill] sm:$0xff]  ;;  %v4447_v54 = vld [vmem:[#allocation22_spill] sm:$0xff] }
 0x600   :  { %1730 = vmatprep.subr.mxu0 %v3395_v55  ;;  %1807 = vmatprep.subr.mxu1 %v3401_v61  ;;  %v4448_v55 = vld [vmem:[#allocation13_spill] sm:$0xff]  ;;  %v4449_v61 = vld [vmem:[#allocation24_spill] sm:$0xff] }
 0x601   :  { %1731 = vmatpush1.msra.mxu0 %v3407_v0  ;;  %1808 = vmatpush1.msra.mxu1 %v3413_v51  ;;  %v4450_v0 = vld [vmem:[#allocation15_spill] sm:$0xff]  ;;  %v4451_v51 = vld [vmem:[#allocation26_spill] sm:$0xff] }
 0x602   :  { %1732 = vmatprep.subr.mxu0 %v3419_v38  ;;  %1809 = vmatprep.subr.mxu1 %v3425_v62  ;;  %v4452_v38 = vld [vmem:[#allocation17_spill] sm:$0xff]  ;;  %v4453_v62 = vld [vmem:[#allocation27_spill] sm:$0xff] }
 0x603   :  { %1733 = vmatpush1.msra.mxu0 %v3431_v59  ;;  %1810 = vmatpush1.msra.mxu1 %v3437_v9  ;;  %v4454_v59 = vld [vmem:[#allocation19_spill] sm:$0xff]  ;;  %v4455_v9 = vld [vmem:[#allocation28_spill] sm:$0xff] }
 0x604   :  { %1734 = vmatprep.subr.mxu0 %v3443_v57  ;;  %1811 = vmatprep.subr.mxu1 %v3449_v46  ;;  %v4456_v57 = vld [vmem:[#allocation21_spill] sm:$0xff] }
 0x605   :  { %1735 = vmatpush1.msra.mxu0 %v3455_v4  ;;  %1812 = vmatpush1.msra.mxu1 %v3461_v1  ;;  %v4457_v46 = vld [vmem:[#allocation29_spill] sm:$0xff]  ;;  %v4458_v4 = vld [vmem:[#allocation23_spill] sm:$0xff]  ;;  %v4459_v1 = vld [vmem:[#allocation30_spill] sm:$0xff] }
 0x606   :  { %1736 = vmatprep.subr.mxu0 %v3467_v2  ;;  %1813 = vmatprep.subr.mxu1 %v3473_v3  ;;  %v4460_v2 = vld [vmem:[#allocation25_spill] sm:$0xff] }
 0x607   :  { %1737 = vmatpush1.msra.mxu0 %v3479_v5  ;;  %1814 = vmatpush1.msra.mxu1 %v3485_v6  ;;  %v2133_v3 = vld [vmem:[%s4160_s0 + $0x180] sm:$0xff]  ;;  %v2134_v5 = vld [vmem:[%s4160_s0 + $0x188] sm:$0xff] }
 0x608   :  { %1738 = vmatprep.subr.mxu0 %v3491_v7  ;;  %1815 = vmatprep.subr.mxu1 %v3497_v8  ;;  %v1489_v6 = vadd.f32 %v2133_v3, %v4332_v49  ;;  %v2137_v7 = vld [vmem:[%s4160_s0 + $0x1a0] sm:$0xff] }
 0x609   :  { %1739 = vmatpush1.msra.mxu0 %v3503_v10  ;;  %1816 = vmatpush1.msra.mxu1 %v3509_v11  ;;  %v4461_v8 = vld [vmem:[#allocation33_spill] sm:$0xff] }
 0x60a   :  { %1740 = vmatprep.subr.mxu0 %v3515_v12  ;;  %1817 = vmatprep.subr.mxu1 %v3521_v13  ;;  %v1490_v10 = vadd.f32 %v2134_v5, %v4461_v8  ;;  %v2138_v12 = vld [vmem:[%s4160_s0 + $0x1a8] sm:$0xff] }
 0x60b   :  { %1741 = vmatpush1.msra.mxu0 %v3527_v14  ;;  %1818 = vmatpush1.msra.mxu1 %v3533_v15  ;;  %v1493_v15 = vadd.f32 %v2137_v7, %v4332_v49 }
 0x60c   :  { %1742 = vmatprep.subr.mxu0 %v3539_v16  ;;  %1819 = vmatprep.subr.mxu1 %v3545_v17 }
 0x60d   :  { %1743 = vmatpush1.msra.mxu0 %v3551_v18  ;;  %1820 = vmatpush1.msra.mxu1 %v3557_v19  ;;  %v1494_v19 = vadd.f32 %v2138_v12, %v4461_v8 }
 0x60e   :  { %1744 = vmatprep.subr.mxu0 %v3563_v20  ;;  %1821 = vmatprep.subr.mxu1 %v4438_v53 }
 0x60f   :  { %1745 = vmatpush1.msra.mxu0 %v4439_v45  ;;  %1822 = vmatpush1.msra.mxu1 %v4440_v52  ;;  %v1495_v52 = vadd.f32 %v2139_v28, %v3083_v63 }
 0x610   :  { %1746 = vmatprep.subr.mxu0 %v4441_v56  ;;  %1823 = vmatprep.subr.mxu1 %v4442_v44 }
 0x611   :  { %1747 = vmatpush1.msra.mxu0 %v4443_v47  ;;  %1824 = vmatpush1.msra.mxu1 %v4444_v40 }
 0x612   :  { %1748 = vmatprep.subr.mxu0 %v4445_v60  ;;  %1825 = vmatprep.subr.mxu1 %v4446_v42 }
 0x613   :  { %1749 = vmatpush1.msra.mxu0 %v4447_v54  ;;  %1826 = vmatpush1.msra.mxu1 %v4448_v55 }
 0x614   :  { %1750 = vmatprep.subr.mxu0 %v4449_v61  ;;  %1827 = vmatprep.subr.mxu1 %v4450_v0 }
 0x615   :  { %1751 = vmatpush1.msra.mxu0 %v4451_v51  ;;  %1828 = vmatpush1.msra.mxu1 %v4452_v38 }
 0x616   :  { %1752 = vmatprep.subr.mxu0 %v4453_v62  ;;  %1829 = vmatprep.subr.mxu1 %v4454_v59 }
 0x617   :  { %1753 = vmatpush1.msra.mxu0 %v4455_v9  ;;  %1830 = vmatpush1.msra.mxu1 %v4456_v57 }
 0x618   :  { %1754 = vmatprep.subr.mxu0 %v4457_v46  ;;  %1831 = vmatprep.subr.mxu1 %v4458_v4 }
 0x619   :  { %1755 = vmatpush1.msra.mxu0 %v4459_v1  ;;  %1788 = vmatprep.mubr.f32.mxu0 %v4304_v48 }
 0x61a   :  { %1832 = vmatpush1.msra.mxu1 %v4460_v2  ;;  %1865 = vmatprep.mubr.f32.mxu1 %v4304_v48 }
 0x6b8   :  { %v1563_v11 = vpop.f32.mrf.mxu0  ;;  %v1640_v14 = vpop.f32.mrf.mxu1 }
 0x6b9   :  { %v1651_v13 = vadd.f32 %v1563_v11, %v1489_v6  ;;  %v1653_v45 = vadd.f32 %v1640_v14, %v1491_v43  ;;  %v2152_v43 = vld [vmem:[%s4160_s0 + $0x1e8] sm:$0xff] }
 0x6ba   :  { %v1565_v16 = vpop.f32.mrf.mxu0  ;;  %v1642_v24 = vpop.f32.mrf.mxu1 }
 0x6bb   :  { %v2141_v17 = vmul.f32 -1.442695, %v1651_v13  ;;  %v1652_v18 = vadd.f32 %v1565_v16, %v1490_v10  ;;  %v1654_v30 = vadd.f32 %v1642_v24, %v1492_v27  ;;  %v1955_v16 = vld [vmem:[%s4163_s3 + $0x70] sm:$0xff]  ;;  %v1942_v27 = vld [vmem:[%s4163_s3 + $0x8] sm:$0xff] }
 0x6bc   :  { %v1569_v20 = vpop.f32.mrf.mxu0  ;;  %v1646_v39 = vpop.f32.mrf.mxu1  ;;  %v1947_v24 = vld [vmem:[%s4163_s3 + $0x30] sm:$0xff] }
 0x6bd   :  { %2411 = vpow2.f32 %v2141_v17  ;;  %v2143_v21 = vmul.f32 -1.442695, %v1652_v18  ;;  %v1655_v33 = vadd.f32 %v1569_v20, %v1493_v15  ;;  %v2145_v37 = vmul.f32 -1.442695, %v1654_v30  ;;  %v1954_v17 = vld [vmem:[%s4163_s3 + $0x68] sm:$0xff]  ;;  %v1952_v18 = vld [vmem:[%s4163_s3 + $0x58] sm:$0xff] }
 0x6be   :  { %v1571_v22 = vpop.f32.mrf.mxu0  ;;  %v1648_v34 = vpop.f32.mrf.mxu1  ;;  %v1657_v42 = vadd.f32 %v1646_v39, %v1495_v52  ;;  %v1950_v20 = vld [vmem:[%s4163_s3 + $0x48] sm:$0xff]  ;;  %v1941_v39 = vld [vmem:[%s4163_s3] sm:$0xff] }
 0x6bf   :  { %2413 = vpow2.f32 %v2143_v21  ;;  %v2142_v29 = vmul.f32 -1.442695, %v1655_v33  ;;  %v1656_v58 = vadd.f32 %v1571_v22, %v1494_v19  ;;  %v1658_v50 = vadd.f32 %v1648_v34, %v1496_v35  ;;  %v1951_v19 = vld [vmem:[%s4163_s3 + $0x50] sm:$0xff]  ;;  %v1949_v21 = vld [vmem:[%s4163_s3 + $0x40] sm:$0xff]  ;;  %v1946_v33 = vld [vmem:[%s4163_s3 + $0x28] sm:$0xff] }
 0x6c0   :  { %v1945_v22 = vld [vmem:[%s4163_s3 + $0x20] sm:$0xff]  ;;  %v1717_v35 = vadd.f32 %v2148_v26, %v4461_v8 }
 0x6c1   :  { %2415 = vpow2.f32 %v2142_v29  ;;  %v2144_v36 = vmul.f32 -1.442695, %v1656_v58  ;;  %v2146_v47 = vmul.f32 -1.442695, %v1658_v50  ;;  %v1944_v29 = vld [vmem:[%s4163_s3 + $0x18] sm:$0xff]  ;;  %v1943_v58 = vld [vmem:[%s4163_s3 + $0x10] sm:$0xff] }
 0x6c2   :  { %v2151_v30 = vld [vmem:[%s4160_s0 + $0x1e0] sm:$0xff] }
 0x6c3   :  { %2417 = vpow2.f32 %v2144_v36  ;;  %v2147_v36 = vld [vmem:[%s4160_s0 + $0x1c0] sm:$0xff]  ;;  %v1720_v50 = vadd.f32 %v2151_v30, %v4332_v49 }
 0x6c4   :  { %2419 = vpow2.f32 %v2145_v37  ;;  %v1716_v23 = vadd.f32 %v2147_v36, %v4332_v49 }
 0x6ca   :  { %v2412_v53 = vpop.eup %2411 }
 0x6cb   :  { %v1665_v56 = vadd.f32 1.0, %v2412_v53 }
 0x6cc   :  { %v2414_v44 = vpop.eup %2413 }
 0x6cd   :  { %2421 = vrcp.f32 %v1665_v56  ;;  %v1677_v40 = vadd.f32 1.0, %v2414_v44  ;;  %v1721_v56 = vadd.f32 %v2152_v43, %v4461_v8  ;;  %v2154_v8 = vld [vmem:[%s4160_s0 + $0x1f8] sm:$0xff] }
 0x6ce   :  { %v2416_v60 = vpop.eup %2415  ;;  %2423 = vtanh.f32 %v1653_v45 }
 0x6cf   :  { %2425 = vrcp.f32 %v1677_v40  ;;  %v1666_v54 = vadd.f32 1.0, %v2416_v60  ;;  %v2150_v40 = vld [vmem:[%s4160_s0 + $0x1d8] sm:$0xff] }
 0x6d0   :  { %v2418_v55 = vpop.eup %2417  ;;  %2427 = vpow2.f32 %v2146_v47  ;;  %v1719_v49 = vadd.f32 %v2150_v40, %v4462_v31 }
 0x6d1   :  { %2429 = vrcp.f32 %v1666_v54  ;;  %v1678_v61 = vadd.f32 1.0, %v2418_v55  ;;  %v2420_v0 = vpop.eup %2419 }
 0x6d2   :  { %2431 = vtanh.f32 %v1657_v42  ;;  %v1691_v59 = vadd.f32 1.0, %v2420_v0 }
 0x6d3   :  { %2433 = vrcp.f32 %v1678_v61 }
 0x6d4   :  { %2435 = vrcp.f32 %v1691_v59  ;;  %v1723_v59 = vadd.f32 %v2154_v8, %v4462_v31 }
 0x6da   :  { %v2422_v51 = vpop.eup %2421 }
 0x6db   :  { %v2424_v38 = vpop.eup %2423 }
 0x6dc   :  { %v2426_v62 = vpop.eup %2425  ;;  %v1699_v57 = vmul.f32 %v2424_v38, %v2422_v51  ;;  %v2149_v38 = vld [vmem:[%s4160_s0 + $0x1d0] sm:$0xff] }
 0x6dd   :  { %v2428_v9 = vpop.eup %2427  ;;  %v1697_v46 = vmul.f32 %v2426_v62, %v3957_v32 }
 0x6de   :  { %v2430_v4 = vpop.eup %2429  ;;  %v1692_v5 = vadd.f32 1.0, %v2428_v9 }
 0x6df   :  { %v2432_v1 = vpop.eup %2431  ;;  %v4063_v2 = vadd.f32 %v1699_v57, %v1697_v46  ;;  %v1718_v57 = vadd.f32 %v2149_v38, %v3083_v63  ;;  %v2153_v46 = vld [vmem:[%s4160_s0 + $0x1f0] sm:$0xff] }
 0x6e0   :  { %v2434_v3 = vpop.eup %2433  ;;  %v1700_v6 = vmul.f32 %v2432_v1, %v2430_v4 }
 0x6e1   :  { %2437 = vtanh.f32 %v4063_v2  ;;  %v1698_v7 = vmul.f32 %v2434_v3, %v3961_v25  ;;  %v2436_v11 = vpop.eup %2435  ;;  %v1956_v25 = vld [vmem:[%s4163_s3 + $0x78] sm:$0xff] }
 0x6e2   :  { %2439 = vrcp.f32 %v1692_v5  ;;  %2180 = vmatprep.subr.mxu0 %v1956_v25 }
 0x6e3   :  { %v4067_v10 = vadd.f32 %v1700_v6, %v1698_v7  ;;  %v1722_v6 = vadd.f32 %v2153_v46, %v3083_v63 }
 0x6e5   :  { %2441 = vtanh.f32 %v4067_v10 }
 0x6ee   :  { %v2438_v12 = vpop.eup %2437 }
 0x6ef   :  { %v1705_v32 = vmul.f32 %v2438_v12, %v2436_v11  ;;  %v2440_v13 = vpop.eup %2439 }
 0x6f1   :  { %1789 = vmatmul.mubr.f32.vlgmr.msra.gmra.mxu0 %v1705_v32  ;;  %1866 = vmatmul.mubr.f32.vlgmr.msra.gmra.mxu1 %v1705_v32 }
 0x6f2   :  { %v2442_v14 = vpop.eup %2441  ;;  %1794 = vmatprep.mubr.f32.mxu0 %v4304_v48  ;;  %1871 = vmatprep.mubr.f32.mxu1 %v4304_v48  ;;  %v1953_v48 = vld [vmem:[%s4163_s3 + $0x60] sm:$0xff] }
 0x6f3   :  { %v1706_v15 = vmul.f32 %v2442_v14, %v2440_v13  ;;  %2181 = vmatpush3.msra.mxu0 %v1956_v25 }
 0x6f4   :  { %2182 = vmatprep.subr.mxu0 %v1955_v16 }
 0x6f5   :  { %1795 = vmatmul.mubr.f32.gmra.mxu0 %v1706_v15  ;;  %1872 = vmatmul.mubr.f32.gmra.mxu1 %v1706_v15 }
 0x6f6   :  { %2183 = vmatpush3.msra.mxu0 %v1955_v16 }
 0x6f7   :  { %2184 = vmatprep.subr.mxu0 %v1954_v17 }
 0x6f8   :  { %2185 = vmatpush3.msra.mxu0 %v1954_v17 }
 0x6f9   :  { %2186 = vmatprep.subr.mxu0 %v1953_v48 }
 0x6fa   :  { %2187 = vmatpush3.msra.mxu0 %v1953_v48 }
 0x6fb   :  { %2188 = vmatprep.subr.mxu0 %v1952_v18 }
 0x6fc   :  { %2189 = vmatpush3.msra.mxu0 %v1952_v18 }
 0x6fd   :  { %2190 = vmatprep.subr.mxu0 %v1951_v19 }
 0x6fe   :  { %2191 = vmatpush3.msra.mxu0 %v1951_v19 }
 0x6ff   :  { %2192 = vmatprep.subr.mxu0 %v1950_v20 }
 0x700   :  { %2193 = vmatpush3.msra.mxu0 %v1950_v20 }
 0x701   :  { %2194 = vmatprep.subr.mxu0 %v1949_v21 }
 0x702   :  { %2195 = vmatpush3.msra.mxu0 %v1949_v21 }
 0x703   :  { %2196 = vmatprep.subr.mxu0 %v1948_v41 }
 0x704   :  { %2197 = vmatpush3.msra.mxu0 %v1948_v41 }
 0x705   :  { %2198 = vmatprep.subr.mxu0 %v1947_v24 }
 0x706   :  { %2199 = vmatpush3.msra.mxu0 %v1947_v24 }
 0x707   :  { %2200 = vmatprep.subr.mxu0 %v1946_v33 }
 0x708   :  { %2201 = vmatpush3.msra.mxu0 %v1946_v33 }
 0x709   :  { %2202 = vmatprep.subr.mxu0 %v1945_v22 }
 0x70a   :  { %2203 = vmatpush3.msra.mxu0 %v1945_v22 }
 0x70b   :  { %2204 = vmatprep.subr.mxu0 %v1944_v29 }
 0x70c   :  { %2205 = vmatpush3.msra.mxu0 %v1944_v29 }
 0x70d   :  { %2206 = vmatprep.subr.mxu0 %v1943_v58 }
 0x70e   :  { %2207 = vmatpush3.msra.mxu0 %v1943_v58 }
 0x70f   :  { %2208 = vmatprep.subr.mxu0 %v1942_v27 }
 0x710   :  { %2209 = vmatpush3.msra.mxu0 %v1942_v27 }
 0x711   :  { %2210 = vmatprep.subr.mxu0 %v1941_v39 }
 0x712   :  { %2211 = vmatpush3.msra.mxu0 %v1941_v39 }
 0x7b1   :  { %v1790_v34 = vpop.f32.mrf.mxu0  ;;  %v1867_v37 = vpop.f32.mrf.mxu1 }
 0x7b2   :  { %v1878_v28 = vadd.f32 %v1790_v34, %v1716_v23  ;;  %v1880_v5 = vadd.f32 %v1867_v37, %v1718_v57  ;;  %v2161_v34 = vld [vmem:[%s4164_s4] ss:$0 sm:$0xff] }
 0x7b3   :  { %v1792_v53 = vpop.f32.mrf.mxu0  ;;  %v1869_v60 = vpop.f32.mrf.mxu1 }
 0x7b4   :  { %v2155_v45 = vmul.f32 -1.442695, %v1878_v28  ;;  %v1879_v52 = vadd.f32 %v1792_v53, %v1717_v35  ;;  %v1881_v62 = vadd.f32 %v1869_v60, %v1719_v49 }
 0x7b5   :  { %v1796_v44 = vpop.f32.mrf.mxu0  ;;  %v1873_v0 = vpop.f32.mrf.mxu1 }
 0x7b6   :  { %2443 = vpow2.f32 %v2155_v45  ;;  %v2157_v47 = vmul.f32 -1.442695, %v1879_v52  ;;  %v1882_v42 = vadd.f32 %v1796_v44, %v1720_v50  ;;  %v2159_v4 = vmul.f32 -1.442695, %v1881_v62 }
 0x7b7   :  { %v1798_v54 = vpop.f32.mrf.mxu0  ;;  %v1875_v9 = vpop.f32.mrf.mxu1  ;;  %v1884_v13 = vadd.f32 %v1873_v0, %v1722_v6 }
 0x7b8   :  { %2445 = vpow2.f32 %v2157_v47  ;;  %v2156_v55 = vmul.f32 -1.442695, %v1882_v42  ;;  %v1883_v61 = vadd.f32 %v1798_v54, %v1721_v56  ;;  %v1885_v1 = vadd.f32 %v1875_v9, %v1723_v59 }
 0x7ba   :  { %2447 = vpow2.f32 %v2156_v55  ;;  %v2158_v51 = vmul.f32 -1.442695, %v1883_v61  ;;  %v2160_v12 = vmul.f32 -1.442695, %v1885_v1 }
 0x7bc   :  { %2449 = vpow2.f32 %v2158_v51 }
 0x7bd   :  { %2451 = vpow2.f32 %v2159_v4 }
 0x7c3   :  { %v2444_v3 = vpop.eup %2443 }
 0x7c4   :  { %v1892_v7 = vadd.f32 1.0, %v2444_v3 }
 0x7c5   :  { %v2446_v11 = vpop.eup %2445 }
 0x7c6   :  { %2453 = vrcp.f32 %v1892_v7  ;;  %v1904_v32 = vadd.f32 1.0, %v2446_v11 }
 0x7c7   :  { %v2448_v31 = vpop.eup %2447  ;;  %2455 = vtanh.f32 %v1880_v5 }
 0x7c8   :  { %2457 = vrcp.f32 %v1904_v32  ;;  %v1893_v14 = vadd.f32 1.0, %v2448_v31 }
 0x7c9   :  { %v2450_v15 = vpop.eup %2449  ;;  %2459 = vpow2.f32 %v2160_v12 }
 0x7ca   :  { %2461 = vrcp.f32 %v1893_v14  ;;  %v1905_v25 = vadd.f32 1.0, %v2450_v15  ;;  %v2452_v16 = vpop.eup %2451 }
 0x7cb   :  { %2463 = vtanh.f32 %v1884_v13  ;;  %v1918_v18 = vadd.f32 1.0, %v2452_v16 }
 0x7cc   :  { %2465 = vrcp.f32 %v1905_v25 }
 0x7cd   :  { %2467 = vrcp.f32 %v1918_v18 }
 0x7d3   :  { %v2454_v17 = vpop.eup %2453 }
 0x7d4   :  { %v2456_v63 = vpop.eup %2455 }
 0x7d5   :  { %v2458_v48 = vpop.eup %2457  ;;  %v1926_v20 = vmul.f32 %v2456_v63, %v2454_v17 }
 0x7d6   :  { %v2460_v19 = vpop.eup %2459  ;;  %v1924_v21 = vmul.f32 %v2458_v48, %v4063_v2 }
 0x7d7   :  { %v2462_v41 = vpop.eup %2461  ;;  %v1919_v29 = vadd.f32 1.0, %v2460_v19 }
 0x7d8   :  { %v2464_v24 = vpop.eup %2463  ;;  %v1928_v33 = vadd.f32 %v1926_v20, %v1924_v21 }
 0x7d9   :  { %v2466_v22 = vpop.eup %2465  ;;  %v1927_v58 = vmul.f32 %v2464_v24, %v2462_v41 }
 0x7da   :  { %v1925_v27 = vmul.f32 %v2466_v22, %v4067_v10  ;;  %2469 = vtanh.f32 %v1928_v33  ;;  %v2468_v36 = vpop.eup %2467 }
 0x7db   :  { %2471 = vrcp.f32 %v1919_v29 }
 0x7dc   :  { %v1929_v39 = vadd.f32 %v1927_v58, %v1925_v27 }
 0x7de   :  { %2473 = vtanh.f32 %v1929_v39 }
 0x7e7   :  { %v2470_v26 = vpop.eup %2469 }
 0x7e8   :  { %v1932_v23 = vmul.f32 %v2470_v26, %v2468_v36  ;;  %v2472_v30 = vpop.eup %2471 }
 0x7ea   :  { %2212 = vmatprep.mubr.f32.mxu0 %v1932_v23 }
 0x7eb   :  { %v2474_v35 = vpop.eup %2473 }
 0x7ec   :  { %v1933_v2 = vmul.f32 %v2474_v35, %v2472_v30 }
 0x7ee   :  { %2213 = vmatmul.mubr.f32.vlgmr.msra.gmra.mxu0 %v1933_v2 }
 0x8ae   :  { %v2214_v43 = vpop.f32.mrf.mxu0 }
 0x8af   :  { %v2036_v10 = vadd.f32 %v2214_v43, %v2161_v34 }
 0x8b0   :  { %v2030_v28 = vpop.f32.mrf.mxu0 }
 0x8b1   :  { %2040 = vst [vmem:[#allocation4 + $0x8] sm:$0xff] %v2036_v10  ;;  %v2031_v37 = vadd.f32 %v2161_v34, %v2030_v28 }
 0x8b3   :  { %2039 = vst [vmem:[#allocation4] sm:$0xff] %v2031_v37 }
 0x8b4   :  { %2550 = shalt.err (!%p2547_p4)
}
 0x8b5   :  { %s2563_s23 = smov 128   ;;  %s2564_s24 = smov 8  }
 0x8b6   :  { %2052 = dma.vmem_to_hbm [thread:$0]  %s2047_s21, 256, %s4165_s5, [#allocation5], %s2563_s23, %s2563_s23, %s2564_s24  }
 0x8b7   :  { %2559 = dma.done.wait [#allocation5], 256  }
 0x8b8   :  { %2560 = vsyncadd [#allocation5], 4294967040 }
 0x8b9   :  { %2056 = vsyncpa [#allocation5], 1 }

</bundles_post_ra>
